<compile_context>
chip_gen: v7x
topology: tpu7x:2x2x1
jax: 0.10.0
libtpu: 0.0.40
codegen_flags: <defaults>
</compile_context>

<pallas_src>
import math

import jax
import jax.numpy as jnp
from jax.experimental import pallas as pl
from jax.experimental.pallas import tpu as pltpu

# ----------------------------------------------------------------------------
# Small DistilBERT-like config (scaled down from hidden=768/heads=12/layers=6)
# ----------------------------------------------------------------------------
VOCAB_SIZE = 100
MAX_POS = 32
HIDDEN = 128
NUM_HEADS = 4
HEAD_DIM = HIDDEN // NUM_HEADS
FFN_DIM = 256
NUM_LAYERS = 2
NUM_TAGS = 5
LANE = 128                       # classifier output padded to a full lane width
LN_EPS = 1e-12                   # DistilBERT LayerNorm eps
MASK_BIAS = -1e9                 # additive bias for padded key positions
VEC_WIDTH = 3 * HIDDEN           # widest packed small-vector row (QKV bias)

# row layout of the packed small-vector array `vecs` (one row = 384 lanes)
ROW_EMB_LN_G = 0
ROW_EMB_LN_B = 1
ROWS_PER_LAYER = 8               # bqkv, bo, ln1_g, ln1_b, b1, b2, ln2_g, ln2_b
ROW_LAYER_BASE = 2
ROW_CLS_B = ROW_LAYER_BASE + ROWS_PER_LAYER * NUM_LAYERS
NUM_VEC_ROWS = ((ROW_CLS_B + 1 + 7) // 8) * 8          # pad rows to multiple of 8


# ----------------------------------------------------------------------------
# Fused whole-model Pallas kernel
# ----------------------------------------------------------------------------
def _layernorm(x, gamma, beta):
    """LayerNorm over the last (lane) axis, f32 math."""
    mean = jnp.mean(x, axis=-1, keepdims=True)
    var = jnp.mean(jnp.square(x - mean), axis=-1, keepdims=True)
    inv = jax.lax.rsqrt(var + LN_EPS)
    return (x - mean) * inv * gamma + beta


def _fused_forward_kernel(
    emb_ref,     # (TB, S, H)        f32   word+pos embeddings
    bias_ref,    # (TB, 1, S)        f32   additive mask bias (0 keep / -1e9 pad)
    wqkv_ref,    # (L, H, 3H)        bf16  fused Q|K|V weights (scale folded in)
    wo_ref,      # (L, H, H)         bf16
    w1_ref,      # (L, H, F)         bf16
    w2_ref,      # (L, F, H)         bf16
    clsw_ref,    # (H, LANE)         bf16  zero-padded beyond NUM_TAGS
    vecs_ref,    # (NUM_VEC_ROWS,3H) f32   packed biases / LN params / cls bias
    logits_ref,  # (TB, LANE)        f32   output
):
    TB, S, H = emb_ref.shape
    M = TB * S
    bias = bias_ref[...]                                   # (TB, 1, S)

    def vrow(r, w):
        return vecs_ref[r:r + 1, 0:w]                      # (1, w) static slice

    # --- embedding LayerNorm (dropout is a no-op in eval) ---
    x = _layernorm(emb_ref[...].reshape(M, H),
                   vrow(ROW_EMB_LN_G, H), vrow(ROW_EMB_LN_B, H))      # (M, H)

    # --- transformer blocks (post-LN, as in DistilBERT), fully unrolled ---
    for l in range(NUM_LAYERS):
        base = ROW_LAYER_BASE + l * ROWS_PER_LAYER
        bqkv = vrow(base + 0, 3 * H)
        bo   = vrow(base + 1, H)
        ln1g = vrow(base + 2, H)
        ln1b = vrow(base + 3, H)
        b1   = vrow(base + 4, FFN_DIM)
        b2   = vrow(base + 5, H)
        ln2g = vrow(base + 6, H)
        ln2b = vrow(base + 7, H)

        # fused Q/K/V projection: one (M,128)x(128,384) MXU matmul
        qkv = jnp.dot(x.astype(jnp.bfloat16), wqkv_ref[l],
                      preferred_element_type=jnp.float32) + bqkv      # (M, 3H)
        qkv3 = qkv.reshape(TB, S, 3 * H)

        # multi-head attention: heads unrolled, each head batched over TB
        # (single batch-dim dot_general, flash-attention style); softmax in f32
        ctx_heads = []
        for h in range(NUM_HEADS):
            off = h * HEAD_DIM
            qh = qkv3[:, :, off:off + HEAD_DIM].astype(jnp.bfloat16)          # (TB,S,Dh)
            kh = qkv3[:, :, H + off:H + off + HEAD_DIM].astype(jnp.bfloat16)
            vh = qkv3[:, :, 2 * H + off:2 * H + off + HEAD_DIM].astype(jnp.bfloat16)
            scores = jax.lax.dot_general(                  # q @ k^T : (TB, S, S)
                qh, kh, (((2,), (2,)), ((0,), (0,))),
                preferred_element_type=jnp.float32)
            scores = scores + bias                         # additive pad mask
            smax = jnp.max(scores, axis=-1, keepdims=True)
            e = jnp.exp(scores - smax)
            denom = jnp.sum(e, axis=-1, keepdims=True)
            probs = e * pl.reciprocal(denom, approx=True)
            ctx_heads.append(jax.lax.dot_general(          # probs @ v : (TB,S,Dh)
                probs.astype(jnp.bfloat16), vh, (((2,), (1,)), ((0,), (0,))),
                preferred_element_type=jnp.float32))
        ctx = jnp.concatenate(ctx_heads, axis=-1).reshape(M, H)        # (M, H)

        # output projection + residual + LayerNorm (fused epilogue)
        attn_out = jnp.dot(ctx.astype(jnp.bfloat16), wo_ref[l],
                           preferred_element_type=jnp.float32) + bo
        x = _layernorm(attn_out + x, ln1g, ln1b)

        # FFN: linear + GELU(tanh) + linear + residual + LayerNorm (fused)
        h1 = jnp.dot(x.astype(jnp.bfloat16), w1_ref[l],
                     preferred_element_type=jnp.float32) + b1
        h1 = jax.nn.gelu(h1, approximate=True)             # tanh form -> EUP slot
        h2 = jnp.dot(h1.astype(jnp.bfloat16), w2_ref[l],
                     preferred_element_type=jnp.float32) + b2
        x = _layernorm(h2 + x, ln2g, ln2b)

    # --- classifier on the stacked CLS (position 0) rows of this batch tile ---
    cls = x.reshape(TB, S, H)[:, 0:1, :].reshape(TB, H).astype(jnp.bfloat16)
    logits = jnp.dot(cls, clsw_ref[...],
                     preferred_element_type=jnp.float32) + vrow(ROW_CLS_B, LANE)
    logits_ref[...] = logits                               # (TB, LANE) lane-dense


def _build_fused_call(b_pad, S, TB):
    L, H, F = NUM_LAYERS, HIDDEN, FFN_DIM
    in_specs = [
        pl.BlockSpec((TB, S, H), lambda b: (b, 0, 0)),          # emb
        pl.BlockSpec((TB, 1, S), lambda b: (b, 0, 0)),          # mask bias
        pl.BlockSpec((L, H, 3 * H), lambda b: (0, 0, 0)),       # wqkv
        pl.BlockSpec((L, H, H), lambda b: (0, 0, 0)),           # wo
        pl.BlockSpec((L, H, F), lambda b: (0, 0, 0)),           # w1
        pl.BlockSpec((L, F, H), lambda b: (0, 0, 0)),           # w2
        pl.BlockSpec((H, LANE), lambda b: (0, 0)),              # cls_w (padded)
        pl.BlockSpec((NUM_VEC_ROWS, VEC_WIDTH), lambda b: (0, 0)),  # packed vecs
    ]
    return pl.pallas_call(
        _fused_forward_kernel,
        out_shape=jax.ShapeDtypeStruct((b_pad, LANE), jnp.float32),
        grid=(b_pad // TB,),
        in_specs=in_specs,
        out_specs=pl.BlockSpec((TB, LANE), lambda b: (b, 0)),
        compiler_params=pltpu.CompilerParams(
            dimension_semantics=("parallel",)),
    )


def _choose_tb(B, S):
    """Batch tile: target TB*S >= 256 rows (v6e/v7x MXU depth), clamped to B."""
    target = max(1, 256 // S)
    if B <= target:
        return B                       # single grid step covering the whole batch
    return max(8, (target // 8) * 8)   # multiple steps: keep TB a multiple of 8


# ----------------------------------------------------------------------------
# Parameter init (deterministic, synthetic)
# ----------------------------------------------------------------------------
def init_params(key):
    keys = iter(jax.random.split(key, 8 + NUM_LAYERS * 16))

    def dense(k, fan_in, fan_out):
        return 0.02 * jax.random.normal(k, (fan_in, fan_out), jnp.float32)

    params = {
        "word_emb": 0.02 * jax.random.normal(
            next(keys), (VOCAB_SIZE, HIDDEN), jnp.float32),
        "pos_emb": 0.02 * jax.random.normal(
            next(keys), (MAX_POS, HIDDEN), jnp.float32),
        "emb_ln_g": jnp.ones((HIDDEN,), jnp.float32),
        "emb_ln_b": jnp.zeros((HIDDEN,), jnp.float32),
        "layers": [],
        "cls_w": dense(next(keys), HIDDEN, NUM_TAGS),
        "cls_b": jnp.zeros((NUM_TAGS,), jnp.float32),
    }
    for _ in range(NUM_LAYERS):
        params["layers"].append({
            "wq": dense(next(keys), HIDDEN, HIDDEN),
            "bq": jnp.zeros((HIDDEN,), jnp.float32),
            "wk": dense(next(keys), HIDDEN, HIDDEN),
            "bk": jnp.zeros((HIDDEN,), jnp.float32),
            "wv": dense(next(keys), HIDDEN, HIDDEN),
            "bv": jnp.zeros((HIDDEN,), jnp.float32),
            "wo": dense(next(keys), HIDDEN, HIDDEN),
            "bo": jnp.zeros((HIDDEN,), jnp.float32),
            "ln1_g": jnp.ones((HIDDEN,), jnp.float32),
            "ln1_b": jnp.zeros((HIDDEN,), jnp.float32),
            "w1": dense(next(keys), HIDDEN, FFN_DIM),
            "b1": jnp.zeros((FFN_DIM,), jnp.float32),
            "w2": dense(next(keys), FFN_DIM, HIDDEN),
            "b2": jnp.zeros((HIDDEN,), jnp.float32),
            "ln2_g": jnp.ones((HIDDEN,), jnp.float32),
            "ln2_b": jnp.zeros((HIDDEN,), jnp.float32),
        })
    return params


def pack_params(params):
    """One-time (outside jit) packing: stack layers, fuse QKV (attention scale
    folded into Q), zero-pad classifier, cast matmul weights to bf16, and pack
    every small f32 vector into one (NUM_VEC_ROWS, 384) array."""
    layers = params["layers"]
    scale = 1.0 / math.sqrt(HEAD_DIM)

    def pad_row(v):
        return jnp.pad(v, (0, VEC_WIDTH - v.shape[0]))

    rows = [pad_row(params["emb_ln_g"]), pad_row(params["emb_ln_b"])]
    wqkv_list = []
    for lp in layers:
        wqkv_list.append(jnp.concatenate([lp["wq"] * scale, lp["wk"], lp["wv"]],
                                         axis=1))                     # (H, 3H)
        rows.extend([
            pad_row(jnp.concatenate([lp["bq"] * scale, lp["bk"], lp["bv"]])),
            pad_row(lp["bo"]),
            pad_row(lp["ln1_g"]),
            pad_row(lp["ln1_b"]),
            pad_row(lp["b1"]),
            pad_row(lp["b2"]),
            pad_row(lp["ln2_g"]),
            pad_row(lp["ln2_b"]),
        ])
    cls_b = jnp.zeros((LANE,), jnp.float32).at[:NUM_TAGS].set(params["cls_b"])
    rows.append(pad_row(cls_b))
    while len(rows) < NUM_VEC_ROWS:
        rows.append(jnp.zeros((VEC_WIDTH,), jnp.float32))
    vecs = jnp.stack(rows)                                             # (NV, 384)

    cls_w = jnp.zeros((HIDDEN, LANE), jnp.float32)
    cls_w = cls_w.at[:, :NUM_TAGS].set(params["cls_w"])

    return {
        "word_emb": params["word_emb"],
        "pos_emb": params["pos_emb"],
        "wqkv": jnp.stack(wqkv_list).astype(jnp.bfloat16),             # (L,H,3H)
        "wo": jnp.stack([lp["wo"] for lp in layers]).astype(jnp.bfloat16),
        "w1": jnp.stack([lp["w1"] for lp in layers]).astype(jnp.bfloat16),
        "w2": jnp.stack([lp["w2"] for lp in layers]).astype(jnp.bfloat16),
        "cls_w": cls_w.astype(jnp.bfloat16),                           # (H, LANE)
        "vecs": vecs,
    }


# ----------------------------------------------------------------------------
# Forward pass (MiniTagTransformer.forward)
# ----------------------------------------------------------------------------
@jax.jit
def mini_tag_transformer_forward(packed, input_ids, attention_mask):
    B, S = input_ids.shape
    TB = _choose_tb(B, S)
    b_pad = ((B + TB - 1) // TB) * TB

    # embedding gather is plain-JAX glue; everything else runs in one kernel
    pos_ids = jnp.arange(S, dtype=jnp.int32)
    emb = (jnp.take(packed["word_emb"], input_ids, axis=0)
           + jnp.take(packed["pos_emb"], pos_ids, axis=0)[None, :, :])  # (B,S,H)
    bias = ((1.0 - attention_mask.astype(jnp.float32)) * MASK_BIAS
            ).reshape(B, 1, S)                                          # additive
    if b_pad != B:
        emb = jnp.pad(emb, ((0, b_pad - B), (0, 0), (0, 0)))
        bias = jnp.pad(bias, ((0, b_pad - B), (0, 0), (0, 0)))

    out = _build_fused_call(b_pad, S, TB)(
        emb, bias, packed["wqkv"], packed["wo"], packed["w1"], packed["w2"],
        packed["cls_w"], packed["vecs"])                                # (b_pad,LANE)
    return out[:B, :NUM_TAGS]                                           # (B, NUM_TAGS)


# ----------------------------------------------------------------------------
if __name__ == "__main__":
    B, S = 2, 8
    root = jax.random.PRNGKey(0)
    k_param, k_ids = jax.random.split(root)

    params = init_params(k_param)
    packed = pack_params(params)            # one-time packing, outside jit

    input_ids = jax.random.randint(k_ids, (B, S), 0, VOCAB_SIZE, dtype=jnp.int32)
    attention_mask = jnp.array(
        [[1, 1, 1, 1, 1, 1, 0, 0],
         [1, 1, 1, 1, 1, 1, 1, 1]], dtype=jnp.int32)

    logits = mini_tag_transformer_forward(packed, input_ids, attention_mask)
    jax.block_until_ready(logits)
    assert logits.shape == (B, NUM_TAGS)
    print("KERNEL_OK")
</pallas_src>

<mosaic_0001>
module attributes {stable_mosaic.version = 11 : i64} {
  func.func @_fused_forward_kernel(%arg0: i32, %arg1: memref<2x8x128xf32, #tpu.memory_space<vmem>>, %arg2: memref<2x1x8xf32, #tpu.memory_space<vmem>>, %arg3: memref<2x128x384xbf16, #tpu.memory_space<vmem>>, %arg4: memref<2x128x128xbf16, #tpu.memory_space<vmem>>, %arg5: memref<2x128x256xbf16, #tpu.memory_space<vmem>>, %arg6: memref<2x256x128xbf16, #tpu.memory_space<vmem>>, %arg7: memref<128x128xbf16, #tpu.memory_space<vmem>>, %arg8: memref<24x384xf32, #tpu.memory_space<vmem>>, %arg9: memref<2x128xf32, #tpu.memory_space<vmem>>) attributes {dimension_semantics = [#tpu.dimension_semantics<parallel>], iteration_bounds = array<i64: 1>, scalar_prefetch = 0 : i64, scratch_operands = 0 : i64, tpu.core_type = #tpu.core_type<tc>, window_params = [{transform_indices = @transform_0, window_bounds = array<i64: 2, 8, 128>}, {transform_indices = @transform_1, window_bounds = array<i64: 2, 1, 8>}, {pipeline_mode = #tpu.pipeline_mode<synchronous>, transform_indices = @transform_2, window_bounds = array<i64: 2, 128, 384>}, {pipeline_mode = #tpu.pipeline_mode<synchronous>, transform_indices = @transform_3, window_bounds = array<i64: 2, 128, 128>}, {pipeline_mode = #tpu.pipeline_mode<synchronous>, transform_indices = @transform_4, window_bounds = array<i64: 2, 128, 256>}, {pipeline_mode = #tpu.pipeline_mode<synchronous>, transform_indices = @transform_5, window_bounds = array<i64: 2, 256, 128>}, {pipeline_mode = #tpu.pipeline_mode<synchronous>, transform_indices = @transform_6, window_bounds = array<i64: 128, 128>}, {pipeline_mode = #tpu.pipeline_mode<synchronous>, transform_indices = @transform_7, window_bounds = array<i64: 24, 384>}, {transform_indices = @transform_8, window_bounds = array<i64: 2, 128>}]} {
    %c0 = arith.constant 0 : index
    %c0_0 = arith.constant 0 : index
    %c0_1 = arith.constant 0 : index
    %0 = vector.load %arg2[%c0, %c0_0, %c0_1] : memref<2x1x8xf32, #tpu.memory_space<vmem>>, vector<2x1x8xf32>
    %c0_2 = arith.constant 0 : index
    %c0_3 = arith.constant 0 : index
    %c0_4 = arith.constant 0 : index
    %1 = vector.load %arg1[%c0_2, %c0_3, %c0_4] : memref<2x8x128xf32, #tpu.memory_space<vmem>>, vector<2x8x128xf32>
    %2 = vector.shape_cast %1 : vector<2x8x128xf32> to vector<16x128xf32>
    %c0_5 = arith.constant 0 : index
    %c0_6 = arith.constant 0 : index
    %3 = vector.load %arg8[%c0_5, %c0_6] : memref<24x384xf32, #tpu.memory_space<vmem>>, vector<1x128xf32>
    %c1 = arith.constant 1 : index
    %c0_7 = arith.constant 0 : index
    %4 = vector.load %arg8[%c1, %c0_7] : memref<24x384xf32, #tpu.memory_space<vmem>>, vector<1x128xf32>
    %cst = arith.constant dense<0.000000e+00> : vector<16xf32>
    %5 = vector.multi_reduction <add>, %2, %cst [1] : vector<16x128xf32> to vector<16xf32>
    %6 = vector.shape_cast %5 : vector<16xf32> to vector<16x1xf32>
    %cst_8 = arith.constant 1.280000e+02 : f32
    %7 = vector.broadcast %cst_8 : f32 to vector<16x1xf32>
    %8 = arith.divf %6, %7 : vector<16x1xf32>
    %9 = vector.broadcast %8 : vector<16x1xf32> to vector<16x128xf32>
    %10 = arith.subf %2, %9 : vector<16x128xf32>
    %11 = arith.mulf %10, %10 : vector<16x128xf32>
    %cst_9 = arith.constant dense<0.000000e+00> : vector<16xf32>
    %12 = vector.multi_reduction <add>, %11, %cst_9 [1] : vector<16x128xf32> to vector<16xf32>
    %13 = vector.shape_cast %12 : vector<16xf32> to vector<16x1xf32>
    %cst_10 = arith.constant 1.280000e+02 : f32
    %14 = vector.broadcast %cst_10 : f32 to vector<16x1xf32>
    %15 = arith.divf %13, %14 : vector<16x1xf32>
    %cst_11 = arith.constant 9.99999996E-13 : f32
    %16 = vector.broadcast %cst_11 : f32 to vector<16x1xf32>
    %17 = arith.addf %15, %16 : vector<16x1xf32>
    %18 = math.rsqrt %17 : vector<16x1xf32>
    %19 = vector.broadcast %8 : vector<16x1xf32> to vector<16x128xf32>
    %20 = arith.subf %2, %19 : vector<16x128xf32>
    %21 = vector.broadcast %18 : vector<16x1xf32> to vector<16x128xf32>
    %22 = arith.mulf %20, %21 : vector<16x128xf32>
    %23 = vector.broadcast %3 : vector<1x128xf32> to vector<16x128xf32>
    %24 = arith.mulf %22, %23 : vector<16x128xf32>
    %25 = vector.broadcast %4 : vector<1x128xf32> to vector<16x128xf32>
    %26 = arith.addf %24, %25 : vector<16x128xf32>
    %c2 = arith.constant 2 : index
    %c0_12 = arith.constant 0 : index
    %27 = vector.load %arg8[%c2, %c0_12] : memref<24x384xf32, #tpu.memory_space<vmem>>, vector<1x384xf32>
    %c3 = arith.constant 3 : index
    %c0_13 = arith.constant 0 : index
    %28 = vector.load %arg8[%c3, %c0_13] : memref<24x384xf32, #tpu.memory_space<vmem>>, vector<1x128xf32>
    %c4 = arith.constant 4 : index
    %c0_14 = arith.constant 0 : index
    %29 = vector.load %arg8[%c4, %c0_14] : memref<24x384xf32, #tpu.memory_space<vmem>>, vector<1x128xf32>
    %c5 = arith.constant 5 : index
    %c0_15 = arith.constant 0 : index
    %30 = vector.load %arg8[%c5, %c0_15] : memref<24x384xf32, #tpu.memory_space<vmem>>, vector<1x128xf32>
    %c6 = arith.constant 6 : index
    %c0_16 = arith.constant 0 : index
    %31 = vector.load %arg8[%c6, %c0_16] : memref<24x384xf32, #tpu.memory_space<vmem>>, vector<1x256xf32>
    %c7 = arith.constant 7 : index
    %c0_17 = arith.constant 0 : index
    %32 = vector.load %arg8[%c7, %c0_17] : memref<24x384xf32, #tpu.memory_space<vmem>>, vector<1x128xf32>
    %c8 = arith.constant 8 : index
    %c0_18 = arith.constant 0 : index
    %33 = vector.load %arg8[%c8, %c0_18] : memref<24x384xf32, #tpu.memory_space<vmem>>, vector<1x128xf32>
    %c9 = arith.constant 9 : index
    %c0_19 = arith.constant 0 : index
    %34 = vector.load %arg8[%c9, %c0_19] : memref<24x384xf32, #tpu.memory_space<vmem>>, vector<1x128xf32>
    %35 = arith.truncf %26 : vector<16x128xf32> to vector<16x128xbf16>
    %c0_20 = arith.constant 0 : index
    %c0_21 = arith.constant 0 : index
    %c0_22 = arith.constant 0 : index
    %36 = vector.load %arg3[%c0_20, %c0_21, %c0_22] : memref<2x128x384xbf16, #tpu.memory_space<vmem>>, vector<1x128x384xbf16>
    %37 = vector.shape_cast %36 : vector<1x128x384xbf16> to vector<128x384xbf16>
    %cst_23 = arith.constant dense<0.000000e+00> : vector<16x384xf32>
    %38 = tpu.matmul %35, %37, %cst_23 {dimension_numbers = #tpu.dot_dimension_numbers<[1], [0], [0], [1], [0, 0, 1, 1], [], []>} : vector<16x128xbf16>, vector<128x384xbf16>, vector<16x384xf32> -> vector<16x384xf32>
    %39 = vector.broadcast %27 : vector<1x384xf32> to vector<16x384xf32>
    %40 = arith.addf %38, %39 : vector<16x384xf32>
    %41 = vector.shape_cast %40 : vector<16x384xf32> to vector<2x8x384xf32>
    %42 = vector.extract_strided_slice %41 {offsets = [0, 0, 0], sizes = [2, 8, 32], strides = [1, 1, 1]} : vector<2x8x384xf32> to vector<2x8x32xf32>
    %43 = arith.truncf %42 : vector<2x8x32xf32> to vector<2x8x32xbf16>
    %44 = vector.extract_strided_slice %41 {offsets = [0, 0, 128], sizes = [2, 8, 32], strides = [1, 1, 1]} : vector<2x8x384xf32> to vector<2x8x32xf32>
    %45 = arith.truncf %44 : vector<2x8x32xf32> to vector<2x8x32xbf16>
    %46 = vector.extract_strided_slice %41 {offsets = [0, 0, 256], sizes = [2, 8, 32], strides = [1, 1, 1]} : vector<2x8x384xf32> to vector<2x8x32xf32>
    %47 = arith.truncf %46 : vector<2x8x32xf32> to vector<2x8x32xbf16>
    %cst_24 = arith.constant dense<0.000000e+00> : vector<2x8x8xf32>
    %48 = tpu.matmul %43, %45, %cst_24 {dimension_numbers = #tpu.dot_dimension_numbers<[2], [2], [1], [1], [0, 0, 0, 1, 1, 1], [0], [0]>} : vector<2x8x32xbf16>, vector<2x8x32xbf16>, vector<2x8x8xf32> -> vector<2x8x8xf32>
    %49 = vector.broadcast %0 : vector<2x1x8xf32> to vector<2x8x8xf32>
    %50 = arith.addf %48, %49 : vector<2x8x8xf32>
    %cst_25 = arith.constant dense<0xFF800000> : vector<2x8xf32>
    %51 = vector.multi_reduction <maximumf>, %50, %cst_25 [2] : vector<2x8x8xf32> to vector<2x8xf32>
    %52 = vector.shape_cast %51 : vector<2x8xf32> to vector<2x8x1xf32>
    %53 = vector.broadcast %52 : vector<2x8x1xf32> to vector<2x8x8xf32>
    %54 = arith.subf %50, %53 : vector<2x8x8xf32>
    %55 = math.exp %54 : vector<2x8x8xf32>
    %cst_26 = arith.constant dense<0.000000e+00> : vector<2x8xf32>
    %56 = vector.multi_reduction <add>, %55, %cst_26 [2] : vector<2x8x8xf32> to vector<2x8xf32>
    %57 = vector.shape_cast %56 : vector<2x8xf32> to vector<2x8x1xf32>
    %58 = tpu.reciprocal %57 {approx = true} : vector<2x8x1xf32> -> vector<2x8x1xf32>
    %59 = vector.broadcast %58 : vector<2x8x1xf32> to vector<2x8x8xf32>
    %60 = arith.mulf %55, %59 : vector<2x8x8xf32>
    %61 = arith.truncf %60 : vector<2x8x8xf32> to vector<2x8x8xbf16>
    %cst_27 = arith.constant dense<0.000000e+00> : vector<2x8x32xf32>
    %62 = tpu.matmul %61, %47, %cst_27 {dimension_numbers = #tpu.dot_dimension_numbers<[2], [1], [1], [2], [0, 0, 0, 1, 1, 2], [0], [0]>} : vector<2x8x8xbf16>, vector<2x8x32xbf16>, vector<2x8x32xf32> -> vector<2x8x32xf32>
    %63 = vector.extract_strided_slice %41 {offsets = [0, 0, 32], sizes = [2, 8, 32], strides = [1, 1, 1]} : vector<2x8x384xf32> to vector<2x8x32xf32>
    %64 = arith.truncf %63 : vector<2x8x32xf32> to vector<2x8x32xbf16>
    %65 = vector.extract_strided_slice %41 {offsets = [0, 0, 160], sizes = [2, 8, 32], strides = [1, 1, 1]} : vector<2x8x384xf32> to vector<2x8x32xf32>
    %66 = arith.truncf %65 : vector<2x8x32xf32> to vector<2x8x32xbf16>
    %67 = vector.extract_strided_slice %41 {offsets = [0, 0, 288], sizes = [2, 8, 32], strides = [1, 1, 1]} : vector<2x8x384xf32> to vector<2x8x32xf32>
    %68 = arith.truncf %67 : vector<2x8x32xf32> to vector<2x8x32xbf16>
    %cst_28 = arith.constant dense<0.000000e+00> : vector<2x8x8xf32>
    %69 = tpu.matmul %64, %66, %cst_28 {dimension_numbers = #tpu.dot_dimension_numbers<[2], [2], [1], [1], [0, 0, 0, 1, 1, 1], [0], [0]>} : vector<2x8x32xbf16>, vector<2x8x32xbf16>, vector<2x8x8xf32> -> vector<2x8x8xf32>
    %70 = vector.broadcast %0 : vector<2x1x8xf32> to vector<2x8x8xf32>
    %71 = arith.addf %69, %70 : vector<2x8x8xf32>
    %cst_29 = arith.constant dense<0xFF800000> : vector<2x8xf32>
    %72 = vector.multi_reduction <maximumf>, %71, %cst_29 [2] : vector<2x8x8xf32> to vector<2x8xf32>
    %73 = vector.shape_cast %72 : vector<2x8xf32> to vector<2x8x1xf32>
    %74 = vector.broadcast %73 : vector<2x8x1xf32> to vector<2x8x8xf32>
    %75 = arith.subf %71, %74 : vector<2x8x8xf32>
    %76 = math.exp %75 : vector<2x8x8xf32>
    %cst_30 = arith.constant dense<0.000000e+00> : vector<2x8xf32>
    %77 = vector.multi_reduction <add>, %76, %cst_30 [2] : vector<2x8x8xf32> to vector<2x8xf32>
    %78 = vector.shape_cast %77 : vector<2x8xf32> to vector<2x8x1xf32>
    %79 = tpu.reciprocal %78 {approx = true} : vector<2x8x1xf32> -> vector<2x8x1xf32>
    %80 = vector.broadcast %79 : vector<2x8x1xf32> to vector<2x8x8xf32>
    %81 = arith.mulf %76, %80 : vector<2x8x8xf32>
    %82 = arith.truncf %81 : vector<2x8x8xf32> to vector<2x8x8xbf16>
    %cst_31 = arith.constant dense<0.000000e+00> : vector<2x8x32xf32>
    %83 = tpu.matmul %82, %68, %cst_31 {dimension_numbers = #tpu.dot_dimension_numbers<[2], [1], [1], [2], [0, 0, 0, 1, 1, 2], [0], [0]>} : vector<2x8x8xbf16>, vector<2x8x32xbf16>, vector<2x8x32xf32> -> vector<2x8x32xf32>
    %84 = vector.extract_strided_slice %41 {offsets = [0, 0, 64], sizes = [2, 8, 32], strides = [1, 1, 1]} : vector<2x8x384xf32> to vector<2x8x32xf32>
    %85 = arith.truncf %84 : vector<2x8x32xf32> to vector<2x8x32xbf16>
    %86 = vector.extract_strided_slice %41 {offsets = [0, 0, 192], sizes = [2, 8, 32], strides = [1, 1, 1]} : vector<2x8x384xf32> to vector<2x8x32xf32>
    %87 = arith.truncf %86 : vector<2x8x32xf32> to vector<2x8x32xbf16>
    %88 = vector.extract_strided_slice %41 {offsets = [0, 0, 320], sizes = [2, 8, 32], strides = [1, 1, 1]} : vector<2x8x384xf32> to vector<2x8x32xf32>
    %89 = arith.truncf %88 : vector<2x8x32xf32> to vector<2x8x32xbf16>
    %cst_32 = arith.constant dense<0.000000e+00> : vector<2x8x8xf32>
    %90 = tpu.matmul %85, %87, %cst_32 {dimension_numbers = #tpu.dot_dimension_numbers<[2], [2], [1], [1], [0, 0, 0, 1, 1, 1], [0], [0]>} : vector<2x8x32xbf16>, vector<2x8x32xbf16>, vector<2x8x8xf32> -> vector<2x8x8xf32>
    %91 = vector.broadcast %0 : vector<2x1x8xf32> to vector<2x8x8xf32>
    %92 = arith.addf %90, %91 : vector<2x8x8xf32>
    %cst_33 = arith.constant dense<0xFF800000> : vector<2x8xf32>
    %93 = vector.multi_reduction <maximumf>, %92, %cst_33 [2] : vector<2x8x8xf32> to vector<2x8xf32>
    %94 = vector.shape_cast %93 : vector<2x8xf32> to vector<2x8x1xf32>
    %95 = vector.broadcast %94 : vector<2x8x1xf32> to vector<2x8x8xf32>
    %96 = arith.subf %92, %95 : vector<2x8x8xf32>
    %97 = math.exp %96 : vector<2x8x8xf32>
    %cst_34 = arith.constant dense<0.000000e+00> : vector<2x8xf32>
    %98 = vector.multi_reduction <add>, %97, %cst_34 [2] : vector<2x8x8xf32> to vector<2x8xf32>
    %99 = vector.shape_cast %98 : vector<2x8xf32> to vector<2x8x1xf32>
    %100 = tpu.reciprocal %99 {approx = true} : vector<2x8x1xf32> -> vector<2x8x1xf32>
    %101 = vector.broadcast %100 : vector<2x8x1xf32> to vector<2x8x8xf32>
    %102 = arith.mulf %97, %101 : vector<2x8x8xf32>
    %103 = arith.truncf %102 : vector<2x8x8xf32> to vector<2x8x8xbf16>
    %cst_35 = arith.constant dense<0.000000e+00> : vector<2x8x32xf32>
    %104 = tpu.matmul %103, %89, %cst_35 {dimension_numbers = #tpu.dot_dimension_numbers<[2], [1], [1], [2], [0, 0, 0, 1, 1, 2], [0], [0]>} : vector<2x8x8xbf16>, vector<2x8x32xbf16>, vector<2x8x32xf32> -> vector<2x8x32xf32>
    %105 = vector.extract_strided_slice %41 {offsets = [0, 0, 96], sizes = [2, 8, 32], strides = [1, 1, 1]} : vector<2x8x384xf32> to vector<2x8x32xf32>
    %106 = arith.truncf %105 : vector<2x8x32xf32> to vector<2x8x32xbf16>
    %107 = vector.extract_strided_slice %41 {offsets = [0, 0, 224], sizes = [2, 8, 32], strides = [1, 1, 1]} : vector<2x8x384xf32> to vector<2x8x32xf32>
    %108 = arith.truncf %107 : vector<2x8x32xf32> to vector<2x8x32xbf16>
    %109 = vector.extract_strided_slice %41 {offsets = [0, 0, 352], sizes = [2, 8, 32], strides = [1, 1, 1]} : vector<2x8x384xf32> to vector<2x8x32xf32>
    %110 = arith.truncf %109 : vector<2x8x32xf32> to vector<2x8x32xbf16>
    %cst_36 = arith.constant dense<0.000000e+00> : vector<2x8x8xf32>
    %111 = tpu.matmul %106, %108, %cst_36 {dimension_numbers = #tpu.dot_dimension_numbers<[2], [2], [1], [1], [0, 0, 0, 1, 1, 1], [0], [0]>} : vector<2x8x32xbf16>, vector<2x8x32xbf16>, vector<2x8x8xf32> -> vector<2x8x8xf32>
    %112 = vector.broadcast %0 : vector<2x1x8xf32> to vector<2x8x8xf32>
    %113 = arith.addf %111, %112 : vector<2x8x8xf32>
    %cst_37 = arith.constant dense<0xFF800000> : vector<2x8xf32>
    %114 = vector.multi_reduction <maximumf>, %113, %cst_37 [2] : vector<2x8x8xf32> to vector<2x8xf32>
    %115 = vector.shape_cast %114 : vector<2x8xf32> to vector<2x8x1xf32>
    %116 = vector.broadcast %115 : vector<2x8x1xf32> to vector<2x8x8xf32>
    %117 = arith.subf %113, %116 : vector<2x8x8xf32>
    %118 = math.exp %117 : vector<2x8x8xf32>
    %cst_38 = arith.constant dense<0.000000e+00> : vector<2x8xf32>
    %119 = vector.multi_reduction <add>, %118, %cst_38 [2] : vector<2x8x8xf32> to vector<2x8xf32>
    %120 = vector.shape_cast %119 : vector<2x8xf32> to vector<2x8x1xf32>
    %121 = tpu.reciprocal %120 {approx = true} : vector<2x8x1xf32> -> vector<2x8x1xf32>
    %122 = vector.broadcast %121 : vector<2x8x1xf32> to vector<2x8x8xf32>
    %123 = arith.mulf %118, %122 : vector<2x8x8xf32>
    %124 = arith.truncf %123 : vector<2x8x8xf32> to vector<2x8x8xbf16>
    %cst_39 = arith.constant dense<0.000000e+00> : vector<2x8x32xf32>
    %125 = tpu.matmul %124, %110, %cst_39 {dimension_numbers = #tpu.dot_dimension_numbers<[2], [1], [1], [2], [0, 0, 0, 1, 1, 2], [0], [0]>} : vector<2x8x8xbf16>, vector<2x8x32xbf16>, vector<2x8x32xf32> -> vector<2x8x32xf32>
    %126 = tpu.concatenate %62, %83, %104, %125 in 2 : vector<2x8x32xf32>, vector<2x8x32xf32>, vector<2x8x32xf32>, vector<2x8x32xf32> -> vector<2x8x128xf32>
    %127 = vector.shape_cast %126 : vector<2x8x128xf32> to vector<16x128xf32>
    %128 = arith.truncf %127 : vector<16x128xf32> to vector<16x128xbf16>
    %c0_40 = arith.constant 0 : index
    %c0_41 = arith.constant 0 : index
    %c0_42 = arith.constant 0 : index
    %129 = vector.load %arg4[%c0_40, %c0_41, %c0_42] : memref<2x128x128xbf16, #tpu.memory_space<vmem>>, vector<1x128x128xbf16>
    %130 = vector.shape_cast %129 : vector<1x128x128xbf16> to vector<128x128xbf16>
    %cst_43 = arith.constant dense<0.000000e+00> : vector<16x128xf32>
    %131 = tpu.matmul %128, %130, %cst_43 {dimension_numbers = #tpu.dot_dimension_numbers<[1], [0], [0], [1], [0, 0, 1, 1], [], []>} : vector<16x128xbf16>, vector<128x128xbf16>, vector<16x128xf32> -> vector<16x128xf32>
    %132 = vector.broadcast %28 : vector<1x128xf32> to vector<16x128xf32>
    %133 = arith.addf %131, %132 : vector<16x128xf32>
    %134 = arith.addf %133, %26 : vector<16x128xf32>
    %cst_44 = arith.constant dense<0.000000e+00> : vector<16xf32>
    %135 = vector.multi_reduction <add>, %134, %cst_44 [1] : vector<16x128xf32> to vector<16xf32>
    %136 = vector.shape_cast %135 : vector<16xf32> to vector<16x1xf32>
    %cst_45 = arith.constant 1.280000e+02 : f32
    %137 = vector.broadcast %cst_45 : f32 to vector<16x1xf32>
    %138 = arith.divf %136, %137 : vector<16x1xf32>
    %139 = vector.broadcast %138 : vector<16x1xf32> to vector<16x128xf32>
    %140 = arith.subf %134, %139 : vector<16x128xf32>
    %141 = arith.mulf %140, %140 : vector<16x128xf32>
    %cst_46 = arith.constant dense<0.000000e+00> : vector<16xf32>
    %142 = vector.multi_reduction <add>, %141, %cst_46 [1] : vector<16x128xf32> to vector<16xf32>
    %143 = vector.shape_cast %142 : vector<16xf32> to vector<16x1xf32>
    %cst_47 = arith.constant 1.280000e+02 : f32
    %144 = vector.broadcast %cst_47 : f32 to vector<16x1xf32>
    %145 = arith.divf %143, %144 : vector<16x1xf32>
    %cst_48 = arith.constant 9.99999996E-13 : f32
    %146 = vector.broadcast %cst_48 : f32 to vector<16x1xf32>
    %147 = arith.addf %145, %146 : vector<16x1xf32>
    %148 = math.rsqrt %147 : vector<16x1xf32>
    %149 = vector.broadcast %138 : vector<16x1xf32> to vector<16x128xf32>
    %150 = arith.subf %134, %149 : vector<16x128xf32>
    %151 = vector.broadcast %148 : vector<16x1xf32> to vector<16x128xf32>
    %152 = arith.mulf %150, %151 : vector<16x128xf32>
    %153 = vector.broadcast %29 : vector<1x128xf32> to vector<16x128xf32>
    %154 = arith.mulf %152, %153 : vector<16x128xf32>
    %155 = vector.broadcast %30 : vector<1x128xf32> to vector<16x128xf32>
    %156 = arith.addf %154, %155 : vector<16x128xf32>
    %157 = arith.truncf %156 : vector<16x128xf32> to vector<16x128xbf16>
    %c0_49 = arith.constant 0 : index
    %c0_50 = arith.constant 0 : index
    %c0_51 = arith.constant 0 : index
    %158 = vector.load %arg5[%c0_49, %c0_50, %c0_51] : memref<2x128x256xbf16, #tpu.memory_space<vmem>>, vector<1x128x256xbf16>
    %159 = vector.shape_cast %158 : vector<1x128x256xbf16> to vector<128x256xbf16>
    %cst_52 = arith.constant dense<0.000000e+00> : vector<16x256xf32>
    %160 = tpu.matmul %157, %159, %cst_52 {dimension_numbers = #tpu.dot_dimension_numbers<[1], [0], [0], [1], [0, 0, 1, 1], [], []>} : vector<16x128xbf16>, vector<128x256xbf16>, vector<16x256xf32> -> vector<16x256xf32>
    %161 = vector.broadcast %31 : vector<1x256xf32> to vector<16x256xf32>
    %162 = arith.addf %160, %161 : vector<16x256xf32>
    %163 = arith.mulf %162, %162 : vector<16x256xf32>
    %164 = arith.mulf %162, %163 : vector<16x256xf32>
    %cst_53 = arith.constant 4.471500e-02 : f32
    %165 = vector.broadcast %cst_53 : f32 to vector<16x256xf32>
    %166 = arith.mulf %165, %164 : vector<16x256xf32>
    %167 = arith.addf %162, %166 : vector<16x256xf32>
    %cst_54 = arith.constant 0.797884583 : f32
    %168 = vector.broadcast %cst_54 : f32 to vector<16x256xf32>
    %169 = arith.mulf %168, %167 : vector<16x256xf32>
    %170 = math.tanh %169 : vector<16x256xf32>
    %cst_55 = arith.constant 1.000000e+00 : f32
    %171 = vector.broadcast %cst_55 : f32 to vector<16x256xf32>
    %172 = arith.addf %171, %170 : vector<16x256xf32>
    %cst_56 = arith.constant 5.000000e-01 : f32
    %173 = vector.broadcast %cst_56 : f32 to vector<16x256xf32>
    %174 = arith.mulf %173, %172 : vector<16x256xf32>
    %175 = arith.mulf %162, %174 : vector<16x256xf32>
    %176 = arith.truncf %175 : vector<16x256xf32> to vector<16x256xbf16>
    %c0_57 = arith.constant 0 : index
    %c0_58 = arith.constant 0 : index
    %c0_59 = arith.constant 0 : index
    %177 = vector.load %arg6[%c0_57, %c0_58, %c0_59] : memref<2x256x128xbf16, #tpu.memory_space<vmem>>, vector<1x256x128xbf16>
    %178 = vector.shape_cast %177 : vector<1x256x128xbf16> to vector<256x128xbf16>
    %cst_60 = arith.constant dense<0.000000e+00> : vector<16x128xf32>
    %179 = tpu.matmul %176, %178, %cst_60 {dimension_numbers = #tpu.dot_dimension_numbers<[1], [0], [0], [1], [0, 0, 1, 1], [], []>} : vector<16x256xbf16>, vector<256x128xbf16>, vector<16x128xf32> -> vector<16x128xf32>
    %180 = vector.broadcast %32 : vector<1x128xf32> to vector<16x128xf32>
    %181 = arith.addf %179, %180 : vector<16x128xf32>
    %182 = arith.addf %181, %156 : vector<16x128xf32>
    %cst_61 = arith.constant dense<0.000000e+00> : vector<16xf32>
    %183 = vector.multi_reduction <add>, %182, %cst_61 [1] : vector<16x128xf32> to vector<16xf32>
    %184 = vector.shape_cast %183 : vector<16xf32> to vector<16x1xf32>
    %cst_62 = arith.constant 1.280000e+02 : f32
    %185 = vector.broadcast %cst_62 : f32 to vector<16x1xf32>
    %186 = arith.divf %184, %185 : vector<16x1xf32>
    %187 = vector.broadcast %186 : vector<16x1xf32> to vector<16x128xf32>
    %188 = arith.subf %182, %187 : vector<16x128xf32>
    %189 = arith.mulf %188, %188 : vector<16x128xf32>
    %cst_63 = arith.constant dense<0.000000e+00> : vector<16xf32>
    %190 = vector.multi_reduction <add>, %189, %cst_63 [1] : vector<16x128xf32> to vector<16xf32>
    %191 = vector.shape_cast %190 : vector<16xf32> to vector<16x1xf32>
    %cst_64 = arith.constant 1.280000e+02 : f32
    %192 = vector.broadcast %cst_64 : f32 to vector<16x1xf32>
    %193 = arith.divf %191, %192 : vector<16x1xf32>
    %cst_65 = arith.constant 9.99999996E-13 : f32
    %194 = vector.broadcast %cst_65 : f32 to vector<16x1xf32>
    %195 = arith.addf %193, %194 : vector<16x1xf32>
    %196 = math.rsqrt %195 : vector<16x1xf32>
    %197 = vector.broadcast %186 : vector<16x1xf32> to vector<16x128xf32>
    %198 = arith.subf %182, %197 : vector<16x128xf32>
    %199 = vector.broadcast %196 : vector<16x1xf32> to vector<16x128xf32>
    %200 = arith.mulf %198, %199 : vector<16x128xf32>
    %201 = vector.broadcast %33 : vector<1x128xf32> to vector<16x128xf32>
    %202 = arith.mulf %200, %201 : vector<16x128xf32>
    %203 = vector.broadcast %34 : vector<1x128xf32> to vector<16x128xf32>
    %204 = arith.addf %202, %203 : vector<16x128xf32>
    %c10 = arith.constant 10 : index
    %c0_66 = arith.constant 0 : index
    %205 = vector.load %arg8[%c10, %c0_66] : memref<24x384xf32, #tpu.memory_space<vmem>>, vector<1x384xf32>
    %c11 = arith.constant 11 : index
    %c0_67 = arith.constant 0 : index
    %206 = vector.load %arg8[%c11, %c0_67] : memref<24x384xf32, #tpu.memory_space<vmem>>, vector<1x128xf32>
    %c12 = arith.constant 12 : index
    %c0_68 = arith.constant 0 : index
    %207 = vector.load %arg8[%c12, %c0_68] : memref<24x384xf32, #tpu.memory_space<vmem>>, vector<1x128xf32>
    %c13 = arith.constant 13 : index
    %c0_69 = arith.constant 0 : index
    %208 = vector.load %arg8[%c13, %c0_69] : memref<24x384xf32, #tpu.memory_space<vmem>>, vector<1x128xf32>
    %c14 = arith.constant 14 : index
    %c0_70 = arith.constant 0 : index
    %209 = vector.load %arg8[%c14, %c0_70] : memref<24x384xf32, #tpu.memory_space<vmem>>, vector<1x256xf32>
    %c15 = arith.constant 15 : index
    %c0_71 = arith.constant 0 : index
    %210 = vector.load %arg8[%c15, %c0_71] : memref<24x384xf32, #tpu.memory_space<vmem>>, vector<1x128xf32>
    %c16 = arith.constant 16 : index
    %c0_72 = arith.constant 0 : index
    %211 = vector.load %arg8[%c16, %c0_72] : memref<24x384xf32, #tpu.memory_space<vmem>>, vector<1x128xf32>
    %c17 = arith.constant 17 : index
    %c0_73 = arith.constant 0 : index
    %212 = vector.load %arg8[%c17, %c0_73] : memref<24x384xf32, #tpu.memory_space<vmem>>, vector<1x128xf32>
    %213 = arith.truncf %204 : vector<16x128xf32> to vector<16x128xbf16>
    %c1_74 = arith.constant 1 : index
    %c0_75 = arith.constant 0 : index
    %c0_76 = arith.constant 0 : index
    %214 = vector.load %arg3[%c1_74, %c0_75, %c0_76] : memref<2x128x384xbf16, #tpu.memory_space<vmem>>, vector<1x128x384xbf16>
    %215 = vector.shape_cast %214 : vector<1x128x384xbf16> to vector<128x384xbf16>
    %cst_77 = arith.constant dense<0.000000e+00> : vector<16x384xf32>
    %216 = tpu.matmul %213, %215, %cst_77 {dimension_numbers = #tpu.dot_dimension_numbers<[1], [0], [0], [1], [0, 0, 1, 1], [], []>} : vector<16x128xbf16>, vector<128x384xbf16>, vector<16x384xf32> -> vector<16x384xf32>
    %217 = vector.broadcast %205 : vector<1x384xf32> to vector<16x384xf32>
    %218 = arith.addf %216, %217 : vector<16x384xf32>
    %219 = vector.shape_cast %218 : vector<16x384xf32> to vector<2x8x384xf32>
    %220 = vector.extract_strided_slice %219 {offsets = [0, 0, 0], sizes = [2, 8, 32], strides = [1, 1, 1]} : vector<2x8x384xf32> to vector<2x8x32xf32>
    %221 = arith.truncf %220 : vector<2x8x32xf32> to vector<2x8x32xbf16>
    %222 = vector.extract_strided_slice %219 {offsets = [0, 0, 128], sizes = [2, 8, 32], strides = [1, 1, 1]} : vector<2x8x384xf32> to vector<2x8x32xf32>
    %223 = arith.truncf %222 : vector<2x8x32xf32> to vector<2x8x32xbf16>
    %224 = vector.extract_strided_slice %219 {offsets = [0, 0, 256], sizes = [2, 8, 32], strides = [1, 1, 1]} : vector<2x8x384xf32> to vector<2x8x32xf32>
    %225 = arith.truncf %224 : vector<2x8x32xf32> to vector<2x8x32xbf16>
    %cst_78 = arith.constant dense<0.000000e+00> : vector<2x8x8xf32>
    %226 = tpu.matmul %221, %223, %cst_78 {dimension_numbers = #tpu.dot_dimension_numbers<[2], [2], [1], [1], [0, 0, 0, 1, 1, 1], [0], [0]>} : vector<2x8x32xbf16>, vector<2x8x32xbf16>, vector<2x8x8xf32> -> vector<2x8x8xf32>
    %227 = vector.broadcast %0 : vector<2x1x8xf32> to vector<2x8x8xf32>
    %228 = arith.addf %226, %227 : vector<2x8x8xf32>
    %cst_79 = arith.constant dense<0xFF800000> : vector<2x8xf32>
    %229 = vector.multi_reduction <maximumf>, %228, %cst_79 [2] : vector<2x8x8xf32> to vector<2x8xf32>
    %230 = vector.shape_cast %229 : vector<2x8xf32> to vector<2x8x1xf32>
    %231 = vector.broadcast %230 : vector<2x8x1xf32> to vector<2x8x8xf32>
    %232 = arith.subf %228, %231 : vector<2x8x8xf32>
    %233 = math.exp %232 : vector<2x8x8xf32>
    %cst_80 = arith.constant dense<0.000000e+00> : vector<2x8xf32>
    %234 = vector.multi_reduction <add>, %233, %cst_80 [2] : vector<2x8x8xf32> to vector<2x8xf32>
    %235 = vector.shape_cast %234 : vector<2x8xf32> to vector<2x8x1xf32>
    %236 = tpu.reciprocal %235 {approx = true} : vector<2x8x1xf32> -> vector<2x8x1xf32>
    %237 = vector.broadcast %236 : vector<2x8x1xf32> to vector<2x8x8xf32>
    %238 = arith.mulf %233, %237 : vector<2x8x8xf32>
    %239 = arith.truncf %238 : vector<2x8x8xf32> to vector<2x8x8xbf16>
    %cst_81 = arith.constant dense<0.000000e+00> : vector<2x8x32xf32>
    %240 = tpu.matmul %239, %225, %cst_81 {dimension_numbers = #tpu.dot_dimension_numbers<[2], [1], [1], [2], [0, 0, 0, 1, 1, 2], [0], [0]>} : vector<2x8x8xbf16>, vector<2x8x32xbf16>, vector<2x8x32xf32> -> vector<2x8x32xf32>
    %241 = vector.extract_strided_slice %219 {offsets = [0, 0, 32], sizes = [2, 8, 32], strides = [1, 1, 1]} : vector<2x8x384xf32> to vector<2x8x32xf32>
    %242 = arith.truncf %241 : vector<2x8x32xf32> to vector<2x8x32xbf16>
    %243 = vector.extract_strided_slice %219 {offsets = [0, 0, 160], sizes = [2, 8, 32], strides = [1, 1, 1]} : vector<2x8x384xf32> to vector<2x8x32xf32>
    %244 = arith.truncf %243 : vector<2x8x32xf32> to vector<2x8x32xbf16>
    %245 = vector.extract_strided_slice %219 {offsets = [0, 0, 288], sizes = [2, 8, 32], strides = [1, 1, 1]} : vector<2x8x384xf32> to vector<2x8x32xf32>
    %246 = arith.truncf %245 : vector<2x8x32xf32> to vector<2x8x32xbf16>
    %cst_82 = arith.constant dense<0.000000e+00> : vector<2x8x8xf32>
    %247 = tpu.matmul %242, %244, %cst_82 {dimension_numbers = #tpu.dot_dimension_numbers<[2], [2], [1], [1], [0, 0, 0, 1, 1, 1], [0], [0]>} : vector<2x8x32xbf16>, vector<2x8x32xbf16>, vector<2x8x8xf32> -> vector<2x8x8xf32>
    %248 = vector.broadcast %0 : vector<2x1x8xf32> to vector<2x8x8xf32>
    %249 = arith.addf %247, %248 : vector<2x8x8xf32>
    %cst_83 = arith.constant dense<0xFF800000> : vector<2x8xf32>
    %250 = vector.multi_reduction <maximumf>, %249, %cst_83 [2] : vector<2x8x8xf32> to vector<2x8xf32>
    %251 = vector.shape_cast %250 : vector<2x8xf32> to vector<2x8x1xf32>
    %252 = vector.broadcast %251 : vector<2x8x1xf32> to vector<2x8x8xf32>
    %253 = arith.subf %249, %252 : vector<2x8x8xf32>
    %254 = math.exp %253 : vector<2x8x8xf32>
    %cst_84 = arith.constant dense<0.000000e+00> : vector<2x8xf32>
    %255 = vector.multi_reduction <add>, %254, %cst_84 [2] : vector<2x8x8xf32> to vector<2x8xf32>
    %256 = vector.shape_cast %255 : vector<2x8xf32> to vector<2x8x1xf32>
    %257 = tpu.reciprocal %256 {approx = true} : vector<2x8x1xf32> -> vector<2x8x1xf32>
    %258 = vector.broadcast %257 : vector<2x8x1xf32> to vector<2x8x8xf32>
    %259 = arith.mulf %254, %258 : vector<2x8x8xf32>
    %260 = arith.truncf %259 : vector<2x8x8xf32> to vector<2x8x8xbf16>
    %cst_85 = arith.constant dense<0.000000e+00> : vector<2x8x32xf32>
    %261 = tpu.matmul %260, %246, %cst_85 {dimension_numbers = #tpu.dot_dimension_numbers<[2], [1], [1], [2], [0, 0, 0, 1, 1, 2], [0], [0]>} : vector<2x8x8xbf16>, vector<2x8x32xbf16>, vector<2x8x32xf32> -> vector<2x8x32xf32>
    %262 = vector.extract_strided_slice %219 {offsets = [0, 0, 64], sizes = [2, 8, 32], strides = [1, 1, 1]} : vector<2x8x384xf32> to vector<2x8x32xf32>
    %263 = arith.truncf %262 : vector<2x8x32xf32> to vector<2x8x32xbf16>
    %264 = vector.extract_strided_slice %219 {offsets = [0, 0, 192], sizes = [2, 8, 32], strides = [1, 1, 1]} : vector<2x8x384xf32> to vector<2x8x32xf32>
    %265 = arith.truncf %264 : vector<2x8x32xf32> to vector<2x8x32xbf16>
    %266 = vector.extract_strided_slice %219 {offsets = [0, 0, 320], sizes = [2, 8, 32], strides = [1, 1, 1]} : vector<2x8x384xf32> to vector<2x8x32xf32>
    %267 = arith.truncf %266 : vector<2x8x32xf32> to vector<2x8x32xbf16>
    %cst_86 = arith.constant dense<0.000000e+00> : vector<2x8x8xf32>
    %268 = tpu.matmul %263, %265, %cst_86 {dimension_numbers = #tpu.dot_dimension_numbers<[2], [2], [1], [1], [0, 0, 0, 1, 1, 1], [0], [0]>} : vector<2x8x32xbf16>, vector<2x8x32xbf16>, vector<2x8x8xf32> -> vector<2x8x8xf32>
    %269 = vector.broadcast %0 : vector<2x1x8xf32> to vector<2x8x8xf32>
    %270 = arith.addf %268, %269 : vector<2x8x8xf32>
    %cst_87 = arith.constant dense<0xFF800000> : vector<2x8xf32>
    %271 = vector.multi_reduction <maximumf>, %270, %cst_87 [2] : vector<2x8x8xf32> to vector<2x8xf32>
    %272 = vector.shape_cast %271 : vector<2x8xf32> to vector<2x8x1xf32>
    %273 = vector.broadcast %272 : vector<2x8x1xf32> to vector<2x8x8xf32>
    %274 = arith.subf %270, %273 : vector<2x8x8xf32>
    %275 = math.exp %274 : vector<2x8x8xf32>
    %cst_88 = arith.constant dense<0.000000e+00> : vector<2x8xf32>
    %276 = vector.multi_reduction <add>, %275, %cst_88 [2] : vector<2x8x8xf32> to vector<2x8xf32>
    %277 = vector.shape_cast %276 : vector<2x8xf32> to vector<2x8x1xf32>
    %278 = tpu.reciprocal %277 {approx = true} : vector<2x8x1xf32> -> vector<2x8x1xf32>
    %279 = vector.broadcast %278 : vector<2x8x1xf32> to vector<2x8x8xf32>
    %280 = arith.mulf %275, %279 : vector<2x8x8xf32>
    %281 = arith.truncf %280 : vector<2x8x8xf32> to vector<2x8x8xbf16>
    %cst_89 = arith.constant dense<0.000000e+00> : vector<2x8x32xf32>
    %282 = tpu.matmul %281, %267, %cst_89 {dimension_numbers = #tpu.dot_dimension_numbers<[2], [1], [1], [2], [0, 0, 0, 1, 1, 2], [0], [0]>} : vector<2x8x8xbf16>, vector<2x8x32xbf16>, vector<2x8x32xf32> -> vector<2x8x32xf32>
    %283 = vector.extract_strided_slice %219 {offsets = [0, 0, 96], sizes = [2, 8, 32], strides = [1, 1, 1]} : vector<2x8x384xf32> to vector<2x8x32xf32>
    %284 = arith.truncf %283 : vector<2x8x32xf32> to vector<2x8x32xbf16>
    %285 = vector.extract_strided_slice %219 {offsets = [0, 0, 224], sizes = [2, 8, 32], strides = [1, 1, 1]} : vector<2x8x384xf32> to vector<2x8x32xf32>
    %286 = arith.truncf %285 : vector<2x8x32xf32> to vector<2x8x32xbf16>
    %287 = vector.extract_strided_slice %219 {offsets = [0, 0, 352], sizes = [2, 8, 32], strides = [1, 1, 1]} : vector<2x8x384xf32> to vector<2x8x32xf32>
    %288 = arith.truncf %287 : vector<2x8x32xf32> to vector<2x8x32xbf16>
    %cst_90 = arith.constant dense<0.000000e+00> : vector<2x8x8xf32>
    %289 = tpu.matmul %284, %286, %cst_90 {dimension_numbers = #tpu.dot_dimension_numbers<[2], [2], [1], [1], [0, 0, 0, 1, 1, 1], [0], [0]>} : vector<2x8x32xbf16>, vector<2x8x32xbf16>, vector<2x8x8xf32> -> vector<2x8x8xf32>
    %290 = vector.broadcast %0 : vector<2x1x8xf32> to vector<2x8x8xf32>
    %291 = arith.addf %289, %290 : vector<2x8x8xf32>
    %cst_91 = arith.constant dense<0xFF800000> : vector<2x8xf32>
    %292 = vector.multi_reduction <maximumf>, %291, %cst_91 [2] : vector<2x8x8xf32> to vector<2x8xf32>
    %293 = vector.shape_cast %292 : vector<2x8xf32> to vector<2x8x1xf32>
    %294 = vector.broadcast %293 : vector<2x8x1xf32> to vector<2x8x8xf32>
    %295 = arith.subf %291, %294 : vector<2x8x8xf32>
    %296 = math.exp %295 : vector<2x8x8xf32>
    %cst_92 = arith.constant dense<0.000000e+00> : vector<2x8xf32>
    %297 = vector.multi_reduction <add>, %296, %cst_92 [2] : vector<2x8x8xf32> to vector<2x8xf32>
    %298 = vector.shape_cast %297 : vector<2x8xf32> to vector<2x8x1xf32>
    %299 = tpu.reciprocal %298 {approx = true} : vector<2x8x1xf32> -> vector<2x8x1xf32>
    %300 = vector.broadcast %299 : vector<2x8x1xf32> to vector<2x8x8xf32>
    %301 = arith.mulf %296, %300 : vector<2x8x8xf32>
    %302 = arith.truncf %301 : vector<2x8x8xf32> to vector<2x8x8xbf16>
    %cst_93 = arith.constant dense<0.000000e+00> : vector<2x8x32xf32>
    %303 = tpu.matmul %302, %288, %cst_93 {dimension_numbers = #tpu.dot_dimension_numbers<[2], [1], [1], [2], [0, 0, 0, 1, 1, 2], [0], [0]>} : vector<2x8x8xbf16>, vector<2x8x32xbf16>, vector<2x8x32xf32> -> vector<2x8x32xf32>
    %304 = tpu.concatenate %240, %261, %282, %303 in 2 : vector<2x8x32xf32>, vector<2x8x32xf32>, vector<2x8x32xf32>, vector<2x8x32xf32> -> vector<2x8x128xf32>
    %305 = vector.shape_cast %304 : vector<2x8x128xf32> to vector<16x128xf32>
    %306 = arith.truncf %305 : vector<16x128xf32> to vector<16x128xbf16>
    %c1_94 = arith.constant 1 : index
    %c0_95 = arith.constant 0 : index
    %c0_96 = arith.constant 0 : index
    %307 = vector.load %arg4[%c1_94, %c0_95, %c0_96] : memref<2x128x128xbf16, #tpu.memory_space<vmem>>, vector<1x128x128xbf16>
    %308 = vector.shape_cast %307 : vector<1x128x128xbf16> to vector<128x128xbf16>
    %cst_97 = arith.constant dense<0.000000e+00> : vector<16x128xf32>
    %309 = tpu.matmul %306, %308, %cst_97 {dimension_numbers = #tpu.dot_dimension_numbers<[1], [0], [0], [1], [0, 0, 1, 1], [], []>} : vector<16x128xbf16>, vector<128x128xbf16>, vector<16x128xf32> -> vector<16x128xf32>
    %310 = vector.broadcast %206 : vector<1x128xf32> to vector<16x128xf32>
    %311 = arith.addf %309, %310 : vector<16x128xf32>
    %312 = arith.addf %311, %204 : vector<16x128xf32>
    %cst_98 = arith.constant dense<0.000000e+00> : vector<16xf32>
    %313 = vector.multi_reduction <add>, %312, %cst_98 [1] : vector<16x128xf32> to vector<16xf32>
    %314 = vector.shape_cast %313 : vector<16xf32> to vector<16x1xf32>
    %cst_99 = arith.constant 1.280000e+02 : f32
    %315 = vector.broadcast %cst_99 : f32 to vector<16x1xf32>
    %316 = arith.divf %314, %315 : vector<16x1xf32>
    %317 = vector.broadcast %316 : vector<16x1xf32> to vector<16x128xf32>
    %318 = arith.subf %312, %317 : vector<16x128xf32>
    %319 = arith.mulf %318, %318 : vector<16x128xf32>
    %cst_100 = arith.constant dense<0.000000e+00> : vector<16xf32>
    %320 = vector.multi_reduction <add>, %319, %cst_100 [1] : vector<16x128xf32> to vector<16xf32>
    %321 = vector.shape_cast %320 : vector<16xf32> to vector<16x1xf32>
    %cst_101 = arith.constant 1.280000e+02 : f32
    %322 = vector.broadcast %cst_101 : f32 to vector<16x1xf32>
    %323 = arith.divf %321, %322 : vector<16x1xf32>
    %cst_102 = arith.constant 9.99999996E-13 : f32
    %324 = vector.broadcast %cst_102 : f32 to vector<16x1xf32>
    %325 = arith.addf %323, %324 : vector<16x1xf32>
    %326 = math.rsqrt %325 : vector<16x1xf32>
    %327 = vector.broadcast %316 : vector<16x1xf32> to vector<16x128xf32>
    %328 = arith.subf %312, %327 : vector<16x128xf32>
    %329 = vector.broadcast %326 : vector<16x1xf32> to vector<16x128xf32>
    %330 = arith.mulf %328, %329 : vector<16x128xf32>
    %331 = vector.broadcast %207 : vector<1x128xf32> to vector<16x128xf32>
    %332 = arith.mulf %330, %331 : vector<16x128xf32>
    %333 = vector.broadcast %208 : vector<1x128xf32> to vector<16x128xf32>
    %334 = arith.addf %332, %333 : vector<16x128xf32>
    %335 = arith.truncf %334 : vector<16x128xf32> to vector<16x128xbf16>
    %c1_103 = arith.constant 1 : index
    %c0_104 = arith.constant 0 : index
    %c0_105 = arith.constant 0 : index
    %336 = vector.load %arg5[%c1_103, %c0_104, %c0_105] : memref<2x128x256xbf16, #tpu.memory_space<vmem>>, vector<1x128x256xbf16>
    %337 = vector.shape_cast %336 : vector<1x128x256xbf16> to vector<128x256xbf16>
    %cst_106 = arith.constant dense<0.000000e+00> : vector<16x256xf32>
    %338 = tpu.matmul %335, %337, %cst_106 {dimension_numbers = #tpu.dot_dimension_numbers<[1], [0], [0], [1], [0, 0, 1, 1], [], []>} : vector<16x128xbf16>, vector<128x256xbf16>, vector<16x256xf32> -> vector<16x256xf32>
    %339 = vector.broadcast %209 : vector<1x256xf32> to vector<16x256xf32>
    %340 = arith.addf %338, %339 : vector<16x256xf32>
    %341 = arith.mulf %340, %340 : vector<16x256xf32>
    %342 = arith.mulf %340, %341 : vector<16x256xf32>
    %cst_107 = arith.constant 4.471500e-02 : f32
    %343 = vector.broadcast %cst_107 : f32 to vector<16x256xf32>
    %344 = arith.mulf %343, %342 : vector<16x256xf32>
    %345 = arith.addf %340, %344 : vector<16x256xf32>
    %cst_108 = arith.constant 0.797884583 : f32
    %346 = vector.broadcast %cst_108 : f32 to vector<16x256xf32>
    %347 = arith.mulf %346, %345 : vector<16x256xf32>
    %348 = math.tanh %347 : vector<16x256xf32>
    %cst_109 = arith.constant 1.000000e+00 : f32
    %349 = vector.broadcast %cst_109 : f32 to vector<16x256xf32>
    %350 = arith.addf %349, %348 : vector<16x256xf32>
    %cst_110 = arith.constant 5.000000e-01 : f32
    %351 = vector.broadcast %cst_110 : f32 to vector<16x256xf32>
    %352 = arith.mulf %351, %350 : vector<16x256xf32>
    %353 = arith.mulf %340, %352 : vector<16x256xf32>
    %354 = arith.truncf %353 : vector<16x256xf32> to vector<16x256xbf16>
    %c1_111 = arith.constant 1 : index
    %c0_112 = arith.constant 0 : index
    %c0_113 = arith.constant 0 : index
    %355 = vector.load %arg6[%c1_111, %c0_112, %c0_113] : memref<2x256x128xbf16, #tpu.memory_space<vmem>>, vector<1x256x128xbf16>
    %356 = vector.shape_cast %355 : vector<1x256x128xbf16> to vector<256x128xbf16>
    %cst_114 = arith.constant dense<0.000000e+00> : vector<16x128xf32>
    %357 = tpu.matmul %354, %356, %cst_114 {dimension_numbers = #tpu.dot_dimension_numbers<[1], [0], [0], [1], [0, 0, 1, 1], [], []>} : vector<16x256xbf16>, vector<256x128xbf16>, vector<16x128xf32> -> vector<16x128xf32>
    %358 = vector.broadcast %210 : vector<1x128xf32> to vector<16x128xf32>
    %359 = arith.addf %357, %358 : vector<16x128xf32>
    %360 = arith.addf %359, %334 : vector<16x128xf32>
    %cst_115 = arith.constant dense<0.000000e+00> : vector<16xf32>
    %361 = vector.multi_reduction <add>, %360, %cst_115 [1] : vector<16x128xf32> to vector<16xf32>
    %362 = vector.shape_cast %361 : vector<16xf32> to vector<16x1xf32>
    %cst_116 = arith.constant 1.280000e+02 : f32
    %363 = vector.broadcast %cst_116 : f32 to vector<16x1xf32>
    %364 = arith.divf %362, %363 : vector<16x1xf32>
    %365 = vector.broadcast %364 : vector<16x1xf32> to vector<16x128xf32>
    %366 = arith.subf %360, %365 : vector<16x128xf32>
    %367 = arith.mulf %366, %366 : vector<16x128xf32>
    %cst_117 = arith.constant dense<0.000000e+00> : vector<16xf32>
    %368 = vector.multi_reduction <add>, %367, %cst_117 [1] : vector<16x128xf32> to vector<16xf32>
    %369 = vector.shape_cast %368 : vector<16xf32> to vector<16x1xf32>
    %cst_118 = arith.constant 1.280000e+02 : f32
    %370 = vector.broadcast %cst_118 : f32 to vector<16x1xf32>
    %371 = arith.divf %369, %370 : vector<16x1xf32>
    %cst_119 = arith.constant 9.99999996E-13 : f32
    %372 = vector.broadcast %cst_119 : f32 to vector<16x1xf32>
    %373 = arith.addf %371, %372 : vector<16x1xf32>
    %374 = math.rsqrt %373 : vector<16x1xf32>
    %375 = vector.broadcast %364 : vector<16x1xf32> to vector<16x128xf32>
    %376 = arith.subf %360, %375 : vector<16x128xf32>
    %377 = vector.broadcast %374 : vector<16x1xf32> to vector<16x128xf32>
    %378 = arith.mulf %376, %377 : vector<16x128xf32>
    %379 = vector.broadcast %211 : vector<1x128xf32> to vector<16x128xf32>
    %380 = arith.mulf %378, %379 : vector<16x128xf32>
    %381 = vector.broadcast %212 : vector<1x128xf32> to vector<16x128xf32>
    %382 = arith.addf %380, %381 : vector<16x128xf32>
    %383 = vector.shape_cast %382 : vector<16x128xf32> to vector<2x8x128xf32>
    %384 = vector.extract_strided_slice %383 {offsets = [0, 0, 0], sizes = [2, 1, 128], strides = [1, 1, 1]} : vector<2x8x128xf32> to vector<2x1x128xf32>
    %385 = vector.shape_cast %384 : vector<2x1x128xf32> to vector<2x128xf32>
    %386 = arith.truncf %385 : vector<2x128xf32> to vector<2x128xbf16>
    %c0_120 = arith.constant 0 : index
    %c0_121 = arith.constant 0 : index
    %387 = vector.load %arg7[%c0_120, %c0_121] : memref<128x128xbf16, #tpu.memory_space<vmem>>, vector<128x128xbf16>
    %cst_122 = arith.constant dense<0.000000e+00> : vector<2x128xf32>
    %388 = tpu.matmul %386, %387, %cst_122 {dimension_numbers = #tpu.dot_dimension_numbers<[1], [0], [0], [1], [0, 0, 1, 1], [], []>} : vector<2x128xbf16>, vector<128x128xbf16>, vector<2x128xf32> -> vector<2x128xf32>
    %c18 = arith.constant 18 : index
    %c0_123 = arith.constant 0 : index
    %389 = vector.load %arg8[%c18, %c0_123] : memref<24x384xf32, #tpu.memory_space<vmem>>, vector<1x128xf32>
    %390 = vector.broadcast %389 : vector<1x128xf32> to vector<2x128xf32>
    %391 = arith.addf %388, %390 : vector<2x128xf32>
    %c0_124 = arith.constant 0 : index
    %c0_125 = arith.constant 0 : index
    %392 = vector.load %arg9[%c0_124, %c0_125] : memref<2x128xf32, #tpu.memory_space<vmem>>, vector<2x128xf32>
    tpu.vector_store %arg9[%c0_124, %c0_125], %391 {strides = array<i32>} : memref<2x128xf32, #tpu.memory_space<vmem>>, vector<2x128xf32>,
    return
  }
  func.func @transform_0(%arg0: i32) -> (i32, i32, i32) {
    %c0_i32 = arith.constant 0 : i32
    %c0_i32_0 = arith.constant 0 : i32
    %c0_i32_1 = arith.constant 0 : i32
    return %arg0, %c0_i32, %c0_i32_0 : i32, i32, i32
  }
  func.func @transform_1(%arg0: i32) -> (i32, i32, i32) {
    %c0_i32 = arith.constant 0 : i32
    %c0_i32_0 = arith.constant 0 : i32
    %c0_i32_1 = arith.constant 0 : i32
    return %arg0, %c0_i32, %c0_i32_0 : i32, i32, i32
  }
  func.func @transform_2(%arg0: i32) -> (i32, i32, i32) {
    %c0_i32 = arith.constant 0 : i32
    %c0_i32_0 = arith.constant 0 : i32
    %c0_i32_1 = arith.constant 0 : i32
    %c0_i32_2 = arith.constant 0 : i32
    return %c0_i32, %c0_i32_0, %c0_i32_1 : i32, i32, i32
  }
  func.func @transform_3(%arg0: i32) -> (i32, i32, i32) {
    %c0_i32 = arith.constant 0 : i32
    %c0_i32_0 = arith.constant 0 : i32
    %c0_i32_1 = arith.constant 0 : i32
    %c0_i32_2 = arith.constant 0 : i32
    return %c0_i32, %c0_i32_0, %c0_i32_1 : i32, i32, i32
  }
  func.func @transform_4(%arg0: i32) -> (i32, i32, i32) {
    %c0_i32 = arith.constant 0 : i32
    %c0_i32_0 = arith.constant 0 : i32
    %c0_i32_1 = arith.constant 0 : i32
    %c0_i32_2 = arith.constant 0 : i32
    return %c0_i32, %c0_i32_0, %c0_i32_1 : i32, i32, i32
  }
  func.func @transform_5(%arg0: i32) -> (i32, i32, i32) {
    %c0_i32 = arith.constant 0 : i32
    %c0_i32_0 = arith.constant 0 : i32
    %c0_i32_1 = arith.constant 0 : i32
    %c0_i32_2 = arith.constant 0 : i32
    return %c0_i32, %c0_i32_0, %c0_i32_1 : i32, i32, i32
  }
  func.func @transform_6(%arg0: i32) -> (i32, i32) {
    %c0_i32 = arith.constant 0 : i32
    %c0_i32_0 = arith.constant 0 : i32
    %c0_i32_1 = arith.constant 0 : i32
    return %c0_i32, %c0_i32_0 : i32, i32
  }
  func.func @transform_7(%arg0: i32) -> (i32, i32) {
    %c0_i32 = arith.constant 0 : i32
    %c0_i32_0 = arith.constant 0 : i32
    %c0_i32_1 = arith.constant 0 : i32
    return %c0_i32, %c0_i32_0 : i32, i32
  }
  func.func @transform_8(%arg0: i32) -> (i32, i32) {
    %c0_i32 = arith.constant 0 : i32
    %c0_i32_0 = arith.constant 0 : i32
    return %arg0, %c0_i32 : i32, i32
  }
}

</mosaic_0001>

<bundles_post_ra>
// kernel: mini_tag_transformer_forward.1
= control target key start
LH: loop header
LB: loop body
LE: loop exit
PB: predicated region body
PF: predicated region fallthrough
CT: control target
= control target key end

     0   :  { %13 = vsyncpa [#allocation3], 0  ;;  %s5527_s0 = inlined_call_operand.vmem [shape: f32[2,8,128], index: 0, kind: input, shape index: {}]   ;;  %s5528_s1 = inlined_call_operand.vmem [shape: f32[2,1,8], index: 1, kind: input, shape index: {}]   ;;  %s5529_s2 = inlined_call_operand.hbm [shape: bf16[2,128,384], index: 2, kind: input, shape index: {}]   ;;  %s5530_s3 = inlined_call_operand.hbm [shape: bf16[2,128,128], index: 3, kind: input, shape index: {}]   ;;  %s5531_s4 = inlined_call_operand.vmem [shape: bf16[2,128,256], index: 4, kind: input, shape index: {}]   ;;  %s5532_s5 = inlined_call_operand.hbm [shape: bf16[2,256,128], index: 5, kind: input, shape index: {}]   ;;  %s5533_s6 = inlined_call_operand.hbm [shape: bf16[128,128], index: 6, kind: input, shape index: {}]   ;;  %s5534_s7 = inlined_call_operand.hbm [shape: f32[24,384], index: 7, kind: input, shape index: {}]   ;;  %s5535_s8 = inlined_call_operand.hbm [shape: f32[2,128], index: 8, kind: output, shape index: {}]  }
   0x1   :  { %14 = vsyncpa [#allocation6], 0 }
   0x2   :  { %15 = vsyncpa [#allocation9], 0 }
   0x3   :  { %16 = vsyncpa [#allocation4], 0  ;;  %s4777_s27 = smov [#allocation5]   ;;  %s4637_s9 = scalar_lea.hbm %s5530_s3, 2048 }
   0x4   :  { %s38_s28 = sshll.u32 %s4777_s27, 4  ;;  %p4638_p0 = scmp.ne.s32.totalorder %s5530_s3, %s4637_s9  ;;  %s39_s28 = int_to_ptr.vmem [resolvable:$true] %s38_s28 }
   0x5   :  { %p4641_p1 = scmp.lt.u32.totalorder %s4637_s9, %s5530_s3 }
   0x7   :  { %p4643_p2 = pnand %p4641_p1, %p4638_p0 }
   0x9   :  { %4646 = shalt.err (!%p4643_p2)
}
   0xa   :  { %s4647_s14 = scalar_lea.vmem %s39_s28, 2048  ;;  %p4652_p4 = scmp.lt.s32.totalorder %s39_s28, %s39_s28 }
   0xb   :  { %p4648_p3 = scmp.ne.s32.totalorder %s39_s28, %s4647_s14  ;;  %p4653_p5 = scmp.lt.s32.totalorder %s4647_s14, %s4647_s14 }
   0xd   :  { %p4654_p6 = por %p4653_p5, %p4652_p4 }
   0xf   :  { %p4655_p7 = pnand %p4654_p6, %p4648_p3 }
  0x11   :  { %4658 = shalt.err (!%p4655_p7)
}
  0x12   :  { %s4778_s15 = smov 64   ;;  %s4779_s16 = smov 4  }
  0x13   :  { %44 = dma.hbm_to_vmem [thread:$0]  %s5530_s3, 2048, %s39_s28, [#allocation6], %s4778_s15, %s4778_s15, %s4779_s16  }
  0x14   :  { %s4780_s19 = smov [#allocation8]   ;;  %s4781_s21 = smov [#allocation2]  }
  0x15   :  { %s64_s20 = sshll.u32 %s4780_s19, 4  ;;  %s26_s22 = sshll.u32 %s4781_s21, 4  ;;  %s65_s20 = int_to_ptr.vmem [resolvable:$true] %s64_s20  ;;  %s27_s22 = int_to_ptr.vmem [resolvable:$true] %s26_s22 }
  0x16   :  { %s4659_s25 = scalar_lea.hbm %s5533_s6, 1024 }
  0x17   :  { %p4660_p8 = scmp.ne.s32.totalorder %s5533_s6, %s4659_s25  ;;  %p4663_p9 = scmp.lt.u32.totalorder %s4659_s25, %s5533_s6 }
  0x19   :  { %p4665_p10 = pnand %p4663_p9, %p4660_p8 }
  0x1b   :  { %4668 = shalt.err (!%p4665_p10)
}
  0x1c   :  { %s4669_s3 = scalar_lea.vmem %s65_s20, 1024  ;;  %p4674_p12 = scmp.lt.s32.totalorder %s65_s20, %s65_s20 }
  0x1d   :  { %p4670_p11 = scmp.ne.s32.totalorder %s65_s20, %s4669_s3  ;;  %p4675_p13 = scmp.lt.s32.totalorder %s4669_s3, %s4669_s3 }
  0x1f   :  { %p4676_p0 = por %p4675_p13, %p4674_p12 }
  0x21   :  { %p4677_p1 = pnand %p4676_p0, %p4670_p11 }
  0x23   :  { %4680 = shalt.err (!%p4677_p1)
}
  0x24   :  { %70 = dma.hbm_to_vmem [thread:$0]  %s5533_s6, 1024, %s65_s20, [#allocation9], %s4778_s15, %s4778_s15, %s4779_s16  }
  0x25   :  { %s4681_s12 = scalar_lea.hbm %s5529_s2, 6144 }
  0x26   :  { %p4682_p2 = scmp.ne.s32.totalorder %s5529_s2, %s4681_s12  ;;  %p4685_p3 = scmp.lt.u32.totalorder %s4681_s12, %s5529_s2 }
  0x28   :  { %p4687_p4 = pnand %p4685_p3, %p4682_p2 }
  0x2a   :  { %4690 = shalt.err (!%p4687_p4)
}
  0x2b   :  { %s4691_s19 = scalar_lea.vmem %s27_s22, 6144  ;;  %p4696_p6 = scmp.lt.s32.totalorder %s27_s22, %s27_s22 }
  0x2c   :  { %p4692_p5 = scmp.ne.s32.totalorder %s27_s22, %s4691_s19  ;;  %p4697_p7 = scmp.lt.s32.totalorder %s4691_s19, %s4691_s19 }
  0x2e   :  { %p4698_p8 = por %p4697_p7, %p4696_p6 }
  0x30   :  { %p4699_p9 = pnand %p4698_p8, %p4692_p5 }
  0x32   :  { %4702 = shalt.err (!%p4699_p9)
}
  0x33   :  { %s4782_s6 = smov 192   ;;  %s4783_s20 = smov 12  }
  0x34   :  { %32 = dma.hbm_to_vmem [thread:$0]  %s5529_s2, 6144, %s27_s22, [#allocation3], %s4782_s6, %s4782_s6, %s4783_s20  }
  0x35   :  { %s4784_s24 = smov [#allocation7]   ;;  %s4785_s26 = smov [#allocation10]  }
  0x36   :  { %s52_s25 = sshll.u32 %s4784_s24, 4  ;;  %s76_s27 = sshll.u32 %s4785_s26, 4  ;;  %s53_s25 = int_to_ptr.vmem [resolvable:$true] %s52_s25  ;;  %s77_s27 = int_to_ptr.vmem [resolvable:$true] %s76_s27 }
  0x37   :  { %s4703_s3 = scalar_lea.hbm %s5532_s5, 4096 }
  0x38   :  { %p4704_p10 = scmp.ne.s32.totalorder %s5532_s5, %s4703_s3  ;;  %p4707_p11 = scmp.lt.u32.totalorder %s4703_s3, %s5532_s5 }
  0x3a   :  { %p4709_p12 = pnand %p4707_p11, %p4704_p10 }
  0x3c   :  { %4712 = shalt.err (!%p4709_p12)
}
  0x3d   :  { %s4713_s2 = scalar_lea.vmem %s53_s25, 4096  ;;  %p4718_p0 = scmp.lt.s32.totalorder %s53_s25, %s53_s25 }
  0x3e   :  { %p4714_p13 = scmp.ne.s32.totalorder %s53_s25, %s4713_s2  ;;  %p4719_p1 = scmp.lt.s32.totalorder %s4713_s2, %s4713_s2 }
  0x40   :  { %p4720_p2 = por %p4719_p1, %p4718_p0 }
  0x42   :  { %p4721_p3 = pnand %p4720_p2, %p4714_p13 }
  0x44   :  { %4724 = shalt.err (!%p4721_p3)
}
  0x45   :  { %58 = dma.hbm_to_vmem [thread:$0]  %s5532_s5, 4096, %s53_s25, [#allocation6], %s4778_s15, %s4778_s15, %s4779_s16  }
  0x46   :  { %s4725_s17 = scalar_lea.hbm %s5534_s7, 1152 }
  0x47   :  { %p4726_p4 = scmp.ne.s32.totalorder %s5534_s7, %s4725_s17  ;;  %p4729_p5 = scmp.lt.u32.totalorder %s4725_s17, %s5534_s7 }
  0x49   :  { %p4731_p6 = pnand %p4729_p5, %p4726_p4 }
  0x4b   :  { %4734 = shalt.err (!%p4731_p6)
}
  0x4c   :  { %s4735_s21 = scalar_lea.vmem %s77_s27, 1152  ;;  %p4740_p8 = scmp.lt.s32.totalorder %s77_s27, %s77_s27 }
  0x4d   :  { %p4736_p7 = scmp.ne.s32.totalorder %s77_s27, %s4735_s21  ;;  %p4741_p9 = scmp.lt.s32.totalorder %s4735_s21, %s4735_s21 }
  0x4f   :  { %p4742_p10 = por %p4741_p9, %p4740_p8 }
  0x51   :  { %p4743_p11 = pnand %p4742_p10, %p4736_p7 }
  0x53   :  { %4746 = shalt.err (!%p4743_p11)
}
  0x54   :  { %s4786_s5 = smov 384   ;;  %s4787_s16 = smov 24  }
  0x55   :  { %82 = dma.hbm_to_vmem [thread:$0]  %s5534_s7, 1152, %s77_s27, [#allocation9], %s4786_s5, %s4786_s5, %s4787_s16  }
  0x56   :  { %4769 = dma.done.wait [#allocation3], 6144  }
  0x57   :  { %4770 = vsyncadd [#allocation3], 4294961152 }
  0x58   :  { %4771 = dma.done.wait [#allocation6], 6144  }
  0x59   :  { %4772 = vsyncadd [#allocation6], 4294961152 }
  0x5a   :  { %4773 = dma.done.wait [#allocation9], 2176  }
  0x5b   :  { %4774 = vsyncadd [#allocation9], 4294965120  ;;  %v101_v0 = vld [vmem:[%s5527_s0] sm:$0xff]  ;;  %v102_v1 = vld [vmem:[%s5527_s0 + $0x8] sm:$0xff]  ;;  %v4788_v4 = vmov 0.0   ;;  %v4789_v30 = vmov 0   ;;  %v176_v53 = vlaneseq }
  0x5c   :  { %105 = vadd.xlane.f32.xlu0 %v101_v0  ;;  %v4367_v2 = vld [vmem:[#allocation2 + $0x4] ss:$12 sps:$4 sm:$0xff]   ;;  %v4369_v3 = vld [vmem:[#allocation2] ss:$12 sps:$4 sm:$0xff]   ;;  %4028 = vmatprep.subr.bf16.mxu1 %v4788_v4  ;;  %v4370_v5 = vld [vmem:[#allocation2 + $0x8] ss:$12 sps:$4 sm:$0xff]  }
  0x5d   :  { %v4371_v6 = vld [vmem:[#allocation2 + $0x1c] ss:$12 sps:$4 sm:$0xff]   ;;  %319 = vmatprep.subr.bf16.mxu0 %v4367_v2  ;;  %4029 = vmatpush3.bf16.msra.mxu1 %v4370_v5  ;;  %v4373_v15 = vld [vmem:[#allocation2 + $0x18] ss:$12 sps:$4 sm:$0xff]   ;;  %v4374_v16 = vld [vmem:[#allocation2 + $0x20] ss:$12 sps:$4 sm:$0xff]  }
  0x5e   :  { %320 = vmatpush1.bf16.msra.mxu0 %v4369_v3  ;;  %4030 = vmatprep.subr.bf16.mxu1 %v4788_v4  ;;  %v4375_v17 = vld [vmem:[#allocation2 + $0x34] ss:$12 sps:$4 sm:$0xff]   ;;  %v4377_v18 = vld [vmem:[#allocation2 + $0x30] ss:$12 sps:$4 sm:$0xff]   ;;  %v4378_v19 = vld [vmem:[#allocation2 + $0x38] ss:$12 sps:$4 sm:$0xff]  }
  0x5f   :  { %321 = vmatprep.subr.bf16.mxu0 %v4371_v6  ;;  %v4379_v20 = vld [vmem:[#allocation2 + $0x4c] ss:$12 sps:$4 sm:$0xff]   ;;  %v4381_v21 = vld [vmem:[#allocation2 + $0x48] ss:$12 sps:$4 sm:$0xff]   ;;  %v4382_v22 = vld [vmem:[#allocation2 + $0x50] ss:$12 sps:$4 sm:$0xff]   ;;  %351 = vmatprep.mubr.bf16.mxu0 %v4789_v30 }
  0x60   :  { %107 = vadd.xlane.f32.xlu0 %v102_v1  ;;  %v4383_v23 = vld [vmem:[#allocation2 + $0x64] ss:$12 sps:$4 sm:$0xff]   ;;  %v4385_v24 = vld [vmem:[#allocation2 + $0x60] ss:$12 sps:$4 sm:$0xff]   ;;  %v4386_v25 = vld [vmem:[#allocation2 + $0x68] ss:$12 sps:$4 sm:$0xff]  }
  0x61   :  { %4031 = vmatpush3.bf16.msra.mxu1 %v4374_v16  ;;  %v4387_v26 = vld [vmem:[#allocation2 + $0x7c] ss:$12 sps:$4 sm:$0xff]   ;;  %v4389_v27 = vld [vmem:[#allocation2 + $0x78] ss:$12 sps:$4 sm:$0xff]   ;;  %v4390_v28 = vld [vmem:[#allocation2 + $0x80] ss:$12 sps:$4 sm:$0xff]  }
  0x62   :  { %322 = vmatpush1.bf16.msra.mxu0 %v4373_v15  ;;  %4032 = vmatprep.subr.bf16.mxu1 %v4788_v4  ;;  %v4391_v29 = vld [vmem:[#allocation2 + $0x94] ss:$12 sps:$4 sm:$0xff]   ;;  %vm4790_vm0 = vmmov 0   ;;  %v4393_v31 = vld [vmem:[#allocation2 + $0x90] ss:$12 sps:$4 sm:$0xff]   ;;  %v4947_v54 = vshrl.u32 %v176_v53, 7 }
  0x63   :  { %323 = vmatprep.subr.bf16.mxu0 %v4375_v17  ;;  %4044 = vmatprep.mubr.msk.bf16.mxu1 %vm4790_vm0, %v4788_v4  ;;  %v4394_v32 = vld [vmem:[#allocation2 + $0x98] ss:$12 sps:$4 sm:$0xff]   ;;  %v4397_v34 = vld [vmem:[#allocation2 + $0xa8] ss:$12 sps:$4 sm:$0xff]   ;;  %v4398_v35 = vld [vmem:[#allocation2 + $0xb0] ss:$12 sps:$4 sm:$0xff]  }
  0x64   :  { %v4395_v33 = vld [vmem:[#allocation2 + $0xac] ss:$12 sps:$4 sm:$0xff]   ;;  %v103_v44 = vld [vmem:[#allocation10] ss:$0 sm:$0xff]  ;;  %v104_v48 = vld [vmem:[#allocation10 + $0x1] ss:$0 sm:$0xff] }
  0x65   :  { %4033 = vmatpush3.bf16.msra.mxu1 %v4378_v19  ;;  %v4950_v55 = vsub.s32 1, %v4947_v54  ;;  %v133_v56 = vld [vmem:[#allocation10 + $0x2] ss:$8 sm:$0x7]  ;;  %v186_v57 = vsub.s32 2, %v4947_v54  ;;  %v4955_v59 = vsub.s32 0, %v4947_v54 }
  0x66   :  { %324 = vmatpush1.bf16.msra.mxu0 %v4377_v18  ;;  %4034 = vmatprep.subr.bf16.mxu1 %v4788_v4  ;;  %vm421_vm1 = vcmask 261120   ;;  %vm542_vm2 = vcmask 1043456   ;;  %vm514_vm3 = vcmask 64512   ;;  %s4791_s28 = smov 96   ;;  %s4792_s9 = smov 32   ;;  %vm1324_vm4 = vcmask 523264  }
  0x67   :  { %325 = vmatprep.subr.bf16.mxu0 %v4379_v20  ;;  %v183_v58 = vrot.slane %v133_v56, %v4950_v55  ;;  %vm1327_vm5 = vcmask 785408   ;;  %vm3579_vm6 = vcmask 1041409  }
  0x69   :  { %4035 = vmatpush3.bf16.msra.mxu1 %v4382_v22 }
  0x6a   :  { %326 = vmatpush1.bf16.msra.mxu0 %v4381_v21  ;;  %4036 = vmatprep.subr.bf16.mxu1 %v4788_v4 }
  0x6b   :  { %327 = vmatprep.subr.bf16.mxu0 %v4383_v23  ;;  %v4995_v23 = vld [vmem:[%s5528_s1] ss:$0 sm:$0xff] }
  0x6d   :  { %4037 = vmatpush3.bf16.msra.mxu1 %v4386_v25  ;;  %v5000_v25 = vld [vmem:[%s5528_s1 + $0x1] ss:$0 sm:$0xff] }
  0x6e   :  { %328 = vmatpush1.bf16.msra.mxu0 %v4385_v24  ;;  %4038 = vmatprep.subr.bf16.mxu1 %v4788_v4 }
  0x6f   :  { %329 = vmatprep.subr.bf16.mxu0 %v4387_v26 }
  0x71   :  { %4039 = vmatpush3.bf16.msra.mxu1 %v4390_v28 }
  0x72   :  { %330 = vmatpush1.bf16.msra.mxu0 %v4389_v27  ;;  %4040 = vmatprep.subr.bf16.mxu1 %v4788_v4 }
  0x73   :  { %331 = vmatprep.subr.bf16.mxu0 %v4391_v29 }
  0x75   :  { %4041 = vmatpush3.bf16.msra.mxu1 %v4394_v32 }
  0x76   :  { %332 = vmatpush1.bf16.msra.mxu0 %v4393_v31  ;;  %4042 = vmatprep.subr.bf16.mxu1 %v4788_v4 }
  0x77   :  { %333 = vmatprep.subr.bf16.mxu0 %v4395_v33 }
  0x79   :  { %4043 = vmatpush3.bf16.msra.mxu1 %v4398_v35 }
  0x7a   :  { %334 = vmatpush1.bf16.msra.mxu0 %v4397_v34  ;;  %4054 = vmatprep.subr.bf16.mxu1 %v4788_v4 }
  0x7b   :  { %4048 = vmatprep.subr.bf16.mxu0 %v4788_v4 }
  0xe9   :  { %v106_v7 = vpop.xlane.xlu0 %105 }
  0xea   :  { %v110_v8 = vmul.f32 0.0078125, %v106_v7  ;;  %v179_v7 = vrot.slane %v133_v56, %v4955_v59 }
  0xec   :  { %v4916_v9 = vsub.f32 %v101_v0, %v110_v8  ;;  %v187_v0 = vrot.slane %v133_v56, %v186_v57 }
  0xed   :  { %v108_v10 = vpop.xlane.xlu0 %107 }
  0xee   :  { %v111_v11 = vmul.f32 0.0078125, %v108_v10  ;;  %v114_v12 = vmul.f32 %v4916_v9, %v4916_v9 }
  0xf0   :  { %v4920_v13 = vsub.f32 %v102_v1, %v111_v11  ;;  %116 = vadd.xlane.f32.xlu1 %v114_v12 }
  0xf2   :  { %v115_v14 = vmul.f32 %v4920_v13, %v4920_v13 }
  0xf4   :  { %118 = vadd.xlane.f32.xlu1 %v115_v14 }
 0x17d   :  { %v117_v36 = vpop.xlane.xlu1 %116 }
 0x17e   :  { %v120_v37 = vmul.f32 0.0078125, %v117_v36 }
 0x180   :  { %v122_v38 = vadd.f32 1e-12, %v120_v37 }
 0x181   :  { %v119_v39 = vpop.xlane.xlu1 %118 }
 0x182   :  { %4535 = vrsqrt.f32 %v122_v38  ;;  %v121_v40 = vmul.f32 0.0078125, %v119_v39 }
 0x184   :  { %v123_v41 = vadd.f32 1e-12, %v121_v40 }
 0x186   :  { %4537 = vrsqrt.f32 %v123_v41 }
 0x18c   :  { %v4536_v42 = vpop.eup %4535 }
 0x18d   :  { %v126_v43 = vmul.f32 %v4536_v42, %v4916_v9 }
 0x18f   :  { %v128_v47 = vmul.f32 %v126_v43, %v103_v44 }
 0x190   :  { %v4538_v45 = vpop.eup %4537 }
 0x191   :  { %v127_v46 = vmul.f32 %v4538_v45, %v4920_v13  ;;  %v4937_v50 = vadd.f32 %v128_v47, %v104_v48 }
 0x193   :  { %v129_v49 = vmul.f32 %v127_v46, %v103_v44 }
 0x195   :  { %v4939_v51 = vadd.f32 %v129_v49, %v104_v48 }
 0x197   :  { %v142_v52 = vpack.c.bf16 %v4939_v51, %v4937_v50 }
 0x199   :  { %352 = vmatmul.mubr.bf16.vlgmr.msra.gmra.mrb[0].mxu0 %v142_v52  ;;  %4045 = vmatmul.mubr.bf16.vlgmr.msra.gmra.mrb[0].mxu1 %v142_v52 }
 0x19a   :  { %4050 = vmatprep.mubr.msk.bf16.mxu0 %vm4790_vm0, %v4788_v4  ;;  %4056 = vmatprep.mubr.msk.bf16.mxu1 %vm4790_vm0, %v4788_v4 }
 0x26c   :  { %v353_v60 = vpop.f32.mrb[0].mxu0  ;;  %v396_v61 = vpop.f32.mrb[0].mxu1 }
 0x26d   :  { %v355_v62 = vpop.f32.mrb[1].mxu0  ;;  %v4046_v63 = vpop.f32.mrb[1].mxu1  ;;  %v397_v10 = vadd.f32 %v396_v61, %v187_v0  ;;  %v354_v13 = vadd.f32 %v353_v60, %v179_v7 }
 0x26e   :  { %v356_v1 = vadd.f32 %v355_v62, %v183_v58  ;;  %v357_v2 = vpop.f32.mrb[2].mxu0  ;;  %v399_v3 = vpop.f32.mrb[2].mxu1 }
 0x26f   :  { %v359_v5 = vpop.f32.mrb[3].mxu0  ;;  %v4047_v6 = vpop.f32.mrb[3].mxu1  ;;  %v400_v14 = vadd.f32 %v399_v3, %v187_v0  ;;  %v4969_v16 = vpack.c.bf16 %v397_v10, %v397_v10  ;;  %v358_v17 = vadd.f32 %v357_v2, %v179_v7  ;;  %v4972_v18 = vpack.c.bf16 %v354_v13, %v354_v13 }
 0x270   :  { %v4960_v8 = vpack.c.bf16 %v356_v1, %v356_v1  ;;  %v360_v9 = vadd.f32 %v359_v5, %v183_v58 }
 0x271   :  { %v4974_v19 = vpack.c.bf16 %v400_v14, %v400_v14  ;;  %v4976_v20 = vpack.c.bf16 %v358_v17, %v358_v17  ;;  %v544_v21 = vsel %vm542_vm2, %v4969_v16, 0 }
 0x272   :  { %v4962_v11 = vpack.c.bf16 %v360_v9, %v360_v9  ;;  %v426_v12 = vsel %vm421_vm1, %v4960_v8, 0 }
 0x273   :  { %4049 = vmatpush3.bf16.xpose.msra.mxu0 %v426_v12  ;;  %v590_v22 = vsel %vm542_vm2, %v4974_v19, 0 }
 0x274   :  { %v472_v15 = vsel %vm421_vm1, %v4962_v11, 0  ;;  %4060 = vmatprep.subr.bf16.mxu0 %v4788_v4 }
 0x275   :  { %4055 = vmatpush3.bf16.xpose.msra.mxu1 %v472_v15 }
 0x276   :  { %4066 = vmatprep.subr.bf16.mxu1 %v4788_v4 }
 0x27a   :  { %4051 = vmatmul.mubr.msk.bf16.vlgmr.msra.gmra.mrb[4].mxu0 %vm421_vm1, %v4972_v18 }
 0x27b   :  { %4061 = vmatpush3.bf16.msra.mxu0 %v544_v21  ;;  %4062 = vmatprep.mubr.msk.bf16.mxu0 %vm4790_vm0, %v4788_v4 }
 0x27c   :  { %4057 = vmatmul.mubr.msk.bf16.vlgmr.msra.gmra.mrb[4].mxu1 %vm421_vm1, %v4976_v20  ;;  %4072 = vmatprep.subr.bf16.mxu0 %v4788_v4 }
 0x27d   :  { %4067 = vmatpush3.bf16.msra.mxu1 %v590_v22  ;;  %4068 = vmatprep.mubr.msk.bf16.mxu1 %vm4790_vm0, %v4788_v4 }
 0x27e   :  { %4078 = vmatprep.subr.bf16.mxu1 %v4788_v4 }
 0x34d   :  { %v462_v24 = vpop.f32.mrb[4].mxu0 }
 0x34e   :  { %v463_v26 = vadd.f32 %v4995_v23, %v462_v24  ;;  %v4052_v27 = vpop.f32.mrb[5].mxu0 }
 0x34f   :  { %v465_v28 = vpop.f32.mrb[6].mxu0  ;;  %v508_v29 = vpop.f32.mrb[4].mxu1 }
 0x350   :  { %v509_v31 = vadd.f32 %v5000_v25, %v508_v29  ;;  %v4053_v32 = vpop.f32.mrb[7].mxu0  ;;  %v4058_v33 = vpop.f32.mrb[5].mxu1  ;;  %v515_v34 = vsel %vm514_vm3, %v463_v26, -inf }
 0x351   :  { %v511_v35 = vpop.f32.mrb[6].mxu1  ;;  %516 = vmax.xlane.f32.xlu0 %v515_v34 }
 0x352   :  { %v4059_v36 = vpop.f32.mrb[7].mxu1  ;;  %v518_v37 = vsel %vm514_vm3, %v509_v31, -inf }
 0x353   :  { %519 = vmax.xlane.f32.xlu1 %v518_v37 }
 0x364   :  { %688 = vrot.lane.b32.xlu1 %v4962_v11, %s4791_s28 }
 0x3de   :  { %v517_v38 = vpop.xlane.xlu0 %516 }
 0x3df   :  { %v521_v39 = vsub.f32 %v463_v26, %v517_v38 }
 0x3e0   :  { %v520_v40 = vpop.xlane.xlu1 %519 }
 0x3e1   :  { %v523_v41 = vmul.f32 1.442695, %v521_v39  ;;  %v522_v42 = vsub.f32 %v509_v31, %v520_v40 }
 0x3e3   :  { %4539 = vpow2.f32 %v523_v41  ;;  %v525_v43 = vmul.f32 1.442695, %v522_v42 }
 0x3e4   :  { %v689_v48 = vpop.permute.xlu1 %688 }
 0x3e5   :  { %4541 = vpow2.f32 %v525_v43  ;;  %v694_v1 = vsel %vm421_vm1, %v689_v48, 0 }
 0x3ed   :  { %v4540_v44 = vpop.eup %4539 }
 0x3ee   :  { %v527_v45 = vsel %vm514_vm3, %v4540_v44, 0.0 }
 0x3ef   :  { %v4542_v46 = vpop.eup %4541  ;;  %528 = vadd.xlane.f32.xlu0 %v527_v45 }
 0x3f0   :  { %v530_v47 = vsel %vm514_vm3, %v4542_v46, 0.0 }
 0x3f1   :  { %531 = vadd.xlane.f32.xlu1 %v530_v47 }
 0x402   :  { %633 = vrot.lane.b32.xlu1 %v4972_v18, %s4791_s28 }
 0x405   :  { %636 = vrot.lane.b32.xlu0 %v4960_v8, %s4791_s28 }
 0x406   :  { %685 = vrot.lane.b32.xlu1 %v4976_v20, %s4791_s28 }
 0x47c   :  { %v529_v49 = vpop.xlane.xlu0 %528 }
 0x47d   :  { %4543 = vrcp.f32 %v529_v49 }
 0x47e   :  { %v532_v52 = vpop.xlane.xlu1 %531 }
 0x47f   :  { %4545 = vrcp.f32 %v532_v52 }
 0x480   :  { %v637_v60 = vpop.permute.xlu0 %636 }
 0x481   :  { %v642_v63 = vsel %vm421_vm1, %v637_v60, 0 }
 0x482   :  { %v634_v2 = vpop.permute.xlu1 %633 }
 0x486   :  { %v686_v3 = vpop.permute.xlu1 %685 }
 0x487   :  { %v4544_v53 = vpop.eup %4543 }
 0x488   :  { %v535_v56 = vmul.f32 %v4544_v53, %v4540_v44 }
 0x489   :  { %v4546_v58 = vpop.eup %4545 }
 0x48a   :  { %v536_v61 = vmul.f32 %v4546_v58, %v4542_v46  ;;  %v537_v62 = vpack.c.bf16 %v535_v56, %v535_v56 }
 0x48c   :  { %4063 = vmatmul.mubr.msk.bf16.vlgmr.msra.gmra.mrb[8].mxu0 %vm514_vm3, %v537_v62  ;;  %v538_v0 = vpack.c.bf16 %v536_v61, %v536_v61 }
 0x48d   :  { %4073 = vmatpush3.bf16.xpose.msra.mxu0 %v642_v63  ;;  %4074 = vmatprep.mubr.msk.bf16.mxu0 %vm4790_vm0, %v4788_v4 }
 0x48e   :  { %4069 = vmatmul.mubr.msk.bf16.vlgmr.msra.gmra.mrb[8].mxu1 %vm514_vm3, %v538_v0  ;;  %4084 = vmatprep.subr.bf16.mxu0 %v4788_v4 }
 0x48f   :  { %4079 = vmatpush3.bf16.xpose.msra.mxu1 %v694_v1  ;;  %4080 = vmatprep.mubr.msk.bf16.mxu1 %vm4790_vm0, %v4788_v4 }
 0x490   :  { %4090 = vmatprep.subr.bf16.mxu1 %v4788_v4 }
 0x494   :  { %4075 = vmatmul.mubr.msk.bf16.vlgmr.msra.gmra.mrb[12].mxu0 %vm421_vm1, %v634_v2 }
 0x495   :  { %4086 = vmatprep.mubr.msk.bf16.mxu0 %vm4790_vm0, %v4788_v4 }
 0x496   :  { %4081 = vmatmul.mubr.msk.bf16.vlgmr.msra.gmra.mrb[12].mxu1 %vm421_vm1, %v686_v3 }
 0x497   :  { %4092 = vmatprep.mubr.msk.bf16.mxu1 %vm4790_vm0, %v4788_v4 }
 0x55f   :  { %v5032_v5 = vpop.f32.mrb[8].mxu0 }
 0x560   :  { %v4064_v6 = vpop.f32.mrb[9].mxu0 }
 0x561   :  { %v583_v7 = vpop.f32.mrb[10].mxu0  ;;  %v5034_v9 = vpop.f32.mrb[8].mxu1 }
 0x562   :  { %v4065_v10 = vpop.f32.mrb[11].mxu0  ;;  %v4070_v12 = vpop.f32.mrb[9].mxu1 }
 0x563   :  { %v629_v13 = vpop.f32.mrb[10].mxu1 }
 0x564   :  { %v4071_v14 = vpop.f32.mrb[11].mxu1 }
 0x567   :  { %v678_v15 = vpop.f32.mrb[12].mxu0 }
 0x568   :  { %v679_v17 = vadd.f32 %v4995_v23, %v678_v15  ;;  %v4076_v21 = vpop.f32.mrb[13].mxu0 }
 0x569   :  { %v681_v22 = vpop.f32.mrb[14].mxu0  ;;  %v730_v24 = vpop.f32.mrb[12].mxu1 }
 0x56a   :  { %v731_v26 = vadd.f32 %v5000_v25, %v730_v24  ;;  %v4077_v27 = vpop.f32.mrb[15].mxu0  ;;  %v4082_v28 = vpop.f32.mrb[13].mxu1  ;;  %v736_v29 = vsel %vm514_vm3, %v679_v17, -inf }
 0x56b   :  { %v733_v31 = vpop.f32.mrb[14].mxu1  ;;  %737 = vmax.xlane.f32.xlu0 %v736_v29 }
 0x56c   :  { %v4083_v32 = vpop.f32.mrb[15].mxu1  ;;  %v739_v33 = vsel %vm514_vm3, %v731_v26, -inf }
 0x56d   :  { %740 = vmax.xlane.f32.xlu1 %v739_v33 }
 0x57e   :  { %810 = vrot.lane.b32.xlu1 %v4974_v19, %s4791_s28 }
 0x582   :  { %860 = vrot.lane.b32.xlu1 %v4960_v8, %s4778_s15 }
 0x586   :  { %910 = vrot.lane.b32.xlu1 %v4962_v11, %s4778_s15 }
 0x58a   :  { %908 = vrot.lane.b32.xlu1 %v4976_v20, %s4778_s15 }
 0x5f8   :  { %v738_v34 = vpop.xlane.xlu0 %737 }
 0x5f9   :  { %v742_v35 = vsub.f32 %v679_v17, %v738_v34 }
 0x5fa   :  { %v741_v36 = vpop.xlane.xlu1 %740 }
 0x5fb   :  { %v744_v37 = vmul.f32 1.442695, %v742_v35  ;;  %v743_v38 = vsub.f32 %v731_v26, %v741_v36 }
 0x5fd   :  { %4547 = vpow2.f32 %v744_v37  ;;  %v746_v39 = vmul.f32 1.442695, %v743_v38 }
 0x5fe   :  { %v811_v40 = vpop.permute.xlu1 %810 }
 0x5ff   :  { %4549 = vpow2.f32 %v746_v39  ;;  %v816_v41 = vsel %vm542_vm2, %v811_v40, 0 }
 0x600   :  { %4091 = vmatpush3.bf16.msra.mxu1 %v816_v41 }
 0x601   :  { %4102 = vmatprep.subr.bf16.mxu1 %v4788_v4 }
 0x602   :  { %v861_v53 = vpop.permute.xlu1 %860 }
 0x603   :  { %v866_v63 = vsel %vm421_vm1, %v861_v53, 0 }
 0x606   :  { %v911_v62 = vpop.permute.xlu1 %910 }
 0x607   :  { %v4548_v42 = vpop.eup %4547  ;;  %v916_v1 = vsel %vm421_vm1, %v911_v62, 0 }
 0x608   :  { %v748_v43 = vsel %vm514_vm3, %v4548_v42, 0.0 }
 0x609   :  { %v4550_v44 = vpop.eup %4549  ;;  %749 = vadd.xlane.f32.xlu0 %v748_v43 }
 0x60a   :  { %v751_v45 = vsel %vm514_vm3, %v4550_v44, 0.0  ;;  %v909_v3 = vpop.permute.xlu1 %908 }
 0x60d   :  { %752 = vadd.xlane.f32.xlu0 %v751_v45 }
 0x623   :  { %761 = vrot.lane.b32.xlu0 %v4969_v16, %s4791_s28 }
 0x627   :  { %858 = vrot.lane.b32.xlu0 %v4972_v18, %s4778_s15 }
 0x696   :  { %v750_v46 = vpop.xlane.xlu0 %749 }
 0x697   :  { %4551 = vrcp.f32 %v750_v46 }
 0x69a   :  { %v753_v47 = vpop.xlane.xlu0 %752 }
 0x69b   :  { %4553 = vrcp.f32 %v753_v47 }
 0x69e   :  { %v762_v48 = vpop.permute.xlu0 %761 }
 0x69f   :  { %v767_v49 = vsel %vm542_vm2, %v762_v48, 0 }
 0x6a0   :  { %4085 = vmatpush3.bf16.msra.mxu0 %v767_v49 }
 0x6a1   :  { %v4552_v52 = vpop.eup %4551  ;;  %4096 = vmatprep.subr.bf16.mxu0 %v4788_v4 }
 0x6a2   :  { %v756_v56 = vmul.f32 %v4552_v52, %v4548_v42  ;;  %v859_v2 = vpop.permute.xlu0 %858 }
 0x6a4   :  { %v758_v58 = vpack.c.bf16 %v756_v56, %v756_v56 }
 0x6a5   :  { %v4554_v60 = vpop.eup %4553 }
 0x6a6   :  { %v757_v61 = vmul.f32 %v4554_v60, %v4550_v44  ;;  %4087 = vmatmul.mubr.msk.bf16.vlgmr.msra.gmra.mrb[16].mxu0 %vm514_vm3, %v758_v58 }
 0x6a7   :  { %4098 = vmatprep.mubr.msk.bf16.mxu0 %vm4790_vm0, %v4788_v4 }
 0x6a8   :  { %v759_v0 = vpack.c.bf16 %v757_v61, %v757_v61 }
 0x6a9   :  { %4097 = vmatpush3.bf16.xpose.msra.mxu0 %v866_v63 }
 0x6aa   :  { %4093 = vmatmul.mubr.msk.bf16.vlgmr.msra.gmra.mrb[16].mxu1 %vm514_vm3, %v759_v0  ;;  %4108 = vmatprep.subr.bf16.mxu0 %v4788_v4 }
 0x6ab   :  { %4103 = vmatpush3.bf16.xpose.msra.mxu1 %v916_v1  ;;  %4104 = vmatprep.mubr.msk.bf16.mxu1 %vm4790_vm0, %v4788_v4 }
 0x6ac   :  { %4114 = vmatprep.subr.bf16.mxu1 %v4788_v4 }
 0x6b0   :  { %4099 = vmatmul.mubr.msk.bf16.vlgmr.msra.gmra.mrb[20].mxu0 %vm421_vm1, %v859_v2 }
 0x6b1   :  { %4110 = vmatprep.mubr.msk.bf16.mxu0 %vm4790_vm0, %v4788_v4 }
 0x6b2   :  { %4105 = vmatmul.mubr.msk.bf16.vlgmr.msra.gmra.mrb[20].mxu1 %vm421_vm1, %v909_v3 }
 0x6b3   :  { %4116 = vmatprep.mubr.msk.bf16.mxu1 %vm4790_vm0, %v4788_v4 }
 0x779   :  { %v5074_v6 = vpop.f32.mrb[16].mxu0 }
 0x77a   :  { %v4088_v7 = vpop.f32.mrb[17].mxu0 }
 0x77b   :  { %v806_v10 = vpop.f32.mrb[18].mxu0 }
 0x77c   :  { %v4089_v12 = vpop.f32.mrb[19].mxu0 }
 0x77d   :  { %v5076_v13 = vpop.f32.mrb[16].mxu1 }
 0x77e   :  { %v4337_v14 = vpack.i.bf16 %v5076_v13, %v5074_v6  ;;  %v4094_v15 = vpop.f32.mrb[17].mxu1 }
 0x77f   :  { %v855_v17 = vpop.f32.mrb[18].mxu1 }
 0x780   :  { %v4095_v21 = vpop.f32.mrb[19].mxu1 }
 0x783   :  { %v902_v22 = vpop.f32.mrb[20].mxu0 }
 0x784   :  { %v903_v24 = vadd.f32 %v4995_v23, %v902_v22  ;;  %v4100_v26 = vpop.f32.mrb[21].mxu0 }
 0x785   :  { %v905_v27 = vpop.f32.mrb[22].mxu0  ;;  %v952_v28 = vpop.f32.mrb[20].mxu1 }
 0x786   :  { %v953_v29 = vadd.f32 %v5000_v25, %v952_v28  ;;  %v4101_v31 = vpop.f32.mrb[23].mxu0  ;;  %v4106_v32 = vpop.f32.mrb[21].mxu1  ;;  %v958_v33 = vsel %vm514_vm3, %v903_v24, -inf }
 0x787   :  { %v955_v34 = vpop.f32.mrb[22].mxu1  ;;  %959 = vmax.xlane.f32.xlu0 %v958_v33 }
 0x788   :  { %v4107_v35 = vpop.f32.mrb[23].mxu1  ;;  %v961_v36 = vsel %vm514_vm3, %v953_v29, -inf }
 0x789   :  { %962 = vmax.xlane.f32.xlu1 %v961_v36 }
 0x79a   :  { %1030 = vrot.lane.b32.xlu1 %v4974_v19, %s4778_s15 }
 0x79e   :  { %1080 = vrot.lane.b32.xlu1 %v4960_v8, %s4792_s9 }
 0x7a2   :  { %1130 = vrot.lane.b32.xlu1 %v4962_v11, %s4792_s9 }
 0x7a6   :  { %1128 = vrot.lane.b32.xlu1 %v4976_v20, %s4792_s9 }
 0x814   :  { %v960_v37 = vpop.xlane.xlu0 %959 }
 0x815   :  { %v964_v38 = vsub.f32 %v903_v24, %v960_v37 }
 0x816   :  { %v963_v39 = vpop.xlane.xlu1 %962 }
 0x817   :  { %v966_v40 = vmul.f32 1.442695, %v964_v38  ;;  %v965_v41 = vsub.f32 %v953_v29, %v963_v39 }
 0x819   :  { %4555 = vpow2.f32 %v966_v40  ;;  %v968_v42 = vmul.f32 1.442695, %v965_v41 }
 0x81a   :  { %v1031_v43 = vpop.permute.xlu1 %1030 }
 0x81b   :  { %4557 = vpow2.f32 %v968_v42  ;;  %v1036_v44 = vsel %vm542_vm2, %v1031_v43, 0 }
 0x81c   :  { %4115 = vmatpush3.bf16.msra.mxu1 %v1036_v44 }
 0x81d   :  { %4126 = vmatprep.subr.bf16.mxu1 %v4788_v4 }
 0x81e   :  { %v1081_v53 = vpop.permute.xlu1 %1080 }
 0x822   :  { %v1131_v62 = vpop.permute.xlu1 %1130 }
 0x823   :  { %v4556_v8 = vpop.eup %4555  ;;  %v1136_v0 = vsel %vm421_vm1, %v1131_v62, 0  ;;  %v4404_v62 = vld [vmem:[#allocation5 + $0x28] sm:$0xff]  }
 0x824   :  { %v970_v11 = vsel %vm514_vm3, %v4556_v8, 0.0 }
 0x825   :  { %v4558_v45 = vpop.eup %4557  ;;  %971 = vadd.xlane.f32.xlu0 %v970_v11 }
 0x826   :  { %v973_v20 = vsel %vm514_vm3, %v4558_v45, 0.0  ;;  %v1129_v2 = vpop.permute.xlu1 %1128 }
 0x829   :  { %974 = vadd.xlane.f32.xlu0 %v973_v20 }
 0x83f   :  { %982 = vrot.lane.b32.xlu0 %v4969_v16, %s4778_s15 }
 0x843   :  { %1078 = vrot.lane.b32.xlu0 %v4972_v18, %s4792_s9  ;;  %v1086_v18 = vsel %vm421_vm1, %v1081_v53, 0  ;;  %v4399_v53 = vld [vmem:[#allocation5] sm:$0xff]  }
 0x8b2   :  { %v972_v46 = vpop.xlane.xlu0 %971 }
 0x8b3   :  { %4559 = vrcp.f32 %v972_v46 }
 0x8b6   :  { %v975_v47 = vpop.xlane.xlu0 %974 }
 0x8b7   :  { %4561 = vrcp.f32 %v975_v47 }
 0x8ba   :  { %v983_v48 = vpop.permute.xlu0 %982 }
 0x8bb   :  { %v988_v49 = vsel %vm542_vm2, %v983_v48, 0 }
 0x8bc   :  { %4109 = vmatpush3.bf16.msra.mxu0 %v988_v49 }
 0x8bd   :  { %v4560_v52 = vpop.eup %4559  ;;  %4120 = vmatprep.subr.bf16.mxu0 %v4788_v4 }
 0x8be   :  { %v978_v56 = vmul.f32 %v4560_v52, %v4556_v8  ;;  %v1079_v1 = vpop.permute.xlu0 %1078 }
 0x8c0   :  { %v980_v58 = vpack.c.bf16 %v978_v56, %v978_v56  ;;  %v4400_v56 = vld [vmem:[#allocation5 + $0x8] sm:$0xff]  }
 0x8c1   :  { %v4562_v60 = vpop.eup %4561 }
 0x8c2   :  { %v979_v61 = vmul.f32 %v4562_v60, %v4558_v45  ;;  %4111 = vmatmul.mubr.msk.bf16.vlgmr.msra.gmra.mrb[24].mxu0 %vm514_vm3, %v980_v58  ;;  %v4401_v58 = vld [vmem:[#allocation5 + $0x10] sm:$0xff]   ;;  %v4402_v60 = vld [vmem:[#allocation5 + $0x18] sm:$0xff]  }
 0x8c3   :  { %4122 = vmatprep.mubr.msk.bf16.mxu0 %vm4790_vm0, %v4788_v4 }
 0x8c4   :  { %v981_v63 = vpack.c.bf16 %v979_v61, %v979_v61  ;;  %v4403_v61 = vld [vmem:[#allocation5 + $0x20] sm:$0xff]  }
 0x8c5   :  { %4121 = vmatpush3.bf16.xpose.msra.mxu0 %v1086_v18  ;;  %v4405_v18 = vld [vmem:[#allocation5 + $0x30] sm:$0xff]  }
 0x8c6   :  { %4117 = vmatmul.mubr.msk.bf16.vlgmr.msra.gmra.mrb[24].mxu1 %vm514_vm3, %v981_v63  ;;  %4132 = vmatprep.subr.bf16.mxu0 %v4788_v4  ;;  %v4406_v63 = vld [vmem:[#allocation5 + $0x38] sm:$0xff]  }
 0x8c7   :  { %4127 = vmatpush3.bf16.xpose.msra.mxu1 %v1136_v0  ;;  %4128 = vmatprep.mubr.msk.bf16.mxu1 %vm4790_vm0, %v4788_v4 }
 0x8c8   :  { %4138 = vmatprep.subr.bf16.mxu1 %v4788_v4 }
 0x8cc   :  { %4123 = vmatmul.mubr.msk.bf16.vlgmr.msra.gmra.mrb[28].mxu0 %vm421_vm1, %v1079_v1 }
 0x8cd   :  { %4134 = vmatprep.mubr.msk.bf16.mxu0 %vm4790_vm0, %v4788_v4 }
 0x8ce   :  { %4129 = vmatmul.mubr.msk.bf16.vlgmr.msra.gmra.mrb[28].mxu1 %vm421_vm1, %v1129_v2 }
 0x8cf   :  { %4140 = vmatprep.mubr.msk.bf16.mxu1 %vm4790_vm0, %v4788_v4 }
 0x995   :  { %v1024_v3 = vpop.f32.mrb[24].mxu0 }
 0x996   :  { %v4112_v7 = vpop.f32.mrb[25].mxu0 }
 0x997   :  { %v1027_v10 = vpop.f32.mrb[26].mxu0 }
 0x998   :  { %v4113_v12 = vpop.f32.mrb[27].mxu0 }
 0x999   :  { %v1072_v15 = vpop.f32.mrb[24].mxu1 }
 0x99a   :  { %v4342_v17 = vpack.i.bf16 %v1072_v15, %v1024_v3  ;;  %v4118_v21 = vpop.f32.mrb[25].mxu1 }
 0x99b   :  { %v1075_v22 = vpop.f32.mrb[26].mxu1 }
 0x99c   :  { %v4119_v24 = vpop.f32.mrb[27].mxu1 }
 0x99f   :  { %v1122_v26 = vpop.f32.mrb[28].mxu0 }
 0x9a0   :  { %v1123_v27 = vadd.f32 %v4995_v23, %v1122_v26  ;;  %v4124_v28 = vpop.f32.mrb[29].mxu0 }
 0x9a1   :  { %v1125_v29 = vpop.f32.mrb[30].mxu0  ;;  %v1172_v31 = vpop.f32.mrb[28].mxu1 }
 0x9a2   :  { %v1173_v32 = vadd.f32 %v5000_v25, %v1172_v31  ;;  %v4125_v33 = vpop.f32.mrb[31].mxu0  ;;  %v4130_v34 = vpop.f32.mrb[29].mxu1  ;;  %v1178_v35 = vsel %vm514_vm3, %v1123_v27, -inf }
 0x9a3   :  { %v1175_v36 = vpop.f32.mrb[30].mxu1  ;;  %1179 = vmax.xlane.f32.xlu0 %v1178_v35 }
 0x9a4   :  { %v4131_v37 = vpop.f32.mrb[31].mxu1  ;;  %v1181_v38 = vsel %vm514_vm3, %v1173_v32, -inf }
 0x9a5   :  { %1182 = vmax.xlane.f32.xlu1 %v1181_v38 }
 0x9b6   :  { %1250 = vrot.lane.b32.xlu1 %v4974_v19, %s4792_s9 }
 0x9ba   :  { %4338 = vrot.lane.b32.xlu1 %v4337_v14, %s4792_s9 }
 0x9be   :  { %4343 = vrot.lane.b32.xlu1 %v4342_v17, %s4778_s15 }
 0xa30   :  { %v1180_v23 = vpop.xlane.xlu0 %1179 }
 0xa31   :  { %v1184_v25 = vsub.f32 %v1123_v27, %v1180_v23 }
 0xa32   :  { %v1183_v39 = vpop.xlane.xlu1 %1182 }
 0xa33   :  { %v1186_v40 = vmul.f32 1.442695, %v1184_v25  ;;  %v1185_v41 = vsub.f32 %v1173_v32, %v1183_v39  ;;  %v134_v25 = vld [vmem:[#allocation10 + $0x3] ss:$0 sm:$0xff] }
 0xa35   :  { %4563 = vpow2.f32 %v1186_v40  ;;  %v1188_v42 = vmul.f32 1.442695, %v1185_v41 }
 0xa36   :  { %v1251_v43 = vpop.permute.xlu1 %1250 }
 0xa37   :  { %4565 = vpow2.f32 %v1188_v42  ;;  %v1256_v44 = vsel %vm542_vm2, %v1251_v43, 0 }
 0xa38   :  { %4139 = vmatpush3.bf16.msra.mxu1 %v1256_v44 }
 0xa3a   :  { %v4339_v21 = vpop.permute.xlu1 %4338 }
 0xa3b   :  { %v4341_v24 = vunpack.i.h.bf16 %v4339_v21  ;;  %v4340_v26 = vunpack.i.l.bf16 %v4339_v21 }
 0xa3d   :  { %v1323_v31 = vsel %vm421_vm1, %v5034_v9, %v4341_v24  ;;  %v1322_v32 = vsel %vm421_vm1, %v5032_v5, %v4340_v26  ;;  %v136_v26 = vld [vmem:[#allocation10 + $0x5] ss:$0 sm:$0xff] }
 0xa3e   :  { %v4344_v22 = vpop.permute.xlu1 %4343 }
 0xa3f   :  { %v4564_v19 = vpop.eup %4563  ;;  %v4346_v27 = vunpack.i.h.bf16 %v4344_v22  ;;  %v4345_v28 = vunpack.i.l.bf16 %v4344_v22 }
 0xa40   :  { %v1190_v8 = vsel %vm514_vm3, %v4564_v19, 0.0 }
 0xa41   :  { %v4566_v11 = vpop.eup %4565  ;;  %1191 = vadd.xlane.f32.xlu0 %v1190_v8  ;;  %v1326_v35 = vsel %vm1324_vm4, %v1323_v31, %v4346_v27  ;;  %v1325_v36 = vsel %vm1324_vm4, %v1322_v32, %v4345_v28  ;;  %v4409_v8 = vld [vmem:[%s5531_s4 + $0x4] ss:$8 sps:$4 sm:$0xff]  }
 0xa42   :  { %v1193_v6 = vsel %vm514_vm3, %v4566_v11, 0.0  ;;  %1572 = vmatprep.subr.bf16.mxu1 %v4409_v8  ;;  %v4431_v32 = vld [vmem:[#allocation7 + $0x40] sm:$0xff]  }
 0xa45   :  { %1194 = vadd.xlane.f32.xlu0 %v1193_v6 }
 0xa5b   :  { %1202 = vrot.lane.b32.xlu0 %v4969_v16, %s4792_s9 }
 0xace   :  { %v1192_v13 = vpop.xlane.xlu0 %1191 }
 0xacf   :  { %4567 = vrcp.f32 %v1192_v13 }
 0xad2   :  { %v1195_v14 = vpop.xlane.xlu0 %1194 }
 0xad3   :  { %4569 = vrcp.f32 %v1195_v14 }
 0xad6   :  { %v1203_v45 = vpop.permute.xlu0 %1202 }
 0xad7   :  { %v1208_v20 = vsel %vm542_vm2, %v1203_v45, 0 }
 0xad8   :  { %4133 = vmatpush3.bf16.msra.mxu0 %v1208_v20 }
 0xad9   :  { %v4568_v46 = vpop.eup %4567  ;;  %4144 = vmatprep.subr.bf16.mxu0 %v4788_v4 }
 0xada   :  { %v1198_v47 = vmul.f32 %v4568_v46, %v4564_v19  ;;  %v4407_v19 = vld [vmem:[%s5531_s4] ss:$8 sps:$4 sm:$0xff]  }
 0xadc   :  { %v1200_v48 = vpack.c.bf16 %v1198_v47, %v1198_v47 }
 0xadd   :  { %v4570_v49 = vpop.eup %4569 }
 0xade   :  { %v1199_v52 = vmul.f32 %v4570_v49, %v4566_v11  ;;  %4135 = vmatmul.mubr.msk.bf16.vlgmr.msra.gmra.mrb[32].mxu0 %vm514_vm3, %v1200_v48  ;;  %v4412_v11 = vld [vmem:[%s5531_s4 + $0x14] ss:$8 sps:$4 sm:$0xff]   ;;  %v4415_v48 = vld [vmem:[%s5531_s4 + $0x24] ss:$8 sps:$4 sm:$0xff]   ;;  %v4413_v49 = vld [vmem:[%s5531_s4 + $0x20] ss:$8 sps:$4 sm:$0xff]  }
 0xadf   :  { %4160 = vmatprep.mubr.msk.bf16.mxu0 %vm4790_vm0, %v4788_v4  ;;  %4145 = vmatpush3.bf16.msra.mxu0 %v4399_v53  ;;  %v4421_v53 = vld [vmem:[%s5531_s4 + $0x44] ss:$8 sps:$4 sm:$0xff]  }
 0xae0   :  { %v1201_v16 = vpack.c.bf16 %v1199_v52, %v1199_v52  ;;  %4146 = vmatprep.subr.bf16.mxu0 %v4788_v4  ;;  %v4418_v52 = vld [vmem:[%s5531_s4 + $0x34] ss:$8 sps:$4 sm:$0xff]  }
 0xae2   :  { %4141 = vmatmul.mubr.msk.bf16.vlgmr.msra.gmra.mrb[32].mxu1 %vm514_vm3, %v1201_v16  ;;  %v4416_v16 = vld [vmem:[%s5531_s4 + $0x30] ss:$8 sps:$4 sm:$0xff]  }
 0xae3   :  { %1604 = vmatprep.mubr.bf16.mxu1 %v4789_v30  ;;  %4147 = vmatpush3.bf16.msra.mxu0 %v4400_v56  ;;  %v4419_v56 = vld [vmem:[%s5531_s4 + $0x40] ss:$8 sps:$4 sm:$0xff]  }
 0xae4   :  { %4148 = vmatprep.subr.bf16.mxu0 %v4788_v4  ;;  %1573 = vmatpush1.bf16.msra.mxu1 %v4407_v19 }
 0xae5   :  { %1574 = vmatprep.subr.bf16.mxu1 %v4412_v11 }
 0xae7   :  { %4149 = vmatpush3.bf16.msra.mxu0 %v4401_v58  ;;  %v4424_v58 = vld [vmem:[%s5531_s4 + $0x54] ss:$8 sps:$4 sm:$0xff]  }
 0xae8   :  { %4150 = vmatprep.subr.bf16.mxu0 %v4788_v4 }
 0xaeb   :  { %4151 = vmatpush3.bf16.msra.mxu0 %v4402_v60  ;;  %v4422_v60 = vld [vmem:[%s5531_s4 + $0x50] ss:$8 sps:$4 sm:$0xff]  }
 0xaec   :  { %4152 = vmatprep.subr.bf16.mxu0 %v4788_v4 }
 0xaef   :  { %4153 = vmatpush3.bf16.msra.mxu0 %v4403_v61  ;;  %v4427_v61 = vld [vmem:[%s5531_s4 + $0x64] ss:$8 sps:$4 sm:$0xff]  }
 0xaf0   :  { %4154 = vmatprep.subr.bf16.mxu0 %v4788_v4 }
 0xaf3   :  { %4155 = vmatpush3.bf16.msra.mxu0 %v4404_v62  ;;  %v4425_v62 = vld [vmem:[%s5531_s4 + $0x60] ss:$8 sps:$4 sm:$0xff]  }
 0xaf4   :  { %4156 = vmatprep.subr.bf16.mxu0 %v4788_v4 }
 0xaf7   :  { %4157 = vmatpush3.bf16.msra.mxu0 %v4405_v18  ;;  %v4430_v18 = vld [vmem:[%s5531_s4 + $0x74] ss:$8 sps:$4 sm:$0xff]  }
 0xaf8   :  { %4158 = vmatprep.subr.bf16.mxu0 %v4788_v4 }
 0xafb   :  { %4159 = vmatpush3.bf16.msra.mxu0 %v4406_v63  ;;  %v4428_v63 = vld [vmem:[%s5531_s4 + $0x70] ss:$8 sps:$4 sm:$0xff]  }
 0xafc   :  { %3925 = vmatprep.subr.bf16.mxu0 %v4431_v32 }
 0xbb1   :  { %v1244_v0 = vpop.f32.mrb[32].mxu0 }
 0xbb2   :  { %v4136_v1 = vpop.f32.mrb[33].mxu0 }
 0xbb3   :  { %v1247_v2 = vpop.f32.mrb[34].mxu0 }
 0xbb4   :  { %v4137_v3 = vpop.f32.mrb[35].mxu0 }
 0xbb5   :  { %v1292_v7 = vpop.f32.mrb[32].mxu1 }
 0xbb6   :  { %v4347_v10 = vpack.i.bf16 %v1292_v7, %v1244_v0  ;;  %v4142_v12 = vpop.f32.mrb[33].mxu1 }
 0xbb7   :  { %v1295_v15 = vpop.f32.mrb[34].mxu1 }
 0xbb8   :  { %v4143_v17 = vpop.f32.mrb[35].mxu1  ;;  %4348 = vrot.lane.b32.xlu0 %v4347_v10, %s4791_s28 }
 0xbb9   :  { %v135_v17 = vld [vmem:[#allocation10 + $0x4] ss:$0 sm:$0xff] }
 0xc2a   :  { %v4349_v29 = vpop.permute.xlu0 %4348 }
 0xc2b   :  { %v4351_v33 = vunpack.i.h.bf16 %v4349_v29  ;;  %v4350_v34 = vunpack.i.l.bf16 %v4349_v29 }
 0xc2d   :  { %v1329_v37 = vsel %vm1327_vm5, %v1326_v35, %v4351_v33  ;;  %v1328_v38 = vsel %vm1327_vm5, %v1325_v36, %v4350_v34  ;;  %v4432_v33 = vld [vmem:[#allocation7] sm:$0xff]   ;;  %v4433_v34 = vld [vmem:[#allocation7 + $0x48] sm:$0xff]   ;;  %v4435_v36 = vld [vmem:[#allocation7 + $0x50] sm:$0xff]  }
 0xc2e   :  { %v1330_v23 = vpack.c.bf16 %v1329_v37, %v1328_v38  ;;  %v4434_v35 = vld [vmem:[#allocation7 + $0x8] sm:$0xff]   ;;  %v4436_v37 = vld [vmem:[#allocation7 + $0x10] sm:$0xff]   ;;  %v4437_v38 = vld [vmem:[#allocation7 + $0x58] sm:$0xff]  }
 0xc30   :  { %4161 = vmatmul.mubr.bf16.vlgmr.msra.gmra.mrb[36].mxu0 %v1330_v23  ;;  %v4438_v23 = vld [vmem:[#allocation7 + $0x18] sm:$0xff]  }
 0xc31   :  { %3926 = vmatpush3.bf16.msra.mxu0 %v4432_v33 }
 0xc32   :  { %3927 = vmatprep.subr.bf16.mxu0 %v4433_v34 }
 0xc35   :  { %3928 = vmatpush3.bf16.msra.mxu0 %v4434_v35 }
 0xc36   :  { %3929 = vmatprep.subr.bf16.mxu0 %v4435_v36 }
 0xc39   :  { %3930 = vmatpush3.bf16.msra.mxu0 %v4436_v37 }
 0xc3a   :  { %3931 = vmatprep.subr.bf16.mxu0 %v4437_v38 }
 0xc3d   :  { %3932 = vmatpush3.bf16.msra.mxu0 %v4438_v23 }
 0xd03   :  { %v1429_v39 = vpop.f32.mrb[36].mxu0 }
 0xd04   :  { %v1430_v40 = vadd.f32 %v1429_v39, %v134_v25  ;;  %v4162_v41 = vpop.f32.mrb[37].mxu0  ;;  %v4440_v39 = vld [vmem:[#allocation7 + $0x20] sm:$0xff]  }
 0xd05   :  { %v1432_v9 = vpop.f32.mrb[38].mxu0  ;;  %v4442_v41 = vld [vmem:[#allocation7 + $0x28] sm:$0xff]  }
 0xd06   :  { %v1433_v42 = vadd.f32 %v1432_v9, %v134_v25  ;;  %v4163_v43 = vpop.f32.mrb[39].mxu0  ;;  %v1436_v5 = vadd.f32 %v1430_v40, %v4937_v50  ;;  %v4410_v50 = vld [vmem:[%s5531_s4 + $0x10] ss:$8 sps:$4 sm:$0xff]   ;;  %v4439_v25 = vld [vmem:[#allocation7 + $0x60] sm:$0xff]   ;;  %v4441_v40 = vld [vmem:[#allocation7 + $0x68] sm:$0xff]  }
 0xd07   :  { %1575 = vmatpush1.bf16.msra.mxu1 %v4410_v50  ;;  %3933 = vmatprep.subr.bf16.mxu0 %v4439_v25  ;;  %v4443_v9 = vld [vmem:[#allocation7 + $0x70] sm:$0xff]   ;;  %v4445_v43 = vld [vmem:[#allocation7 + $0x78] sm:$0xff]  }
 0xd08   :  { %1438 = vadd.xlane.f32.xlu1 %v1436_v5  ;;  %v1437_v44 = vadd.f32 %v1433_v42, %v4939_v51  ;;  %1576 = vmatprep.subr.bf16.mxu1 %v4415_v48  ;;  %v4444_v42 = vld [vmem:[#allocation7 + $0x30] sm:$0xff]  }
 0xd09   :  { %3934 = vmatpush3.bf16.msra.mxu0 %v4440_v39 }
 0xd0a   :  { %1440 = vadd.xlane.f32.xlu0 %v1437_v44  ;;  %3935 = vmatprep.subr.bf16.mxu0 %v4441_v40  ;;  %v139_v40 = vld [vmem:[#allocation10 + $0x7] ss:$0 sm:$0xff] }
 0xd0b   :  { %1577 = vmatpush1.bf16.msra.mxu1 %v4413_v49 }
 0xd0c   :  { %1578 = vmatprep.subr.bf16.mxu1 %v4418_v52 }
 0xd0d   :  { %3936 = vmatpush3.bf16.msra.mxu0 %v4442_v41 }
 0xd0e   :  { %3937 = vmatprep.subr.bf16.mxu0 %v4443_v9 }
 0xd0f   :  { %1579 = vmatpush1.bf16.msra.mxu1 %v4416_v16 }
 0xd10   :  { %1580 = vmatprep.subr.bf16.mxu1 %v4421_v53 }
 0xd11   :  { %3938 = vmatpush3.bf16.msra.mxu0 %v4444_v42 }
 0xd12   :  { %3939 = vmatprep.subr.bf16.mxu0 %v4445_v43 }
 0xd13   :  { %1581 = vmatpush1.bf16.msra.mxu1 %v4419_v56 }
 0xd14   :  { %1582 = vmatprep.subr.bf16.mxu1 %v4424_v58 }
 0xd17   :  { %1583 = vmatpush1.bf16.msra.mxu1 %v4422_v60 }
 0xd18   :  { %1584 = vmatprep.subr.bf16.mxu1 %v4427_v61 }
 0xd1b   :  { %1585 = vmatpush1.bf16.msra.mxu1 %v4425_v62 }
 0xd1c   :  { %1586 = vmatprep.subr.bf16.mxu1 %v4430_v18 }
 0xd1f   :  { %1587 = vmatpush1.bf16.msra.mxu1 %v4428_v63 }
 0xd95   :  { %v1439_v51 = vpop.xlane.xlu1 %1438 }
 0xd96   :  { %v1442_v6 = vmul.f32 0.0078125, %v1439_v51 }
 0xd97   :  { %v1441_v13 = vpop.xlane.xlu0 %1440 }
 0xd98   :  { %v1444_v14 = vsub.f32 %v1436_v5, %v1442_v6  ;;  %v1443_v45 = vmul.f32 0.0078125, %v1441_v13  ;;  %v4446_v5 = vld [vmem:[#allocation7 + $0x38] sm:$0xff]  }
 0xd99   :  { %3940 = vmatpush3.bf16.msra.mxu0 %v4446_v5 }
 0xd9a   :  { %v1445_v20 = vsub.f32 %v1437_v44, %v1443_v45  ;;  %v1446_v46 = vmul.f32 %v1444_v14, %v1444_v14  ;;  %4164 = vmatprep.subr.bf16.mxu0 %v4788_v4  ;;  %v138_v44 = vld [vmem:[#allocation10 + $0x6] ss:$8 sm:$0x3] }
 0xd9b   :  { %v1485_v19 = vrot.slane %v138_v44, %v4955_v59  ;;  %v1489_v8 = vrot.slane %v138_v44, %v4950_v55 }
 0xd9c   :  { %1448 = vadd.xlane.f32.xlu0 %v1446_v46  ;;  %v1447_v47 = vmul.f32 %v1445_v20, %v1445_v20 }
 0xda0   :  { %1450 = vadd.xlane.f32.xlu0 %v1447_v47 }
 0xe29   :  { %v1449_v0 = vpop.xlane.xlu0 %1448 }
 0xe2a   :  { %v1452_v1 = vmul.f32 0.0078125, %v1449_v0 }
 0xe2c   :  { %v1454_v2 = vadd.f32 1e-12, %v1452_v1 }
 0xe2d   :  { %v1451_v3 = vpop.xlane.xlu0 %1450 }
 0xe2e   :  { %4571 = vrsqrt.f32 %v1454_v2  ;;  %v1453_v7 = vmul.f32 0.0078125, %v1451_v3 }
 0xe30   :  { %v1455_v10 = vadd.f32 1e-12, %v1453_v7 }
 0xe32   :  { %4573 = vrsqrt.f32 %v1455_v10 }
 0xe38   :  { %v4572_v12 = vpop.eup %4571 }
 0xe39   :  { %v1458_v15 = vmul.f32 %v4572_v12, %v1444_v14 }
 0xe3b   :  { %v1460_v24 = vmul.f32 %v1458_v15, %v135_v17 }
 0xe3c   :  { %v4574_v21 = vpop.eup %4573 }
 0xe3d   :  { %v1459_v22 = vmul.f32 %v4574_v21, %v1445_v20  ;;  %v5207_v28 = vadd.f32 %v1460_v24, %v136_v26 }
 0xe3f   :  { %v1461_v27 = vmul.f32 %v1459_v22, %v135_v17 }
 0xe41   :  { %v5209_v29 = vadd.f32 %v1461_v27, %v136_v26 }
 0xe43   :  { %v1464_v31 = vpack.c.bf16 %v5209_v29, %v5207_v28 }
 0xe45   :  { %1605 = vmatmul.mubr.bf16.vlgmr.msra.gmra.mrb[36].mxu1 %v1464_v31 }
 0xe46   :  { %2070 = vmatprep.mubr.bf16.mxu1 %v4789_v30 }
 0xf18   :  { %v1606_v11 = vpop.f32.mrb[36].mxu1 }
 0xf19   :  { %v1607_v50 = vadd.f32 %v1606_v11, %v1485_v19  ;;  %v1608_v51 = vpop.f32.mrb[37].mxu1 }
 0xf1a   :  { %v1609_v6 = vadd.f32 %v1608_v51, %v1489_v8  ;;  %v1610_v13 = vpop.f32.mrb[38].mxu1  ;;  %v4449_v51 = vld [vmem:[#allocation2 + $0xc4] ss:$12 sps:$4 sm:$0xff]  }
 0xf1b   :  { %v1615_v14 = vmul.f32 %v1607_v50, %v1607_v50  ;;  %v1611_v45 = vadd.f32 %v1610_v13, %v1485_v19  ;;  %v1612_v20 = vpop.f32.mrb[39].mxu1  ;;  %v4453_v13 = vld [vmem:[#allocation2 + $0xdc] ss:$12 sps:$4 sm:$0xff]   ;;  %2038 = vmatprep.subr.bf16.mxu1 %v4449_v51 }
 0xf1c   :  { %v1616_v46 = vmul.f32 %v1609_v6, %v1609_v6  ;;  %v1613_v47 = vadd.f32 %v1612_v20, %v1489_v8 }
 0xf1d   :  { %v1619_v48 = vmul.f32 %v1615_v14, %v1607_v50  ;;  %v1617_v49 = vmul.f32 %v1611_v45, %v1611_v45  ;;  %v4454_v14 = vld [vmem:[#allocation2 + $0xe0] ss:$12 sps:$4 sm:$0xff]  }
 0xf1e   :  { %v1620_v52 = vmul.f32 %v1616_v46, %v1609_v6  ;;  %v1618_v16 = vmul.f32 %v1613_v47, %v1613_v47 }
 0xf1f   :  { %v1623_v53 = vmul.f32 0.044715, %v1619_v48  ;;  %v1621_v56 = vmul.f32 %v1617_v49, %v1611_v45 }
 0xf20   :  { %v1624_v58 = vmul.f32 0.044715, %v1620_v52  ;;  %v1622_v60 = vmul.f32 %v1618_v16, %v1613_v47  ;;  %v4457_v16 = vld [vmem:[#allocation2 + $0xf4] ss:$12 sps:$4 sm:$0xff]  }
 0xf21   :  { %v1627_v61 = vadd.f32 %v1623_v53, %v1607_v50  ;;  %v1625_v62 = vmul.f32 0.044715, %v1621_v56  ;;  %v4455_v53 = vld [vmem:[#allocation2 + $0xf0] ss:$12 sps:$4 sm:$0xff]   ;;  %v4458_v56 = vld [vmem:[#allocation2 + $0xf8] ss:$12 sps:$4 sm:$0xff]  }
 0xf22   :  { %v1628_v18 = vadd.f32 %v1624_v58, %v1609_v6  ;;  %v1626_v63 = vmul.f32 0.044715, %v1622_v60  ;;  %v4461_v58 = vld [vmem:[#allocation2 + $0x10c] ss:$12 sps:$4 sm:$0xff]   ;;  %v4459_v60 = vld [vmem:[#allocation2 + $0x108] ss:$12 sps:$4 sm:$0xff]  }
 0xf23   :  { %v1631_v0 = vmul.f32 0.7978846, %v1627_v61  ;;  %v1629_v1 = vadd.f32 %v1625_v62, %v1611_v45  ;;  %v4462_v61 = vld [vmem:[#allocation2 + $0x110] ss:$12 sps:$4 sm:$0xff]  }
 0xf24   :  { %v1632_v2 = vmul.f32 0.7978846, %v1628_v18  ;;  %v1630_v3 = vadd.f32 %v1626_v63, %v1613_v47  ;;  %v4465_v62 = vld [vmem:[#allocation2 + $0x124] ss:$12 sps:$4 sm:$0xff]   ;;  %v4463_v18 = vld [vmem:[#allocation2 + $0x120] ss:$12 sps:$4 sm:$0xff]  }
 0xf25   :  { %4575 = vtanh.f32 %v1631_v0  ;;  %v1633_v7 = vmul.f32 0.7978846, %v1629_v1  ;;  %v4466_v63 = vld [vmem:[#allocation2 + $0x128] ss:$12 sps:$4 sm:$0xff]   ;;  %v4467_v1 = vld [vmem:[#allocation2 + $0x138] ss:$12 sps:$4 sm:$0xff]  }
 0xf26   :  { %4577 = vtanh.f32 %v1632_v2  ;;  %v1634_v10 = vmul.f32 0.7978846, %v1630_v3  ;;  %v4469_v0 = vld [vmem:[#allocation2 + $0x13c] ss:$12 sps:$4 sm:$0xff]   ;;  %v4470_v2 = vld [vmem:[#allocation2 + $0x140] ss:$12 sps:$4 sm:$0xff]  }
 0xf27   :  { %4579 = vtanh.f32 %v1633_v7  ;;  %v4473_v3 = vld [vmem:[#allocation2 + $0x154] ss:$12 sps:$4 sm:$0xff]   ;;  %v4471_v7 = vld [vmem:[#allocation2 + $0x150] ss:$12 sps:$4 sm:$0xff]  }
 0xf28   :  { %4581 = vtanh.f32 %v1634_v10  ;;  %v4474_v10 = vld [vmem:[#allocation2 + $0x158] ss:$12 sps:$4 sm:$0xff]  }
 0xf2f   :  { %v4576_v12 = vpop.eup %4575 }
 0xf30   :  { %v4578_v15 = vpop.eup %4577  ;;  %v1639_v17 = vadd.f32 1.0, %v4576_v12  ;;  %v4477_v12 = vld [vmem:[#allocation2 + $0x16c] ss:$12 sps:$4 sm:$0xff]  }
 0xf31   :  { %v4580_v21 = vpop.eup %4579  ;;  %v1640_v22 = vadd.f32 1.0, %v4578_v15  ;;  %v4475_v15 = vld [vmem:[#allocation2 + $0x168] ss:$12 sps:$4 sm:$0xff]  }
 0xf32   :  { %v4582_v24 = vpop.eup %4581  ;;  %v1643_v26 = vmul.f32 0.5, %v1639_v17  ;;  %v1641_v27 = vadd.f32 1.0, %v4580_v21  ;;  %v4478_v17 = vld [vmem:[#allocation2 + $0x170] ss:$12 sps:$4 sm:$0xff]  }
 0xf33   :  { %v1642_v31 = vadd.f32 1.0, %v4582_v24  ;;  %v1644_v32 = vmul.f32 0.5, %v1640_v22 }
 0xf34   :  { %v1645_v33 = vmul.f32 0.5, %v1641_v27  ;;  %v1647_v35 = vmul.f32 %v1643_v26, %v1607_v50  ;;  %v4447_v50 = vld [vmem:[#allocation2 + $0xc0] ss:$12 sps:$4 sm:$0xff]  }
 0xf35   :  { %v1646_v34 = vmul.f32 0.5, %v1642_v31  ;;  %v1648_v37 = vmul.f32 %v1644_v32, %v1609_v6  ;;  %v4450_v6 = vld [vmem:[#allocation2 + $0xc8] ss:$12 sps:$4 sm:$0xff]   ;;  %2039 = vmatpush1.bf16.msra.mxu1 %v4447_v50 }
 0xf36   :  { %v1649_v36 = vmul.f32 %v1645_v33, %v1611_v45  ;;  %v4451_v45 = vld [vmem:[#allocation2 + $0xd8] ss:$12 sps:$4 sm:$0xff]   ;;  %2040 = vmatprep.subr.bf16.mxu1 %v4453_v13 }
 0xf37   :  { %v1650_v38 = vmul.f32 %v1646_v34, %v1613_v47  ;;  %v140_v33 = vld [vmem:[#allocation10 + $0x18] ss:$0 sm:$0xff] }
 0xf38   :  { %v1651_v23 = vpack.c.bf16 %v1649_v36, %v1647_v35 }
 0xf39   :  { %v1652_v25 = vpack.c.bf16 %v1650_v38, %v1648_v37  ;;  %2041 = vmatpush1.bf16.msra.mxu1 %v4451_v45  ;;  %v141_v38 = vld [vmem:[#allocation10 + $0x19] ss:$0 sm:$0xff] }
 0xf3a   :  { %2042 = vmatprep.subr.bf16.mxu1 %v4457_v16 }
 0xf3b   :  { %1813 = vmatprep.mubr.bf16.mxu0 %v1652_v25 }
 0xf3c   :  { %1814 = vmatmul.mubr.bf16.vlgmr.msra.gmra.mrb[40].mxu0 %v1651_v23 }
 0xf3d   :  { %4180 = vmatprep.mubr.msk.bf16.mxu0 %vm4790_vm0, %v4788_v4  ;;  %4165 = vmatpush3.bf16.msra.mxu0 %v4450_v6 }
 0xf3e   :  { %4166 = vmatprep.subr.bf16.mxu0 %v4788_v4  ;;  %2043 = vmatpush1.bf16.msra.mxu1 %v4455_v53 }
 0xf3f   :  { %2044 = vmatprep.subr.bf16.mxu1 %v4461_v58 }
 0xf41   :  { %4167 = vmatpush3.bf16.msra.mxu0 %v4454_v14 }
 0xf42   :  { %4168 = vmatprep.subr.bf16.mxu0 %v4788_v4  ;;  %2045 = vmatpush1.bf16.msra.mxu1 %v4459_v60 }
 0xf43   :  { %2046 = vmatprep.subr.bf16.mxu1 %v4465_v62 }
 0xf45   :  { %4169 = vmatpush3.bf16.msra.mxu0 %v4458_v56  ;;  %v5276_v56 = vld [vmem:[%s5528_s1] ss:$0 sm:$0xff] }
 0xf46   :  { %4170 = vmatprep.subr.bf16.mxu0 %v4788_v4  ;;  %2047 = vmatpush1.bf16.msra.mxu1 %v4463_v18 }
 0xf47   :  { %2048 = vmatprep.subr.bf16.mxu1 %v4469_v0  ;;  %v5283_v0 = vld [vmem:[%s5528_s1 + $0x1] ss:$0 sm:$0xff] }
 0xf49   :  { %4171 = vmatpush3.bf16.msra.mxu0 %v4462_v61 }
 0xf4a   :  { %4172 = vmatprep.subr.bf16.mxu0 %v4788_v4  ;;  %2049 = vmatpush1.bf16.msra.mxu1 %v4467_v1 }
 0xf4b   :  { %2050 = vmatprep.subr.bf16.mxu1 %v4473_v3 }
 0xf4d   :  { %4173 = vmatpush3.bf16.msra.mxu0 %v4466_v63 }
 0xf4e   :  { %4174 = vmatprep.subr.bf16.mxu0 %v4788_v4  ;;  %2051 = vmatpush1.bf16.msra.mxu1 %v4471_v7 }
 0xf4f   :  { %2052 = vmatprep.subr.bf16.mxu1 %v4477_v12 }
 0xf51   :  { %4175 = vmatpush3.bf16.msra.mxu0 %v4470_v2 }
 0xf52   :  { %4176 = vmatprep.subr.bf16.mxu0 %v4788_v4  ;;  %2053 = vmatpush1.bf16.msra.mxu1 %v4475_v15 }
 0xf53   :  { %4184 = vmatprep.subr.bf16.mxu1 %v4788_v4 }
 0xf55   :  { %4177 = vmatpush3.bf16.msra.mxu0 %v4474_v10 }
 0xf56   :  { %4178 = vmatprep.subr.bf16.mxu0 %v4788_v4 }
 0xf59   :  { %4179 = vmatpush3.bf16.msra.mxu0 %v4478_v17 }
 0xf5a   :  { %4208 = vmatprep.subr.bf16.mxu0 %v4788_v4 }
0x100f   :  { %v3941_v39 = vpop.f32.mrb[40].mxu0 }
0x1010   :  { %v3942_v41 = vpop.f32.mrb[41].mxu0 }
0x1011   :  { %v3943_v9 = vadd.f32 %v3942_v41, %v3941_v39  ;;  %v3944_v42 = vpop.f32.mrb[42].mxu0  ;;  %v1851_v41 = vld [vmem:[#allocation10 + $0x1a] ss:$8 sm:$0x7] }
0x1012   :  { %v3945_v43 = vpop.f32.mrb[43].mxu0  ;;  %v1898_v14 = vrot.slane %v1851_v41, %v4955_v59 }
0x1013   :  { %v1816_v5 = vadd.f32 %v3943_v9, %v139_v40  ;;  %v3946_v44 = vadd.f32 %v3945_v43, %v3944_v42  ;;  %v1902_v9 = vrot.slane %v1851_v41, %v4950_v55 }
0x1015   :  { %v1819_v19 = vadd.f32 %v3946_v44, %v139_v40  ;;  %v1822_v8 = vadd.f32 %v1816_v5, %v5207_v28  ;;  %v1906_v5 = vrot.slane %v1851_v41, %v186_v57 }
0x1017   :  { %1824 = vadd.xlane.f32.xlu1 %v1822_v8  ;;  %v1823_v11 = vadd.f32 %v1819_v19, %v5209_v29 }
0x1019   :  { %1826 = vadd.xlane.f32.xlu0 %v1823_v11 }
0x10a4   :  { %v1825_v28 = vpop.xlane.xlu1 %1824 }
0x10a5   :  { %v1828_v20 = vmul.f32 0.0078125, %v1825_v28 }
0x10a6   :  { %v1827_v29 = vpop.xlane.xlu0 %1826 }
0x10a7   :  { %v1830_v46 = vsub.f32 %v1822_v8, %v1828_v20  ;;  %v1829_v47 = vmul.f32 0.0078125, %v1827_v29 }
0x10a9   :  { %v1831_v48 = vsub.f32 %v1823_v11, %v1829_v47  ;;  %v1832_v49 = vmul.f32 %v1830_v46, %v1830_v46 }
0x10ab   :  { %1834 = vadd.xlane.f32.xlu1 %v1832_v49  ;;  %v1833_v52 = vmul.f32 %v1831_v48, %v1831_v48 }
0x10ad   :  { %1836 = vadd.xlane.f32.xlu0 %v1833_v52 }
0x1138   :  { %v1835_v21 = vpop.xlane.xlu1 %1834 }
0x1139   :  { %v1838_v22 = vmul.f32 0.0078125, %v1835_v21 }
0x113a   :  { %v1837_v24 = vpop.xlane.xlu0 %1836 }
0x113b   :  { %v1840_v26 = vadd.f32 1e-12, %v1838_v22  ;;  %v1839_v27 = vmul.f32 0.0078125, %v1837_v24 }
0x113d   :  { %4583 = vrsqrt.f32 %v1840_v26  ;;  %v1841_v31 = vadd.f32 1e-12, %v1839_v27 }
0x113f   :  { %4585 = vrsqrt.f32 %v1841_v31 }
0x1147   :  { %v4584_v32 = vpop.eup %4583 }
0x1148   :  { %v1844_v34 = vmul.f32 %v4584_v32, %v1830_v46 }
0x1149   :  { %v4586_v35 = vpop.eup %4585 }
0x114a   :  { %v1845_v36 = vmul.f32 %v4586_v35, %v1831_v48  ;;  %v1846_v37 = vmul.f32 %v1844_v34, %v140_v33 }
0x114c   :  { %v1847_v23 = vmul.f32 %v1845_v36, %v140_v33  ;;  %v5230_v25 = vadd.f32 %v1846_v37, %v141_v38 }
0x114e   :  { %v5232_v39 = vadd.f32 %v1847_v23, %v141_v38 }
0x1150   :  { %v1860_v40 = vpack.c.bf16 %v5232_v39, %v5230_v25 }
0x1152   :  { %2071 = vmatmul.mubr.bf16.vlgmr.msra.gmra.mrb[40].mxu1 %v1860_v40  ;;  %4181 = vmatmul.mubr.bf16.vlgmr.msra.gmra.mrb[44].mxu0 %v1860_v40 }
0x1153   :  { %4186 = vmatprep.mubr.msk.bf16.mxu1 %vm4790_vm0, %v4788_v4  ;;  %4210 = vmatprep.mubr.msk.bf16.mxu0 %vm4790_vm0, %v4788_v4 }
0x1225   :  { %v2072_v42 = vpop.f32.mrb[40].mxu1  ;;  %v2115_v43 = vpop.f32.mrb[44].mxu0 }
0x1226   :  { %v2074_v44 = vpop.f32.mrb[41].mxu1  ;;  %v4182_v19 = vpop.f32.mrb[45].mxu0  ;;  %v2073_v54 = vadd.f32 %v2072_v42, %v1898_v14  ;;  %v2116_v46 = vadd.f32 %v2115_v43, %v1906_v5 }
0x1227   :  { %v2075_v8 = vadd.f32 %v2074_v44, %v1902_v9  ;;  %v2076_v11 = vpop.f32.mrb[42].mxu1  ;;  %v2118_v50 = vpop.f32.mrb[46].mxu0 }
0x1228   :  { %v5243_v51 = vadd.f32 %v2118_v50, %v1906_v5  ;;  %v2078_v6 = vpop.f32.mrb[43].mxu1  ;;  %v4183_v13 = vpop.f32.mrb[47].mxu0  ;;  %v5253_v29 = vpack.c.bf16 %v2073_v54, %v2073_v54  ;;  %v2077_v48 = vadd.f32 %v2076_v11, %v1898_v14  ;;  %v5262_v49 = vpack.c.bf16 %v2116_v46, %v2116_v46 }
0x1229   :  { %v5246_v45 = vpack.c.bf16 %v2075_v8, %v2075_v8  ;;  %v2079_v28 = vadd.f32 %v2078_v6, %v1902_v9 }
0x122a   :  { %v5264_v52 = vpack.c.bf16 %v2077_v48, %v2077_v48  ;;  %v2248_v16 = vsel %vm542_vm2, %v5262_v49, 0  ;;  %v5301_v38 = vpack.c.bf16 %v5243_v51, %v5243_v51 }
0x122b   :  { %v2132_v20 = vsel %vm421_vm1, %v5246_v45, 0  ;;  %v5251_v57 = vpack.c.bf16 %v2079_v28, %v2079_v28 }
0x122c   :  { %4185 = vmatpush3.bf16.xpose.msra.mxu1 %v2132_v20  ;;  %v2294_v9 = vsel %vm542_vm2, %v5301_v38, 0 }
0x122d   :  { %4190 = vmatprep.subr.bf16.mxu1 %v4788_v4  ;;  %v2178_v47 = vsel %vm421_vm1, %v5251_v57, 0 }
0x1233   :  { %4187 = vmatmul.mubr.msk.bf16.vlgmr.msra.gmra.mrb[44].mxu1 %vm421_vm1, %v5253_v29 }
0x1234   :  { %4191 = vmatpush3.bf16.xpose.msra.mxu1 %v2178_v47  ;;  %4192 = vmatprep.mubr.msk.bf16.mxu1 %vm4790_vm0, %v4788_v4 }
0x1235   :  { %4196 = vmatprep.subr.bf16.mxu1 %v4788_v4 }
0x123b   :  { %4193 = vmatmul.mubr.msk.bf16.vlgmr.msra.gmra.mrb[48].mxu1 %vm421_vm1, %v5264_v52 }
0x123c   :  { %4197 = vmatpush3.bf16.msra.mxu1 %v2248_v16  ;;  %4198 = vmatprep.mubr.msk.bf16.mxu1 %vm4790_vm0, %v4788_v4 }
0x123d   :  { %4202 = vmatprep.subr.bf16.mxu1 %v4788_v4 }
0x1306   :  { %v2168_v53 = vpop.f32.mrb[44].mxu1 }
0x1307   :  { %v2169_v58 = vadd.f32 %v5276_v56, %v2168_v53  ;;  %v4188_v60 = vpop.f32.mrb[45].mxu1 }
0x1308   :  { %v2171_v61 = vpop.f32.mrb[46].mxu1 }
0x1309   :  { %v4189_v62 = vpop.f32.mrb[47].mxu1  ;;  %v2220_v18 = vsel %vm514_vm3, %v2169_v58, -inf }
0x130a   :  { %2221 = vmax.xlane.f32.xlu1 %v2220_v18 }
0x130e   :  { %v2214_v63 = vpop.f32.mrb[48].mxu1 }
0x130f   :  { %v2215_v1 = vadd.f32 %v5283_v0, %v2214_v63  ;;  %v4194_v2 = vpop.f32.mrb[49].mxu1 }
0x1310   :  { %v2217_v3 = vpop.f32.mrb[50].mxu1 }
0x1311   :  { %v4195_v7 = vpop.f32.mrb[51].mxu1  ;;  %v2223_v10 = vsel %vm514_vm3, %v2215_v1, -inf }
0x1312   :  { %2224 = vmax.xlane.f32.xlu0 %v2223_v10 }
0x1397   :  { %v2222_v12 = vpop.xlane.xlu1 %2221 }
0x1398   :  { %v2226_v15 = vsub.f32 %v2169_v58, %v2222_v12 }
0x139a   :  { %v2228_v17 = vmul.f32 1.442695, %v2226_v15 }
0x139c   :  { %4587 = vpow2.f32 %v2228_v17 }
0x139f   :  { %v2225_v21 = vpop.xlane.xlu0 %2224 }
0x13a0   :  { %v2227_v22 = vsub.f32 %v2215_v1, %v2225_v21 }
0x13a2   :  { %v2230_v24 = vmul.f32 1.442695, %v2227_v22 }
0x13a4   :  { %4589 = vpow2.f32 %v2230_v24 }
0x13a6   :  { %v4588_v26 = vpop.eup %4587 }
0x13a7   :  { %v2232_v27 = vsel %vm514_vm3, %v4588_v26, 0.0 }
0x13a8   :  { %2233 = vadd.xlane.f32.xlu1 %v2232_v27 }
0x13ae   :  { %v4590_v31 = vpop.eup %4589 }
0x13af   :  { %v2235_v32 = vsel %vm514_vm3, %v4590_v31, 0.0 }
0x13b0   :  { %2236 = vadd.xlane.f32.xlu0 %v2235_v32 }
0x13b9   :  { %2340 = vrot.lane.b32.xlu1 %v5246_v45, %s4791_s28 }
0x13bd   :  { %2337 = vrot.lane.b32.xlu1 %v5253_v29, %s4791_s28 }
0x13c1   :  { %2389 = vrot.lane.b32.xlu1 %v5264_v52, %s4791_s28 }
0x13c6   :  { %2392 = vrot.lane.b32.xlu0 %v5251_v57, %s4791_s28 }
0x1435   :  { %v2234_v33 = vpop.xlane.xlu1 %2233 }
0x1436   :  { %4591 = vrcp.f32 %v2234_v33 }
0x1439   :  { %v2341_v34 = vpop.permute.xlu1 %2340 }
0x143a   :  { %v2346_v35 = vsel %vm421_vm1, %v2341_v34, 0 }
0x143b   :  { %4209 = vmatpush3.bf16.xpose.msra.mxu0 %v2346_v35 }
0x143c   :  { %4220 = vmatprep.subr.bf16.mxu0 %v4788_v4 }
0x143d   :  { %v2237_v36 = vpop.xlane.xlu0 %2236  ;;  %v2338_v40 = vpop.permute.xlu1 %2337 }
0x143e   :  { %4593 = vrcp.f32 %v2237_v36 }
0x1440   :  { %v4592_v37 = vpop.eup %4591 }
0x1441   :  { %v2240_v23 = vmul.f32 %v4592_v37, %v4588_v26  ;;  %v2393_v5 = vpop.permute.xlu0 %2392  ;;  %v2390_v8 = vpop.permute.xlu1 %2389 }
0x1442   :  { %4211 = vmatmul.mubr.msk.bf16.vlgmr.msra.gmra.mrb[48].mxu0 %vm421_vm1, %v2338_v40  ;;  %v2398_v19 = vsel %vm421_vm1, %v2393_v5, 0 }
0x1443   :  { %v2242_v41 = vpack.c.bf16 %v2240_v23, %v2240_v23  ;;  %4222 = vmatprep.mubr.msk.bf16.mxu0 %vm4790_vm0, %v4788_v4 }
0x1445   :  { %4199 = vmatmul.mubr.msk.bf16.vlgmr.msra.gmra.mrb[52].mxu1 %vm514_vm3, %v2242_v41 }
0x1446   :  { %4203 = vmatpush3.bf16.msra.mxu1 %v2294_v9  ;;  %4204 = vmatprep.mubr.msk.bf16.mxu1 %vm4790_vm0, %v4788_v4 }
0x1447   :  { %4214 = vmatprep.subr.bf16.mxu1 %v4788_v4 }
0x1448   :  { %v4594_v42 = vpop.eup %4593 }
0x1449   :  { %v2241_v43 = vmul.f32 %v4594_v42, %v4590_v31 }
0x144b   :  { %v2243_v44 = vpack.c.bf16 %v2241_v43, %v2241_v43 }
0x144d   :  { %4205 = vmatmul.mubr.msk.bf16.vlgmr.msra.gmra.mrb[56].mxu1 %vm514_vm3, %v2243_v44 }
0x144e   :  { %4216 = vmatprep.mubr.msk.bf16.mxu1 %vm4790_vm0, %v4788_v4 }
0x144f   :  { %4215 = vmatpush3.bf16.xpose.msra.mxu1 %v2398_v19 }
0x1450   :  { %4226 = vmatprep.subr.bf16.mxu1 %v4788_v4 }
0x1456   :  { %4217 = vmatmul.mubr.msk.bf16.vlgmr.msra.gmra.mrb[60].mxu1 %vm421_vm1, %v2390_v8 }
0x1457   :  { %4228 = vmatprep.mubr.msk.bf16.mxu1 %vm4790_vm0, %v4788_v4 }
0x1515   :  { %v2382_v11 = vpop.f32.mrb[48].mxu0 }
0x1516   :  { %v2383_v50 = vadd.f32 %v5276_v56, %v2382_v11  ;;  %v4212_v51 = vpop.f32.mrb[49].mxu0 }
0x1517   :  { %v2385_v6 = vpop.f32.mrb[50].mxu0 }
0x1518   :  { %v5321_v13 = vpop.f32.mrb[52].mxu1  ;;  %v4213_v14 = vpop.f32.mrb[51].mxu0  ;;  %v2440_v28 = vsel %vm514_vm3, %v2383_v50, -inf }
0x1519   :  { %2441 = vmax.xlane.f32.xlu1 %v2440_v28  ;;  %v4200_v20 = vpop.f32.mrb[53].mxu1 }
0x151a   :  { %v2287_v54 = vpop.f32.mrb[54].mxu1 }
0x151b   :  { %v4201_v46 = vpop.f32.mrb[55].mxu1 }
0x1520   :  { %v5324_v47 = vpop.f32.mrb[56].mxu1 }
0x1521   :  { %v4206_v48 = vpop.f32.mrb[57].mxu1 }
0x1522   :  { %v2333_v16 = vpop.f32.mrb[58].mxu1 }
0x1523   :  { %v4207_v53 = vpop.f32.mrb[59].mxu1 }
0x1529   :  { %v2434_v58 = vpop.f32.mrb[60].mxu1 }
0x152a   :  { %v2435_v60 = vadd.f32 %v5283_v0, %v2434_v58  ;;  %v4218_v61 = vpop.f32.mrb[61].mxu1  ;;  %2465 = vrot.lane.b32.xlu1 %v5262_v49, %s4791_s28 }
0x152b   :  { %v2437_v62 = vpop.f32.mrb[62].mxu1 }
0x152c   :  { %v4219_v18 = vpop.f32.mrb[63].mxu1  ;;  %v2443_v63 = vsel %vm514_vm3, %v2435_v60, -inf }
0x152d   :  { %2444 = vmax.xlane.f32.xlu0 %v2443_v63 }
0x152e   :  { %2564 = vrot.lane.b32.xlu1 %v5246_v45, %s4778_s15 }
0x1532   :  { %2614 = vrot.lane.b32.xlu1 %v5251_v57, %s4778_s15 }
0x1536   :  { %2562 = vrot.lane.b32.xlu1 %v5253_v29, %s4778_s15 }
0x15a6   :  { %v2442_v1 = vpop.xlane.xlu1 %2441 }
0x15a7   :  { %v2446_v2 = vsub.f32 %v2383_v50, %v2442_v1 }
0x15a9   :  { %v2448_v3 = vmul.f32 1.442695, %v2446_v2 }
0x15aa   :  { %v2466_v7 = vpop.permute.xlu1 %2465 }
0x15ab   :  { %4595 = vpow2.f32 %v2448_v3  ;;  %v2471_v10 = vsel %vm542_vm2, %v2466_v7, 0 }
0x15ac   :  { %4221 = vmatpush3.bf16.msra.mxu0 %v2471_v10 }
0x15ad   :  { %4232 = vmatprep.subr.bf16.mxu0 %v4788_v4 }
0x15ae   :  { %v2565_v32 = vpop.permute.xlu1 %2564 }
0x15af   :  { %v2570_v35 = vsel %vm421_vm1, %v2565_v32, 0 }
0x15b2   :  { %v2615_v36 = vpop.permute.xlu1 %2614 }
0x15b3   :  { %v2620_v5 = vsel %vm421_vm1, %v2615_v36, 0 }
0x15b5   :  { %v4596_v12 = vpop.eup %4595 }
0x15b6   :  { %v2452_v15 = vsel %vm514_vm3, %v4596_v12, 0.0  ;;  %v2563_v23 = vpop.permute.xlu1 %2562 }
0x15b7   :  { %2453 = vadd.xlane.f32.xlu0 %v2452_v15 }
0x15ba   :  { %v2445_v17 = vpop.xlane.xlu0 %2444 }
0x15bb   :  { %v2447_v21 = vsub.f32 %v2435_v60, %v2445_v17 }
0x15bd   :  { %v2450_v22 = vmul.f32 1.442695, %v2447_v21 }
0x15bf   :  { %4597 = vpow2.f32 %v2450_v22 }
0x15c9   :  { %v4598_v24 = vpop.eup %4597 }
0x15ca   :  { %v2455_v26 = vsel %vm514_vm3, %v4598_v24, 0.0 }
0x15cb   :  { %2456 = vadd.xlane.f32.xlu0 %v2455_v26 }
0x15e1   :  { %2514 = vrot.lane.b32.xlu0 %v5301_v38, %s4791_s28 }
0x15e5   :  { %2612 = vrot.lane.b32.xlu0 %v5264_v52, %s4778_s15 }
0x1644   :  { %v2454_v27 = vpop.xlane.xlu0 %2453 }
0x1645   :  { %4599 = vrcp.f32 %v2454_v27 }
0x164f   :  { %v4600_v31 = vpop.eup %4599 }
0x1650   :  { %v2460_v33 = vmul.f32 %v4600_v31, %v4596_v12 }
0x1652   :  { %v2462_v34 = vpack.c.bf16 %v2460_v33, %v2460_v33 }
0x1654   :  { %4223 = vmatmul.mubr.msk.bf16.vlgmr.msra.gmra.mrb[52].mxu0 %vm514_vm3, %v2462_v34 }
0x1655   :  { %4233 = vmatpush3.bf16.xpose.msra.mxu0 %v2570_v35  ;;  %4234 = vmatprep.mubr.msk.bf16.mxu0 %vm4790_vm0, %v4788_v4 }
0x1656   :  { %4244 = vmatprep.subr.bf16.mxu0 %v4788_v4 }
0x1658   :  { %v2457_v37 = vpop.xlane.xlu0 %2456 }
0x1659   :  { %4601 = vrcp.f32 %v2457_v37 }
0x165c   :  { %v2515_v40 = vpop.permute.xlu0 %2514  ;;  %4235 = vmatmul.mubr.msk.bf16.vlgmr.msra.gmra.mrb[56].mxu0 %vm421_vm1, %v2563_v23 }
0x165d   :  { %v2520_v41 = vsel %vm542_vm2, %v2515_v40, 0  ;;  %4246 = vmatprep.mubr.msk.bf16.mxu0 %vm4790_vm0, %v4788_v4 }
0x165e   :  { %4227 = vmatpush3.bf16.msra.mxu1 %v2520_v41 }
0x165f   :  { %4238 = vmatprep.subr.bf16.mxu1 %v4788_v4 }
0x1660   :  { %v2613_v44 = vpop.permute.xlu0 %2612 }
0x1663   :  { %v4602_v9 = vpop.eup %4601 }
0x1664   :  { %v2461_v42 = vmul.f32 %v4602_v9, %v4598_v24 }
0x1666   :  { %v2463_v43 = vpack.c.bf16 %v2461_v42, %v2461_v42 }
0x1668   :  { %4229 = vmatmul.mubr.msk.bf16.vlgmr.msra.gmra.mrb[64].mxu1 %vm514_vm3, %v2463_v43 }
0x1669   :  { %4239 = vmatpush3.bf16.xpose.msra.mxu1 %v2620_v5  ;;  %4240 = vmatprep.mubr.msk.bf16.mxu1 %vm4790_vm0, %v4788_v4 }
0x166a   :  { %4250 = vmatprep.subr.bf16.mxu1 %v4788_v4 }
0x1670   :  { %4241 = vmatmul.mubr.msk.bf16.vlgmr.msra.gmra.mrb[68].mxu1 %vm421_vm1, %v2613_v44 }
0x1671   :  { %4252 = vmatprep.mubr.msk.bf16.mxu1 %vm4790_vm0, %v4788_v4 }
0x1727   :  { %v5362_v19 = vpop.f32.mrb[52].mxu0 }
0x1728   :  { %v4224_v8 = vpop.f32.mrb[53].mxu0 }
0x1729   :  { %v2510_v11 = vpop.f32.mrb[54].mxu0 }
0x172a   :  { %v4225_v50 = vpop.f32.mrb[55].mxu0 }
0x172f   :  { %v2606_v51 = vpop.f32.mrb[56].mxu0 }
0x1730   :  { %v2607_v6 = vadd.f32 %v5276_v56, %v2606_v51  ;;  %v4236_v14 = vpop.f32.mrb[57].mxu0 }
0x1731   :  { %v2609_v28 = vpop.f32.mrb[58].mxu0 }
0x1732   :  { %v4237_v20 = vpop.f32.mrb[59].mxu0  ;;  %v2662_v54 = vsel %vm514_vm3, %v2607_v6, -inf }
0x1733   :  { %2663 = vmax.xlane.f32.xlu1 %v2662_v54 }
0x173b   :  { %v5366_v46 = vpop.f32.mrb[64].mxu1 }
0x173c   :  { %v4352_v48 = vpack.i.bf16 %v5366_v46, %v5362_v19  ;;  %v4230_v16 = vpop.f32.mrb[65].mxu1 }
0x173d   :  { %v2559_v53 = vpop.f32.mrb[66].mxu1 }
0x173e   :  { %v4231_v58 = vpop.f32.mrb[67].mxu1 }
0x1743   :  { %v2656_v60 = vpop.f32.mrb[68].mxu1 }
0x1744   :  { %v2657_v61 = vadd.f32 %v5283_v0, %v2656_v60  ;;  %v4242_v62 = vpop.f32.mrb[69].mxu1  ;;  %2686 = vrot.lane.b32.xlu1 %v5262_v49, %s4778_s15 }
0x1745   :  { %v2659_v18 = vpop.f32.mrb[70].mxu1 }
0x1746   :  { %v4243_v63 = vpop.f32.mrb[71].mxu1  ;;  %v2665_v1 = vsel %vm514_vm3, %v2657_v61, -inf }
0x1747   :  { %2666 = vmax.xlane.f32.xlu0 %v2665_v1 }
0x1748   :  { %2784 = vrot.lane.b32.xlu1 %v5246_v45, %s4792_s9 }
0x174c   :  { %2834 = vrot.lane.b32.xlu1 %v5251_v57, %s4792_s9 }
0x1750   :  { %2782 = vrot.lane.b32.xlu1 %v5253_v29, %s4792_s9 }
0x17c0   :  { %v2664_v2 = vpop.xlane.xlu1 %2663 }
0x17c1   :  { %v2668_v3 = vsub.f32 %v2607_v6, %v2664_v2 }
0x17c3   :  { %v2670_v7 = vmul.f32 1.442695, %v2668_v3 }
0x17c4   :  { %v2687_v10 = vpop.permute.xlu1 %2686 }
0x17c5   :  { %4603 = vpow2.f32 %v2670_v7  ;;  %v2692_v12 = vsel %vm542_vm2, %v2687_v10, 0 }
0x17c6   :  { %4245 = vmatpush3.bf16.msra.mxu0 %v2692_v12 }
0x17c7   :  { %4256 = vmatprep.subr.bf16.mxu0 %v4788_v4 }
0x17c8   :  { %v2785_v27 = vpop.permute.xlu1 %2784 }
0x17c9   :  { %v2790_v33 = vsel %vm421_vm1, %v2785_v27, 0 }
0x17cc   :  { %v2835_v34 = vpop.permute.xlu1 %2834 }
0x17cd   :  { %v2840_v9 = vsel %vm421_vm1, %v2835_v34, 0  ;;  %v4482_v34 = vld [vmem:[#allocation5 + $0x58] sm:$0xff]  }
0x17cf   :  { %v4604_v15 = vpop.eup %4603 }
0x17d0   :  { %v2674_v17 = vsel %vm514_vm3, %v4604_v15, 0.0 }
0x17d1   :  { %2675 = vadd.xlane.f32.xlu0 %v2674_v17 }
0x17d4   :  { %v2667_v45 = vpop.xlane.xlu0 %2666 }
0x17d5   :  { %v2669_v21 = vsub.f32 %v2657_v61, %v2667_v45 }
0x17d7   :  { %v2672_v57 = vmul.f32 1.442695, %v2669_v21 }
0x17d9   :  { %4605 = vpow2.f32 %v2672_v57 }
0x17e3   :  { %v4606_v22 = vpop.eup %4605 }
0x17e4   :  { %v2677_v29 = vsel %vm514_vm3, %v4606_v22, 0.0 }
0x17e5   :  { %2678 = vadd.xlane.f32.xlu0 %v2677_v29 }
0x17fb   :  { %2734 = vrot.lane.b32.xlu0 %v5301_v38, %s4778_s15 }
0x17ff   :  { %2832 = vrot.lane.b32.xlu0 %v5264_v52, %s4792_s9  ;;  %v2783_v52 = vpop.permute.xlu1 %2782 }
0x185e   :  { %v2676_v24 = vpop.xlane.xlu0 %2675 }
0x185f   :  { %4607 = vrcp.f32 %v2676_v24 }
0x1869   :  { %v4608_v26 = vpop.eup %4607 }
0x186a   :  { %v2682_v31 = vmul.f32 %v4608_v26, %v4604_v15 }
0x186c   :  { %v2684_v32 = vpack.c.bf16 %v2682_v31, %v2682_v31 }
0x186e   :  { %4247 = vmatmul.mubr.msk.bf16.vlgmr.msra.gmra.mrb[60].mxu0 %vm514_vm3, %v2684_v32  ;;  %v4480_v32 = vld [vmem:[#allocation5 + $0x48] sm:$0xff]  }
0x186f   :  { %4257 = vmatpush3.bf16.xpose.msra.mxu0 %v2790_v33  ;;  %4258 = vmatprep.mubr.msk.bf16.mxu0 %vm4790_vm0, %v4788_v4  ;;  %v4481_v33 = vld [vmem:[#allocation5 + $0x50] sm:$0xff]  }
0x1870   :  { %4268 = vmatprep.subr.bf16.mxu0 %v4788_v4 }
0x1872   :  { %v2679_v35 = vpop.xlane.xlu0 %2678 }
0x1873   :  { %4609 = vrcp.f32 %v2679_v35  ;;  %v4483_v35 = vld [vmem:[#allocation5 + $0x60] sm:$0xff]  }
0x1876   :  { %v2735_v36 = vpop.permute.xlu0 %2734  ;;  %4259 = vmatmul.mubr.msk.bf16.vlgmr.msra.gmra.mrb[64].mxu0 %vm421_vm1, %v2783_v52  ;;  %v4484_v52 = vld [vmem:[#allocation5 + $0x68] sm:$0xff]  }
0x1877   :  { %v2740_v37 = vsel %vm542_vm2, %v2735_v36, 0  ;;  %4270 = vmatprep.mubr.msk.bf16.mxu0 %vm4790_vm0, %v4788_v4 }
0x1878   :  { %4251 = vmatpush3.bf16.msra.mxu1 %v2740_v37 }
0x1879   :  { %4262 = vmatprep.subr.bf16.mxu1 %v4788_v4 }
0x187a   :  { %v2833_v42 = vpop.permute.xlu0 %2832 }
0x187d   :  { %v4610_v23 = vpop.eup %4609 }
0x187e   :  { %v2683_v40 = vmul.f32 %v4610_v23, %v4606_v22 }
0x1880   :  { %v2685_v41 = vpack.c.bf16 %v2683_v40, %v2683_v40 }
0x1882   :  { %4253 = vmatmul.mubr.msk.bf16.vlgmr.msra.gmra.mrb[72].mxu1 %vm514_vm3, %v2685_v41  ;;  %v4486_v41 = vld [vmem:[#allocation5 + $0x78] sm:$0xff]  }
0x1883   :  { %4263 = vmatpush3.bf16.xpose.msra.mxu1 %v2840_v9  ;;  %4264 = vmatprep.mubr.msk.bf16.mxu1 %vm4790_vm0, %v4788_v4 }
0x1884   :  { %4274 = vmatprep.subr.bf16.mxu1 %v4788_v4 }
0x188a   :  { %4265 = vmatmul.mubr.msk.bf16.vlgmr.msra.gmra.mrb[76].mxu1 %vm421_vm1, %v2833_v42 }
0x188b   :  { %4276 = vmatprep.mubr.msk.bf16.mxu1 %vm4790_vm0, %v4788_v4 }
0x1941   :  { %v2728_v43 = vpop.f32.mrb[60].mxu0 }
0x1942   :  { %v4248_v5 = vpop.f32.mrb[61].mxu0 }
0x1943   :  { %v2731_v44 = vpop.f32.mrb[62].mxu0 }
0x1944   :  { %v4249_v8 = vpop.f32.mrb[63].mxu0 }
0x1949   :  { %v2826_v11 = vpop.f32.mrb[64].mxu0 }
0x194a   :  { %v2827_v50 = vadd.f32 %v5276_v56, %v2826_v11  ;;  %v4260_v51 = vpop.f32.mrb[65].mxu0 }
0x194b   :  { %v2829_v6 = vpop.f32.mrb[66].mxu0 }
0x194c   :  { %v4261_v14 = vpop.f32.mrb[67].mxu0  ;;  %v2882_v28 = vsel %vm514_vm3, %v2827_v50, -inf }
0x194d   :  { %2883 = vmax.xlane.f32.xlu1 %v2882_v28 }
0x1955   :  { %v2776_v20 = vpop.f32.mrb[72].mxu1 }
0x1956   :  { %v4357_v54 = vpack.i.bf16 %v2776_v20, %v2728_v43  ;;  %v4254_v16 = vpop.f32.mrb[73].mxu1 }
0x1957   :  { %v2779_v53 = vpop.f32.mrb[74].mxu1 }
0x1958   :  { %v4255_v58 = vpop.f32.mrb[75].mxu1 }
0x195d   :  { %v2876_v60 = vpop.f32.mrb[76].mxu1 }
0x195e   :  { %v2877_v61 = vadd.f32 %v5283_v0, %v2876_v60  ;;  %v4266_v62 = vpop.f32.mrb[77].mxu1  ;;  %2906 = vrot.lane.b32.xlu1 %v5262_v49, %s4792_s9 }
0x195f   :  { %v2879_v18 = vpop.f32.mrb[78].mxu1 }
0x1960   :  { %v4267_v56 = vpop.f32.mrb[79].mxu1  ;;  %v2885_v63 = vsel %vm514_vm3, %v2877_v61, -inf }
0x1961   :  { %2886 = vmax.xlane.f32.xlu0 %v2885_v63  ;;  %v1852_v56 = vld [vmem:[#allocation10 + $0x1b] ss:$0 sm:$0xff] }
0x1962   :  { %4353 = vrot.lane.b32.xlu1 %v4352_v48, %s4792_s9 }
0x1966   :  { %4358 = vrot.lane.b32.xlu1 %v4357_v54, %s4778_s15 }
0x19da   :  { %v2884_v1 = vpop.xlane.xlu1 %2883 }
0x19db   :  { %v2888_v2 = vsub.f32 %v2827_v50, %v2884_v1 }
0x19dd   :  { %v2890_v3 = vmul.f32 1.442695, %v2888_v2 }
0x19de   :  { %v2907_v0 = vpop.permute.xlu1 %2906 }
0x19df   :  { %4611 = vpow2.f32 %v2890_v3  ;;  %v2912_v7 = vsel %vm542_vm2, %v2907_v0, 0 }
0x19e0   :  { %4269 = vmatpush3.bf16.msra.mxu0 %v2912_v7 }
0x19e1   :  { %4280 = vmatprep.subr.bf16.mxu0 %v4788_v4 }
0x19e2   :  { %v4354_v8 = vpop.permute.xlu1 %4353 }
0x19e3   :  { %v4356_v50 = vunpack.i.h.bf16 %v4354_v8  ;;  %v4355_v51 = vunpack.i.l.bf16 %v4354_v8  ;;  %v1854_v8 = vld [vmem:[#allocation10 + $0x1d] ss:$0 sm:$0xff] }
0x19e5   :  { %v3027_v20 = vsel %vm421_vm1, %v5324_v47, %v4356_v50  ;;  %v3026_v54 = vsel %vm421_vm1, %v5321_v13, %v4355_v51 }
0x19e6   :  { %v4359_v11 = vpop.permute.xlu1 %4358 }
0x19e7   :  { %v4361_v6 = vunpack.i.h.bf16 %v4359_v11  ;;  %v4360_v14 = vunpack.i.l.bf16 %v4359_v11 }
0x19e9   :  { %v4612_v49 = vpop.eup %4611  ;;  %v3029_v58 = vsel %vm1324_vm4, %v3027_v20, %v4361_v6  ;;  %v3028_v60 = vsel %vm1324_vm4, %v3026_v54, %v4360_v14  ;;  %v4511_v14 = vld [vmem:[#allocation7 + $0xc0] sm:$0xff]   ;;  %v4513_v20 = vld [vmem:[#allocation7 + $0xc8] sm:$0xff]  }
0x19ea   :  { %v2894_v10 = vsel %vm514_vm3, %v4612_v49, 0.0  ;;  %v4514_v54 = vld [vmem:[#allocation7 + $0x88] sm:$0xff]  }
0x19eb   :  { %2895 = vadd.xlane.f32.xlu0 %v2894_v10  ;;  %v4489_v10 = vld [vmem:[%s5531_s4 + $0x84] ss:$8 sps:$4 sm:$0xff]  }
0x19ee   :  { %v2887_v12 = vpop.xlane.xlu0 %2886 }
0x19ef   :  { %v2889_v15 = vsub.f32 %v2877_v61, %v2887_v12  ;;  %v4492_v12 = vld [vmem:[%s5531_s4 + $0x94] ss:$8 sps:$4 sm:$0xff]  }
0x19f1   :  { %v2892_v19 = vmul.f32 1.442695, %v2889_v15 }
0x19f3   :  { %4613 = vpow2.f32 %v2892_v19 }
0x19fd   :  { %v4614_v46 = vpop.eup %4613 }
0x19fe   :  { %v2897_v48 = vsel %vm514_vm3, %v4614_v46, 0.0 }
0x19ff   :  { %2898 = vadd.xlane.f32.xlu0 %v2897_v48 }
0x1a15   :  { %2954 = vrot.lane.b32.xlu0 %v5301_v38, %s4792_s9  ;;  %v4479_v38 = vld [vmem:[#allocation5 + $0x40] sm:$0xff]  }
0x1a78   :  { %v2896_v17 = vpop.xlane.xlu0 %2895 }
0x1a79   :  { %4615 = vrcp.f32 %v2896_v17 }
0x1a83   :  { %v4616_v45 = vpop.eup %4615 }
0x1a84   :  { %v2902_v21 = vmul.f32 %v4616_v45, %v4612_v49  ;;  %v4487_v49 = vld [vmem:[%s5531_s4 + $0x80] ss:$8 sps:$4 sm:$0xff]  }
0x1a86   :  { %v2904_v57 = vpack.c.bf16 %v2902_v21, %v2902_v21 }
0x1a88   :  { %4271 = vmatmul.mubr.msk.bf16.vlgmr.msra.gmra.mrb[68].mxu0 %vm514_vm3, %v2904_v57  ;;  %v4495_v57 = vld [vmem:[%s5531_s4 + $0xa4] ss:$8 sps:$4 sm:$0xff]  }
0x1a89   :  { %4296 = vmatprep.mubr.msk.bf16.mxu0 %vm4790_vm0, %v4788_v4  ;;  %4281 = vmatpush3.bf16.msra.mxu0 %v4479_v38  ;;  %v4502_v38 = vld [vmem:[%s5531_s4 + $0xd0] ss:$8 sps:$4 sm:$0xff]  }
0x1a8a   :  { %4282 = vmatprep.subr.bf16.mxu0 %v4788_v4 }
0x1a8c   :  { %v2899_v22 = vpop.xlane.xlu0 %2898 }
0x1a8d   :  { %4617 = vrcp.f32 %v2899_v22  ;;  %4283 = vmatpush3.bf16.msra.mxu0 %v4480_v32  ;;  %v4493_v22 = vld [vmem:[%s5531_s4 + $0xa0] ss:$8 sps:$4 sm:$0xff]   ;;  %v4507_v32 = vld [vmem:[%s5531_s4 + $0xe4] ss:$8 sps:$4 sm:$0xff]  }
0x1a8e   :  { %4284 = vmatprep.subr.bf16.mxu0 %v4788_v4 }
0x1a90   :  { %v2955_v29 = vpop.permute.xlu0 %2954 }
0x1a91   :  { %v2960_v24 = vsel %vm542_vm2, %v2955_v29, 0  ;;  %4285 = vmatpush3.bf16.msra.mxu0 %v4481_v33  ;;  %v4498_v29 = vld [vmem:[%s5531_s4 + $0xb4] ss:$8 sps:$4 sm:$0xff]   ;;  %v4505_v33 = vld [vmem:[%s5531_s4 + $0xe0] ss:$8 sps:$4 sm:$0xff]  }
0x1a92   :  { %4275 = vmatpush3.bf16.msra.mxu1 %v2960_v24  ;;  %4286 = vmatprep.subr.bf16.mxu0 %v4788_v4  ;;  %v4496_v24 = vld [vmem:[%s5531_s4 + $0xb0] ss:$8 sps:$4 sm:$0xff]  }
0x1a93   :  { %3276 = vmatprep.subr.bf16.mxu1 %v4489_v10 }
0x1a95   :  { %4287 = vmatpush3.bf16.msra.mxu0 %v4482_v34  ;;  %v4510_v34 = vld [vmem:[%s5531_s4 + $0xf4] ss:$8 sps:$4 sm:$0xff]  }
0x1a96   :  { %4288 = vmatprep.subr.bf16.mxu0 %v4788_v4 }
0x1a97   :  { %v4618_v26 = vpop.eup %4617 }
0x1a98   :  { %v2903_v27 = vmul.f32 %v4618_v26, %v4614_v46  ;;  %v4501_v26 = vld [vmem:[%s5531_s4 + $0xc4] ss:$8 sps:$4 sm:$0xff]  }
0x1a99   :  { %4289 = vmatpush3.bf16.msra.mxu0 %v4483_v35  ;;  %v4508_v35 = vld [vmem:[%s5531_s4 + $0xf0] ss:$8 sps:$4 sm:$0xff]  }
0x1a9a   :  { %v2905_v31 = vpack.c.bf16 %v2903_v27, %v2903_v27  ;;  %4290 = vmatprep.subr.bf16.mxu0 %v4788_v4  ;;  %v4499_v27 = vld [vmem:[%s5531_s4 + $0xc0] ss:$8 sps:$4 sm:$0xff]  }
0x1a9c   :  { %4277 = vmatmul.mubr.msk.bf16.vlgmr.msra.gmra.mrb[80].mxu1 %vm514_vm3, %v2905_v31  ;;  %v4504_v31 = vld [vmem:[%s5531_s4 + $0xd4] ss:$8 sps:$4 sm:$0xff]  }
0x1a9d   :  { %3308 = vmatprep.mubr.bf16.mxu1 %v4789_v30  ;;  %4291 = vmatpush3.bf16.msra.mxu0 %v4484_v52  ;;  %v4485_v30 = vld [vmem:[#allocation5 + $0x70] sm:$0xff]  }
0x1a9e   :  { %4292 = vmatprep.subr.bf16.mxu0 %v4788_v4  ;;  %3277 = vmatpush1.bf16.msra.mxu1 %v4487_v49 }
0x1a9f   :  { %3278 = vmatprep.subr.bf16.mxu1 %v4492_v12 }
0x1aa1   :  { %4293 = vmatpush3.bf16.msra.mxu0 %v4485_v30 }
0x1aa2   :  { %4294 = vmatprep.subr.bf16.mxu0 %v4788_v4 }
0x1aa5   :  { %4295 = vmatpush3.bf16.msra.mxu0 %v4486_v41 }
0x1aa6   :  { %3997 = vmatprep.subr.bf16.mxu0 %v4511_v14 }
0x1b5b   :  { %v2948_v36 = vpop.f32.mrb[68].mxu0 }
0x1b5c   :  { %v4272_v37 = vpop.f32.mrb[69].mxu0 }
0x1b5d   :  { %v2951_v23 = vpop.f32.mrb[70].mxu0 }
0x1b5e   :  { %v4273_v40 = vpop.f32.mrb[71].mxu0 }
0x1b6f   :  { %v2996_v9 = vpop.f32.mrb[80].mxu1 }
0x1b70   :  { %v4362_v42 = vpack.i.bf16 %v2996_v9, %v2948_v36  ;;  %v4278_v43 = vpop.f32.mrb[81].mxu1 }
0x1b71   :  { %v2999_v5 = vpop.f32.mrb[82].mxu1 }
0x1b72   :  { %4363 = vrot.lane.b32.xlu1 %v4362_v42, %s4791_s28  ;;  %v4279_v44 = vpop.f32.mrb[83].mxu1  ;;  %v1853_v42 = vld [vmem:[#allocation10 + $0x1c] ss:$0 sm:$0xff] }
0x1be4   :  { %v4364_v28 = vpop.permute.xlu1 %4363 }
0x1be5   :  { %v4366_v16 = vunpack.i.h.bf16 %v4364_v28  ;;  %v4365_v53 = vunpack.i.l.bf16 %v4364_v28  ;;  %v4512_v28 = vld [vmem:[#allocation7 + $0x80] sm:$0xff]  }
0x1be7   :  { %v3031_v61 = vsel %vm1327_vm5, %v3029_v58, %v4366_v16  ;;  %v3030_v62 = vsel %vm1327_vm5, %v3028_v60, %v4365_v53  ;;  %v4515_v16 = vld [vmem:[#allocation7 + $0xd0] sm:$0xff]   ;;  %v4517_v58 = vld [vmem:[#allocation7 + $0xd8] sm:$0xff]  }
0x1be8   :  { %v3032_v18 = vpack.c.bf16 %v3031_v61, %v3030_v62  ;;  %v4516_v53 = vld [vmem:[#allocation7 + $0x90] sm:$0xff]   ;;  %v4518_v60 = vld [vmem:[#allocation7 + $0x98] sm:$0xff]   ;;  %v4519_v61 = vld [vmem:[#allocation7 + $0xe0] sm:$0xff]  }
0x1be9   :  { %v4520_v62 = vld [vmem:[#allocation7 + $0xa0] sm:$0xff]  }
0x1bea   :  { %4297 = vmatmul.mubr.bf16.vlgmr.msra.gmra.mrb[72].mxu0 %v3032_v18  ;;  %v4521_v18 = vld [vmem:[#allocation7 + $0xe8] sm:$0xff]  }
0x1beb   :  { %3998 = vmatpush3.bf16.msra.mxu0 %v4512_v28 }
0x1bec   :  { %3999 = vmatprep.subr.bf16.mxu0 %v4513_v20 }
0x1bef   :  { %4000 = vmatpush3.bf16.msra.mxu0 %v4514_v54 }
0x1bf0   :  { %4001 = vmatprep.subr.bf16.mxu0 %v4515_v16 }
0x1bf3   :  { %4002 = vmatpush3.bf16.msra.mxu0 %v4516_v53  ;;  %v1857_v53 = vld [vmem:[#allocation10 + $0x1f] ss:$0 sm:$0xff] }
0x1bf4   :  { %4003 = vmatprep.subr.bf16.mxu0 %v4517_v58 }
0x1bf7   :  { %4004 = vmatpush3.bf16.msra.mxu0 %v4518_v60 }
0x1bf8   :  { %4005 = vmatprep.subr.bf16.mxu0 %v4519_v61 }
0x1bfb   :  { %4006 = vmatpush3.bf16.msra.mxu0 %v4520_v62 }
0x1bfc   :  { %4007 = vmatprep.subr.bf16.mxu0 %v4521_v18 }
0x1cbd   :  { %v3132_v63 = vpop.f32.mrb[72].mxu0 }
0x1cbe   :  { %v3133_v1 = vadd.f32 %v3132_v63, %v1852_v56  ;;  %v4298_v2 = vpop.f32.mrb[73].mxu0  ;;  %v4523_v63 = vld [vmem:[#allocation7 + $0xf0] sm:$0xff]  }
0x1cbf   :  { %v3135_v47 = vpop.f32.mrb[74].mxu0  ;;  %v4525_v2 = vld [vmem:[#allocation7 + $0xf8] sm:$0xff]  }
0x1cc0   :  { %v3136_v3 = vadd.f32 %v3135_v47, %v1852_v56  ;;  %v4299_v0 = vpop.f32.mrb[75].mxu0  ;;  %v3139_v13 = vadd.f32 %v3133_v1, %v5230_v25  ;;  %v4490_v25 = vld [vmem:[%s5531_s4 + $0x90] ss:$8 sps:$4 sm:$0xff]   ;;  %v4522_v56 = vld [vmem:[#allocation7 + $0xa8] sm:$0xff]   ;;  %s4793_s4 = smov [#allocation11]  }
0x1cc1   :  { %3279 = vmatpush1.bf16.msra.mxu1 %v4490_v25  ;;  %4008 = vmatpush3.bf16.msra.mxu0 %v4522_v56  ;;  %v4524_v1 = vld [vmem:[#allocation7 + $0xb0] sm:$0xff]   ;;  %v4526_v47 = vld [vmem:[#allocation7 + $0xb8] sm:$0xff]   ;;  %s3678_s9 = sshll.u32 %s4793_s4, 4  ;;  %s3679_s9 = int_to_ptr.vmem [resolvable:$true] %s3678_s9 }
0x1cc2   :  { %3141 = vadd.xlane.f32.xlu0 %v3139_v13  ;;  %v3140_v7 = vadd.f32 %v3136_v3, %v5232_v39  ;;  %3280 = vmatprep.subr.bf16.mxu1 %v4495_v57  ;;  %v1856_v3 = vld [vmem:[#allocation10 + $0x1e] ss:$8 sm:$0x3]  ;;  %s4747_s20 = scalar_lea.vmem %s3679_s9, 32  ;;  %p4752_p13 = scmp.lt.s32.totalorder %s3679_s9, %s3679_s9 }
0x1cc3   :  { %4009 = vmatprep.subr.bf16.mxu0 %v4523_v63  ;;  %v3189_v0 = vrot.slane %v1856_v3, %v4955_v59  ;;  %p4748_p12 = scmp.ne.s32.totalorder %s3679_s9, %s4747_s20  ;;  %p4753_p0 = scmp.lt.s32.totalorder %s4747_s20, %s4747_s20 }
0x1cc4   :  { %3143 = vadd.xlane.f32.xlu1 %v3140_v7 }
0x1cc5   :  { %3281 = vmatpush1.bf16.msra.mxu1 %v4493_v22  ;;  %4010 = vmatpush3.bf16.msra.mxu0 %v4524_v1  ;;  %p4754_p1 = por %p4753_p0, %p4752_p13 }
0x1cc6   :  { %3282 = vmatprep.subr.bf16.mxu1 %v4498_v29  ;;  %4011 = vmatprep.subr.bf16.mxu0 %v4525_v2 }
0x1cc7   :  { %p4755_p2 = pnand %p4754_p1, %p4748_p12 }
0x1cc9   :  { %3283 = vmatpush1.bf16.msra.mxu1 %v4496_v24  ;;  %4012 = vmatpush3.bf16.msra.mxu0 %v4526_v47 }
0x1cca   :  { %3284 = vmatprep.subr.bf16.mxu1 %v4501_v26 }
0x1ccd   :  { %3285 = vmatpush1.bf16.msra.mxu1 %v4499_v27 }
0x1cce   :  { %3286 = vmatprep.subr.bf16.mxu1 %v4504_v31 }
0x1cd1   :  { %3287 = vmatpush1.bf16.msra.mxu1 %v4502_v38 }
0x1cd2   :  { %3288 = vmatprep.subr.bf16.mxu1 %v4507_v32 }
0x1cd5   :  { %3289 = vmatpush1.bf16.msra.mxu1 %v4505_v33 }
0x1cd6   :  { %3290 = vmatprep.subr.bf16.mxu1 %v4510_v34 }
0x1cd9   :  { %3291 = vmatpush1.bf16.msra.mxu1 %v4508_v35 }
0x1cda   :  { %4300 = vmatprep.subr.bf16.mxu1 %v4788_v4 }
0x1d4f   :  { %v3142_v39 = vpop.xlane.xlu0 %3141 }
0x1d50   :  { %v3145_v15 = vmul.f32 0.0078125, %v3142_v39 }
0x1d51   :  { %v3144_v19 = vpop.xlane.xlu1 %3143 }
0x1d52   :  { %v3147_v46 = vsub.f32 %v3139_v13, %v3145_v15  ;;  %v3146_v48 = vmul.f32 0.0078125, %v3144_v19  ;;  %v3193_v13 = vrot.slane %v1856_v3, %v4950_v55 }
0x1d54   :  { %v3148_v17 = vsub.f32 %v3140_v7, %v3146_v48  ;;  %v3149_v45 = vmul.f32 %v3147_v46, %v3147_v46 }
0x1d56   :  { %3151 = vadd.xlane.f32.xlu0 %v3149_v45  ;;  %v3150_v21 = vmul.f32 %v3148_v17, %v3148_v17 }
0x1d5a   :  { %3153 = vadd.xlane.f32.xlu0 %v3150_v21 }
0x1de3   :  { %v3152_v52 = vpop.xlane.xlu0 %3151 }
0x1de4   :  { %v3155_v30 = vmul.f32 0.0078125, %v3152_v52 }
0x1de6   :  { %v3157_v36 = vadd.f32 1e-12, %v3155_v30 }
0x1de7   :  { %v3154_v37 = vpop.xlane.xlu0 %3153 }
0x1de8   :  { %4619 = vrsqrt.f32 %v3157_v36  ;;  %v3156_v23 = vmul.f32 0.0078125, %v3154_v37 }
0x1dea   :  { %v3158_v40 = vadd.f32 1e-12, %v3156_v23 }
0x1dec   :  { %4621 = vrsqrt.f32 %v3158_v40 }
0x1df2   :  { %v4620_v41 = vpop.eup %4619 }
0x1df3   :  { %v3161_v9 = vmul.f32 %v4620_v41, %v3147_v46 }
0x1df5   :  { %v3163_v44 = vmul.f32 %v3161_v9, %v1853_v42 }
0x1df6   :  { %v4622_v43 = vpop.eup %4621 }
0x1df7   :  { %v3162_v5 = vmul.f32 %v4622_v43, %v3148_v17  ;;  %v5496_v50 = vadd.f32 %v3163_v44, %v1854_v8 }
0x1df9   :  { %v3164_v11 = vmul.f32 %v3162_v5, %v1853_v42 }
0x1dfb   :  { %v5498_v51 = vadd.f32 %v3164_v11, %v1854_v8 }
0x1dfd   :  { %v3167_v6 = vpack.c.bf16 %v5498_v51, %v5496_v50 }
0x1dff   :  { %3309 = vmatmul.mubr.bf16.vlgmr.msra.gmra.mrb[84].mxu1 %v3167_v6 }
0x1e00   :  { %4316 = vmatprep.mubr.msk.bf16.mxu1 %vm4790_vm0, %v4788_v4 }
0x1ed2   :  { %v3310_v7 = vpop.f32.mrb[84].mxu1 }
0x1ed3   :  { %v3311_v49 = vadd.f32 %v3310_v7, %v3189_v0  ;;  %v3312_v10 = vpop.f32.mrb[85].mxu1 }
0x1ed4   :  { %v3313_v12 = vadd.f32 %v3312_v10, %v3193_v13  ;;  %v3314_v25 = vpop.f32.mrb[86].mxu1 }
0x1ed5   :  { %v3319_v39 = vmul.f32 %v3311_v49, %v3311_v49  ;;  %v3315_v15 = vadd.f32 %v3314_v25, %v3189_v0  ;;  %v3316_v19 = vpop.f32.mrb[87].mxu1  ;;  %v4527_v25 = vld [vmem:[#allocation8] sm:$0xff]  }
0x1ed6   :  { %v3320_v46 = vmul.f32 %v3313_v12, %v3313_v12  ;;  %v3317_v48 = vadd.f32 %v3316_v19, %v3193_v13  ;;  %4301 = vmatpush3.bf16.msra.mxu1 %v4527_v25  ;;  %v4532_v19 = vld [vmem:[#allocation8 + $0x28] sm:$0xff]  }
0x1ed7   :  { %v3323_v17 = vmul.f32 %v3319_v39, %v3311_v49  ;;  %v3321_v45 = vmul.f32 %v3315_v15, %v3315_v15  ;;  %4302 = vmatprep.subr.bf16.mxu1 %v4788_v4  ;;  %v4528_v39 = vld [vmem:[#allocation8 + $0x8] sm:$0xff]  }
0x1ed8   :  { %v3324_v21 = vmul.f32 %v3320_v46, %v3313_v12  ;;  %v3322_v57 = vmul.f32 %v3317_v48, %v3317_v48  ;;  %v4533_v46 = vld [vmem:[#allocation8 + $0x30] sm:$0xff]  }
0x1ed9   :  { %v3327_v22 = vmul.f32 0.044715, %v3323_v17  ;;  %v3325_v29 = vmul.f32 %v3321_v45, %v3315_v15 }
0x1eda   :  { %v3328_v24 = vmul.f32 0.044715, %v3324_v21  ;;  %v3326_v59 = vmul.f32 %v3322_v57, %v3317_v48  ;;  %4303 = vmatpush3.bf16.msra.mxu1 %v4528_v39 }
0x1edb   :  { %v3331_v26 = vadd.f32 %v3327_v22, %v3311_v49  ;;  %v3329_v55 = vmul.f32 0.044715, %v3325_v29  ;;  %4304 = vmatprep.subr.bf16.mxu1 %v4788_v4 }
0x1edc   :  { %v3332_v27 = vadd.f32 %v3328_v24, %v3313_v12  ;;  %v3330_v31 = vmul.f32 0.044715, %v3326_v59  ;;  %v1858_v59 = vld [vmem:[#allocation10 + $0x30] ss:$0 sm:$0xff] }
0x1edd   :  { %v3335_v38 = vmul.f32 0.7978846, %v3331_v26  ;;  %v3333_v32 = vadd.f32 %v3329_v55, %v3315_v15 }
0x1ede   :  { %v3336_v33 = vmul.f32 0.7978846, %v3332_v27  ;;  %v3334_v34 = vadd.f32 %v3330_v31, %v3317_v48  ;;  %v1859_v27 = vld [vmem:[#allocation10 + $0x31] ss:$0 sm:$0xff] }
0x1edf   :  { %4623 = vtanh.f32 %v3335_v38  ;;  %v3337_v35 = vmul.f32 0.7978846, %v3333_v32 }
0x1ee0   :  { %4625 = vtanh.f32 %v3336_v33  ;;  %v3338_v52 = vmul.f32 0.7978846, %v3334_v34 }
0x1ee1   :  { %4627 = vtanh.f32 %v3337_v35 }
0x1ee2   :  { %4629 = vtanh.f32 %v3338_v52 }
0x1ee9   :  { %v4624_v30 = vpop.eup %4623 }
0x1eea   :  { %v4626_v36 = vpop.eup %4625  ;;  %v3343_v37 = vadd.f32 1.0, %v4624_v30 }
0x1eeb   :  { %v4628_v23 = vpop.eup %4627  ;;  %v3344_v40 = vadd.f32 1.0, %v4626_v36 }
0x1eec   :  { %v4630_v41 = vpop.eup %4629  ;;  %v3347_v9 = vmul.f32 0.5, %v3343_v37  ;;  %v3345_v42 = vadd.f32 1.0, %v4628_v23 }
0x1eed   :  { %v3346_v43 = vadd.f32 1.0, %v4630_v41  ;;  %v3348_v5 = vmul.f32 0.5, %v3344_v40  ;;  %v3573_v40 = vld [vmem:[#allocation10 + $0x32] ss:$0 sm:$0xff] }
0x1eee   :  { %v3349_v44 = vmul.f32 0.5, %v3345_v42  ;;  %v3351_v11 = vmul.f32 %v3347_v9, %v3311_v49 }
0x1eef   :  { %v3350_v8 = vmul.f32 0.5, %v3346_v43  ;;  %v3352_v14 = vmul.f32 %v3348_v5, %v3313_v12 }
0x1ef0   :  { %v3353_v6 = vmul.f32 %v3349_v44, %v3315_v15  ;;  %v4531_v15 = vld [vmem:[#allocation8 + $0x20] sm:$0xff]  }
0x1ef1   :  { %v3354_v28 = vmul.f32 %v3350_v8, %v3317_v48  ;;  %v4534_v48 = vld [vmem:[#allocation8 + $0x38] sm:$0xff]  }
0x1ef2   :  { %v3355_v20 = vpack.c.bf16 %v3353_v6, %v3351_v11 }
0x1ef3   :  { %v3356_v54 = vpack.c.bf16 %v3354_v28, %v3352_v14 }
0x1ef5   :  { %3518 = vmatprep.mubr.bf16.mxu0 %v3356_v54 }
0x1ef6   :  { %3519 = vmatmul.mubr.bf16.vlgmr.msra.gmra.mrb[76].mxu0 %v3355_v20 }
0x1fc9   :  { %v4013_v16 = vpop.f32.mrb[76].mxu0 }
0x1fca   :  { %v4014_v58 = vpop.f32.mrb[77].mxu0 }
0x1fcb   :  { %v4015_v60 = vadd.f32 %v4014_v58, %v4013_v16  ;;  %v4016_v61 = vpop.f32.mrb[78].mxu0 }
0x1fcc   :  { %v4017_v62 = vpop.f32.mrb[79].mxu0 }
0x1fcd   :  { %v3521_v18 = vadd.f32 %v4015_v60, %v1857_v53  ;;  %v4018_v56 = vadd.f32 %v4017_v62, %v4016_v61 }
0x1fcf   :  { %v3524_v63 = vadd.f32 %v4018_v56, %v1857_v53  ;;  %v3527_v1 = vadd.f32 %v3521_v18, %v5496_v50  ;;  %v4529_v50 = vld [vmem:[#allocation8 + $0x10] sm:$0xff]  }
0x1fd0   :  { %4305 = vmatpush3.bf16.msra.mxu1 %v4529_v50 }
0x1fd1   :  { %3529 = vadd.xlane.f32.xlu1 %v3527_v1  ;;  %v3528_v2 = vadd.f32 %v3524_v63, %v5498_v51  ;;  %4306 = vmatprep.subr.bf16.mxu1 %v4788_v4  ;;  %v4530_v51 = vld [vmem:[#allocation8 + $0x18] sm:$0xff]  }
0x1fd3   :  { %3531 = vadd.xlane.f32.xlu0 %v3528_v2 }
0x1fd4   :  { %4307 = vmatpush3.bf16.msra.mxu1 %v4530_v51 }
0x1fd5   :  { %4308 = vmatprep.subr.bf16.mxu1 %v4788_v4 }
0x1fd8   :  { %4309 = vmatpush3.bf16.msra.mxu1 %v4531_v15 }
0x1fd9   :  { %4310 = vmatprep.subr.bf16.mxu1 %v4788_v4 }
0x1fdc   :  { %4311 = vmatpush3.bf16.msra.mxu1 %v4532_v19 }
0x1fdd   :  { %4312 = vmatprep.subr.bf16.mxu1 %v4788_v4 }
0x1fe0   :  { %4313 = vmatpush3.bf16.msra.mxu1 %v4533_v46 }
0x1fe1   :  { %4314 = vmatprep.subr.bf16.mxu1 %v4788_v4 }
0x1fe4   :  { %4315 = vmatpush3.bf16.msra.mxu1 %v4534_v48 }
0x205e   :  { %v3530_v47 = vpop.xlane.xlu1 %3529 }
0x205f   :  { %v3533_v3 = vmul.f32 0.0078125, %v3530_v47 }
0x2060   :  { %v3532_v0 = vpop.xlane.xlu0 %3531 }
0x2061   :  { %v3535_v13 = vsub.f32 %v3527_v1, %v3533_v3  ;;  %v3534_v7 = vmul.f32 0.0078125, %v3532_v0 }
0x2063   :  { %v3536_v49 = vsub.f32 %v3528_v2, %v3534_v7  ;;  %v3537_v10 = vmul.f32 %v3535_v13, %v3535_v13 }
0x2065   :  { %3539 = vadd.xlane.f32.xlu1 %v3537_v10  ;;  %v3538_v12 = vmul.f32 %v3536_v49, %v3536_v49 }
0x2067   :  { %3541 = vadd.xlane.f32.xlu0 %v3538_v12 }
0x20f2   :  { %v3540_v17 = vpop.xlane.xlu1 %3539 }
0x20f3   :  { %v3543_v45 = vmul.f32 0.0078125, %v3540_v17 }
0x20f4   :  { %v3542_v21 = vpop.xlane.xlu0 %3541 }
0x20f5   :  { %v3545_v57 = vadd.f32 1e-12, %v3543_v45  ;;  %v3544_v22 = vmul.f32 0.0078125, %v3542_v21 }
0x20f7   :  { %4631 = vrsqrt.f32 %v3545_v57  ;;  %v3546_v29 = vadd.f32 1e-12, %v3544_v22 }
0x20f9   :  { %4633 = vrsqrt.f32 %v3546_v29 }
0x2101   :  { %v4632_v24 = vpop.eup %4631 }
0x2102   :  { %v3549_v26 = vmul.f32 %v4632_v24, %v3535_v13 }
0x2103   :  { %v4634_v55 = vpop.eup %4633 }
0x2104   :  { %v3551_v31 = vmul.f32 %v3549_v26, %v1858_v59  ;;  %v3550_v38 = vmul.f32 %v4634_v55, %v3536_v49 }
0x2106   :  { %v3552_v32 = vmul.f32 %v3550_v38, %v1858_v59  ;;  %v3553_v33 = vadd.f32 %v3551_v31, %v1859_v27 }
0x2108   :  { %v3554_v34 = vadd.f32 %v3552_v32, %v1859_v27  ;;  %v3555_v4 = vpack.c.bf16 %v3553_v33, %v3553_v33 }
0x210a   :  { %v3556_v35 = vpack.c.bf16 %v3554_v34, %v3554_v34  ;;  %v3576_v30 = vunpack.c.l.b16 %v3555_v4 }
0x210c   :  { %v3577_v52 = vunpack.c.l.b16 %v3556_v35 }
0x210e   :  { %v3578_v36 = vrot.slane %v3577_v52, 7 }
0x2110   :  { %v3580_v37 = vsel %vm3579_vm6, %v3578_v36, %v3576_v30 }
0x2111   :  { %v3581_v23 = vpack.c.b16 %v3580_v37, %v3580_v37 }
0x2113   :  { %4317 = vmatmul.mubr.bf16.vlgmr.msra.gmra.mrb[88].mxu1 %v3581_v23 }
0x21e6   :  { %v3665_v41 = vpop.f32.mrb[88].mxu1 }
0x21e7   :  { %v3666_v9 = vadd.f32 %v3665_v41, %v3573_v40  ;;  %v4318_v42 = vpop.f32.mrb[89].mxu1 }
0x21e8   :  { %v3668_v43 = vpop.f32.mrb[90].mxu1 }
0x21e9   :  { %3671 = vst [vmem:[#allocation11] sm:$0x3] %v3666_v9  ;;  %v4319_v5 = vpop.f32.mrb[91].mxu1 }
0x21ea   :  { %4758 = shalt.err (!%p4755_p2)
}
0x21eb   :  { %s4759_s16 = scalar_lea.hbm %s5535_s8, 32 }
0x21ec   :  { %p4760_p3 = scmp.ne.s32.totalorder %s5535_s8, %s4759_s16  ;;  %p4763_p4 = scmp.lt.u32.totalorder %s4759_s16, %s5535_s8 }
0x21ee   :  { %p4765_p5 = pnand %p4763_p4, %p4760_p3 }
0x21f0   :  { %4768 = shalt.err (!%p4765_p5)
}
0x21f1   :  { %3681 = dma.vmem_to_hbm [thread:$0]  %s3679_s9, 32, %s5535_s8, [#allocation4]  }
0x21f2   :  { %4775 = dma.done.wait [#allocation4], 32  }
0x21f3   :  { %4776 = vsyncadd [#allocation4], 4294967264 }
0x21f4   :  { %3685 = vsyncpa [#allocation3], 1 }
0x21f5   :  { %3686 = vsyncpa [#allocation6], 1 }
0x21f6   :  { %3687 = vsyncpa [#allocation9], 1 }
0x21f7   :  { %3688 = vsyncpa [#allocation4], 1 }

</bundles_post_ra>
